<compile_context>
chip_gen: v7x
topology: tpu7x:2x2x1
jax: 0.10.0
libtpu: 0.0.40
codegen_flags: <defaults>
</compile_context>

<pallas_src>
import functools
import math

import jax
import jax.numpy as jnp
from jax.experimental import pallas as pl
from jax.experimental.pallas import tpu as pltpu


def _round_up(x, m):
    return (x + m - 1) // m * m


# -------------------------------------------------------------------------
# Grouped matmul kernel (the only MXU kernel): for every conv / convT layer
#   out[g] = act_out( A[g] @ W[g] + bias ),  g = 0..G-1
# with optional fused per-channel sum / sum-of-squares (BatchNorm stats)
# accumulated over the g and i (row-tile) grid axes into resident outputs.
# -------------------------------------------------------------------------
def _mm_kernel(*refs, act_out, emit_stats, m_valid, tm):
    if emit_stats:
        a_ref, w_ref, b_ref, o_ref, s_ref, ss_ref, acc_ref = refs
    else:
        a_ref, w_ref, b_ref, o_ref, acc_ref = refs
        s_ref = ss_ref = None

    g = pl.program_id(1)
    i = pl.program_id(2)
    k = pl.program_id(3)

    @pl.when(k == 0)
    def _():
        acc_ref[...] = jnp.zeros_like(acc_ref)

    if emit_stats:
        @pl.when((g == 0) & (i == 0) & (k == 0))
        def _():
            s_ref[...] = jnp.zeros_like(s_ref)
            ss_ref[...] = jnp.zeros_like(ss_ref)

    acc_ref[...] += jnp.dot(a_ref[...], w_ref[...],
                            preferred_element_type=jnp.float32)

    @pl.when(k == pl.num_programs(3) - 1)
    def _():
        r = acc_ref[...] + b_ref[...]
        if emit_stats:
            # BN stats on the pre-activation conv output; mask padded rows
            # (padded A rows produce r == bias and must not bias the sums).
            row = jax.lax.broadcasted_iota(jnp.int32, r.shape, 0) + i * tm
            rm = jnp.where(row < m_valid, r, 0.0)
            s_ref[...] += jnp.sum(rm, axis=0, keepdims=True)
            ss_ref[...] += jnp.sum(rm * rm, axis=0, keepdims=True)
        if act_out == "tanh":
            r = jnp.tanh(r)
        elif act_out == "relu":
            r = jnp.maximum(r, 0.0)
        o_ref[...] = r.astype(o_ref.dtype)


def grouped_matmul(a, w, b, *, act_out="none", emit_stats=False,
                   out_dtype=jnp.bfloat16):
    """a: (G, M, K), w: (G, K, N) bf16, b: (N,) f32.

    Returns (y_pad (G, Mp, Np) out_dtype, sum (1, Np) f32|None, sumsq|None)."""
    G, M, K = a.shape
    Gw, Kw, N = w.shape
    assert G == Gw and K == Kw

    # tm multiple of 16 (bf16 sublane packing), up to 512; tn up to 512
    # (usually full N); tk up to 1024.  Tiny layers keep tm = round_up(M,16).
    tm = min(512, _round_up(M, 16))
    tn = min(512, _round_up(N, 128))
    tk = min(1024, _round_up(K, 128))
    Mp, Np, Kp = _round_up(M, tm), _round_up(N, tn), _round_up(K, tk)

    a_p = jnp.pad(a.astype(jnp.bfloat16), ((0, 0), (0, Mp - M), (0, Kp - K)))
    w_p = jnp.pad(w.astype(jnp.bfloat16), ((0, 0), (0, Kp - K), (0, Np - N)))
    b_p = jnp.pad(b.astype(jnp.float32).reshape(1, N), ((0, 0), (0, Np - N)))

    grid = (Np // tn, G, Mp // tm, Kp // tk)

    in_specs = [
        pl.BlockSpec((None, tm, tk), lambda j, g, i, k: (g, i, k)),
        pl.BlockSpec((None, tk, tn), lambda j, g, i, k: (g, k, j)),
        pl.BlockSpec((1, tn), lambda j, g, i, k: (0, j)),
    ]
    out_specs = [pl.BlockSpec((None, tm, tn), lambda j, g, i, k: (g, i, j))]
    out_shape = [jax.ShapeDtypeStruct((G, Mp, Np), out_dtype)]
    if emit_stats:
        out_specs += [pl.BlockSpec((1, tn), lambda j, g, i, k: (0, j)),
                      pl.BlockSpec((1, tn), lambda j, g, i, k: (0, j))]
        out_shape += [jax.ShapeDtypeStruct((1, Np), jnp.float32),
                      jax.ShapeDtypeStruct((1, Np), jnp.float32)]

    # g / i must be sequential when BN stats accumulate across them.
    dims = ("parallel",
            "arbitrary" if emit_stats else "parallel",
            "arbitrary" if emit_stats else "parallel",
            "arbitrary")

    res = pl.pallas_call(
        functools.partial(_mm_kernel, act_out=act_out, emit_stats=emit_stats,
                          m_valid=M, tm=tm),
        grid=grid,
        in_specs=in_specs,
        out_specs=out_specs,
        out_shape=out_shape,
        scratch_shapes=[pltpu.VMEM((tm, tn), jnp.float32)],
        compiler_params=pltpu.CompilerParams(dimension_semantics=dims),
    )(a_p, w_p, b_p)

    if emit_stats:
        y, s, ss = res
        return y, s, ss
    y = res[0] if isinstance(res, (list, tuple)) else res
    return y, None, None


# -------------------------------------------------------------------------
# BatchNorm2d (training-mode batch statistics): stats come fused out of the
# producing matmul; this is the single scale/shift pass on the padded slab.
# -------------------------------------------------------------------------
def _affine_kernel(x_ref, sc_ref, sh_ref, o_ref):
    x = x_ref[...].astype(jnp.float32)
    o_ref[...] = (x * sc_ref[...] + sh_ref[...]).astype(o_ref.dtype)


def bn_affine(y_pad, s, ss, count, gamma, beta, eps=1e-5):
    G, Mp, Np = y_pad.shape
    N = gamma.shape[0]
    mean = s / count
    var = jnp.maximum(ss / count - mean * mean, 0.0)   # f32 + clamp
    g = jnp.pad(gamma.astype(jnp.float32).reshape(1, N), ((0, 0), (0, Np - N)))
    bt = jnp.pad(beta.astype(jnp.float32).reshape(1, N), ((0, 0), (0, Np - N)))
    scale = g * jax.lax.rsqrt(var + eps)
    shift = bt - mean * scale

    x2 = y_pad.reshape(G * Mp, Np)
    tma = 512 if Mp >= 512 else Mp          # Mp is a multiple of 512 when >= 512
    y = pl.pallas_call(
        _affine_kernel,
        grid=((G * Mp) // tma,),
        in_specs=[pl.BlockSpec((tma, Np), lambda i: (i, 0)),
                  pl.BlockSpec((1, Np), lambda i: (0, 0)),
                  pl.BlockSpec((1, Np), lambda i: (0, 0))],
        out_specs=pl.BlockSpec((tma, Np), lambda i: (i, 0)),
        out_shape=jax.ShapeDtypeStruct((G * Mp, Np), y_pad.dtype),
        compiler_params=pltpu.CompilerParams(dimension_semantics=("parallel",)),
    )(x2, scale, shift)
    return y.reshape(G, Mp, Np)


# -------------------------------------------------------------------------
# Conv glue: hoisted activation + im2col (plain JAX, bf16, fused under jit),
# matmul + fused bias/act/BN-stats in Pallas.
# -------------------------------------------------------------------------
def _act(x, kind):
    if kind == "leaky_relu":
        return jnp.where(x >= 0, x, x * 0.2)
    if kind == "relu":
        return jnp.maximum(x, 0)
    return x


def conv4x4_s2(x, pd, *, act_in="none", norm=None):
    """nn.Conv2d(k=4, s=2, p=1), optional preceding activation and BatchNorm."""
    n, h, w, c = x.shape
    cout = pd["b"].shape[0]
    ho, wo = h // 2, w // 2
    M = n * ho * wo

    xa = _act(x, act_in)                      # hoisted pre-activation (1 pass)
    xp = jnp.pad(xa, ((0, 0), (1, 1), (1, 1), (0, 0)))
    cols = [xp[:, kh:kh + 2 * ho:2, kw:kw + 2 * wo:2, :]
            for kh in range(4) for kw in range(4)]
    a = jnp.stack(cols, axis=3).reshape(1, M, 16 * c)    # K order (kh, kw, c)

    y_pad, s, ss = grouped_matmul(a, pd["w"], pd["b"],
                                  emit_stats=(norm is not None))
    if norm is not None:
        y_pad = bn_affine(y_pad, s, ss, M, norm[0], norm[1])
    return y_pad[0, :M, :cout].reshape(n, ho, wo, cout)


# kernel-tap indices per output phase / window offset: _KMAP[r][d] = k index
_KMAP = ((3, 1), (2, 0))


def convT4x4_s2(x, pu, *, act_in="relu", act_out="none", norm=None,
                out_dtype=jnp.bfloat16):
    """nn.ConvTranspose2d(k=4, s=2, p=1) via 4 output phases, one pallas_call."""
    n, h, w, c = x.shape
    cout = pu["b"].shape[0]
    M = n * h * w

    xa = _act(x, act_in)
    xp = jnp.pad(xa, ((0, 0), (1, 1), (1, 1), (0, 0)))
    phases = []
    for ry in range(2):
        for rx in range(2):
            cols = [xp[:, ry + dy:ry + dy + h, rx + dx:rx + dx + w, :]
                    for dy in range(2) for dx in range(2)]
            phases.append(jnp.stack(cols, axis=3).reshape(M, 4 * c))
    a = jnp.stack(phases, axis=0)                         # (4, M, 4c)

    y_pad, s, ss = grouped_matmul(a, pu["w"], pu["b"], act_out=act_out,
                                  emit_stats=(norm is not None),
                                  out_dtype=out_dtype)
    if norm is not None:
        y_pad = bn_affine(y_pad, s, ss, 4 * M, norm[0], norm[1])
    y = y_pad[:, :M, :cout]                               # (4, M, cout)
    # Phase interleave: (ry, rx, n, h, w, c) -> (n, 2h, 2w, c).
    y = jnp.transpose(y.reshape(2, 2, n, h, w, cout), (2, 3, 0, 4, 1, 5))
    return y.reshape(n, 2 * h, 2 * w, cout)


# -------------------------------------------------------------------------
# Parameter construction (PyTorch default-init style) + matmul-ready weights
# -------------------------------------------------------------------------
def _conv_init(key, cin, cout, k=4, transposed=False):
    k1, k2 = jax.random.split(key)
    if transposed:
        shape = (cin, cout, k, k)
        fan_in = cout * k * k          # torch: weight.size(1) * k * k
    else:
        shape = (cout, cin, k, k)
        fan_in = cin * k * k
    bound = 1.0 / math.sqrt(fan_in)
    w = jax.random.uniform(k1, shape, jnp.float32, -bound, bound)
    b = jax.random.uniform(k2, (cout,), jnp.float32, -bound, bound)
    return w, b


def _prep_conv_weight(w):        # (Cout, Cin, 4, 4) -> (1, 16*Cin, Cout) bf16
    cout, cin = w.shape[0], w.shape[1]
    wr = jnp.transpose(w, (2, 3, 1, 0)).reshape(16 * cin, cout)
    return wr.astype(jnp.bfloat16)[None]


def _prep_convT_weight(w):       # (Cin, Cout, 4, 4) -> (4, 4*Cin, Cout) bf16
    cin, cout = w.shape[0], w.shape[1]
    phases = []
    for ry in range(2):
        for rx in range(2):
            sub = w[:, :, _KMAP[ry], :][:, :, :, _KMAP[rx]]   # (Cin,Cout,dy,dx)
            wr = jnp.transpose(sub, (2, 3, 0, 1)).reshape(4 * cin, cout)
            phases.append(wr.astype(jnp.bfloat16))
    return jnp.stack(phases, axis=0)


def build_block(key, outer_nc, inner_nc, submodule=None,
                outermost=False, innermost=False):
    k1, k2 = jax.random.split(key)
    p = {"outermost": outermost, "innermost": innermost, "submodule": submodule}
    dw, db = _conv_init(k1, outer_nc, inner_nc)
    p["down"] = {"w": _prep_conv_weight(dw), "b": db}
    up_in = inner_nc if innermost else inner_nc * 2
    uw, ub = _conv_init(k2, up_in, outer_nc, transposed=True)
    p["up"] = {"w": _prep_convT_weight(uw), "b": ub}
    if not outermost:
        p["upn_g"] = jnp.ones((outer_nc,), jnp.float32)
        p["upn_b"] = jnp.zeros((outer_nc,), jnp.float32)
    if (not outermost) and (not innermost):
        p["dn_g"] = jnp.ones((inner_nc,), jnp.float32)
        p["dn_b"] = jnp.zeros((inner_nc,), jnp.float32)
    return p


def build_unet(key, input_nc, output_nc, num_downs, ngf):
    assert input_nc == output_nc
    keys = iter(jax.random.split(key, num_downs))
    blk = build_block(next(keys), ngf * 8, ngf * 8, innermost=True)
    for _ in range(num_downs - 5):
        blk = build_block(next(keys), ngf * 8, ngf * 8, blk)
    blk = build_block(next(keys), ngf * 4, ngf * 8, blk)
    blk = build_block(next(keys), ngf * 2, ngf * 4, blk)
    blk = build_block(next(keys), ngf, ngf * 2, blk)
    blk = build_block(next(keys), output_nc, ngf, blk, outermost=True)
    return blk


# -------------------------------------------------------------------------
# Forward (mirrors UnetSkipConnectionBlock.forward, transposed=True path)
# -------------------------------------------------------------------------
def block_forward(p, x):
    if p["outermost"]:
        h = conv4x4_s2(x, p["down"], act_in="none", norm=None)        # downconv
        h = block_forward(p["submodule"], h)                          # submodule
        return convT4x4_s2(h, p["up"], act_in="relu", act_out="tanh", # uprelu+upconv+tanh
                           norm=None, out_dtype=jnp.float32)
    if p["innermost"]:
        h = conv4x4_s2(x, p["down"], act_in="leaky_relu", norm=None)  # downrelu+downconv
        u = convT4x4_s2(h, p["up"], act_in="relu",                    # uprelu+upconv+upnorm
                        norm=(p["upn_g"], p["upn_b"]))
        return jnp.concatenate([u, x], axis=-1)                       # skip concat
    h = conv4x4_s2(x, p["down"], act_in="leaky_relu",                 # downrelu+downconv+downnorm
                   norm=(p["dn_g"], p["dn_b"]))
    h = block_forward(p["submodule"], h)                              # submodule
    u = convT4x4_s2(h, p["up"], act_in="relu",                        # uprelu+upconv+upnorm
                    norm=(p["upn_g"], p["upn_b"]))
    return jnp.concatenate([u, x], axis=-1)                           # skip concat


def unet_generator(params, x_nchw):
    x = jnp.transpose(x_nchw, (0, 2, 3, 1)).astype(jnp.bfloat16)  # NCHW -> NHWC bf16
    y = block_forward(params, x)
    return jnp.transpose(y, (0, 3, 1, 2)).astype(jnp.float32)     # NHWC -> NCHW


# -------------------------------------------------------------------------
if __name__ == "__main__":
    key = jax.random.PRNGKey(0)
    kp, kx = jax.random.split(key)

    input_nc = output_nc = 3
    num_downs = 5          # input spatial must be divisible by 2**num_downs
    ngf = 8                # small ngf for the synthetic test (default is 64)

    params = build_unet(kp, input_nc, output_nc, num_downs, ngf)
    x = jax.random.normal(kx, (2, input_nc, 32, 32), jnp.float32)

    forward = jax.jit(lambda inp: unet_generator(params, inp))
    y = forward(x)
    y = jax.block_until_ready(y)

    assert y.shape == (2, output_nc, 32, 32), y.shape
    assert bool(jnp.all(jnp.isfinite(y)))
    assert bool(jnp.all(jnp.abs(y) <= 1.0))  # final Tanh
    print("KERNEL_OK")
</pallas_src>

<mosaic_0001>
module attributes {stable_mosaic.version = 11 : i64} {
  func.func @_mm_kernel(%arg0: i32, %arg1: i32, %arg2: i32, %arg3: i32, %arg4: memref<1x512x128xbf16, #tpu.memory_space<vmem>>, %arg5: memref<1x128x128xbf16, #tpu.memory_space<vmem>>, %arg6: memref<1x128xf32, #tpu.memory_space<vmem>>, %arg7: memref<1x512x128xbf16, #tpu.memory_space<vmem>>, %arg8: memref<512x128xf32, #tpu.memory_space<vmem>>) attributes {dimension_semantics = [#tpu.dimension_semantics<parallel>, #tpu.dimension_semantics<parallel>, #tpu.dimension_semantics<parallel>, #tpu.dimension_semantics<arbitrary>], iteration_bounds = array<i64: 1, 1, 1, 1>, scalar_prefetch = 0 : i64, scratch_operands = 1 : i64, tpu.core_type = #tpu.core_type<tc>, window_params = [{transform_indices = @transform_0, window_bounds = array<i64: 1, 512, 128>}, {transform_indices = @transform_1, window_bounds = array<i64: 1, 128, 128>}, {transform_indices = @transform_2, window_bounds = array<i64: 1, 128>}, {transform_indices = @transform_3, window_bounds = array<i64: 1, 512, 128>}]} {
    %c0_i32 = arith.constant 0 : i32
    %0 = arith.cmpi eq, %arg3, %c0_i32 : i32
    %1 = arith.extui %0 : i1 to i32
    %c0_i32_0 = arith.constant 0 : i32
    %2 = arith.cmpi ne, %1, %c0_i32_0 : i32
    scf.if %2 {
      %cst_12 = arith.constant 0.000000e+00 : f32
      %14 = vector.broadcast %cst_12 : f32 to vector<512x128xf32>
      %c0_13 = arith.constant 0 : index
      %c0_14 = arith.constant 0 : index
      %15 = vector.load %arg8[%c0_13, %c0_14] : memref<512x128xf32, #tpu.memory_space<vmem>>, vector<512x128xf32>
      tpu.vector_store %arg8[%c0_13, %c0_14], %14 {strides = array<i32>} : memref<512x128xf32, #tpu.memory_space<vmem>>, vector<512x128xf32>,
    } else {
    }
    %c0 = arith.constant 0 : index
    %c0_1 = arith.constant 0 : index
    %3 = vector.load %arg8[%c0, %c0_1] : memref<512x128xf32, #tpu.memory_space<vmem>>, vector<512x128xf32>
    %c0_2 = arith.constant 0 : index
    %c0_3 = arith.constant 0 : index
    %c0_4 = arith.constant 0 : index
    %4 = vector.load %arg4[%c0_2, %c0_3, %c0_4] : memref<1x512x128xbf16, #tpu.memory_space<vmem>>, vector<1x512x128xbf16>
    %5 = vector.shape_cast %4 : vector<1x512x128xbf16> to vector<512x128xbf16>
    %c0_5 = arith.constant 0 : index
    %c0_6 = arith.constant 0 : index
    %c0_7 = arith.constant 0 : index
    %6 = vector.load %arg5[%c0_5, %c0_6, %c0_7] : memref<1x128x128xbf16, #tpu.memory_space<vmem>>, vector<1x128x128xbf16>
    %7 = vector.shape_cast %6 : vector<1x128x128xbf16> to vector<128x128xbf16>
    %cst = arith.constant dense<0.000000e+00> : vector<512x128xf32>
    %8 = tpu.matmul %5, %7, %cst {dimension_numbers = #tpu.dot_dimension_numbers<[1], [0], [0], [1], [0, 0, 1, 1], [], []>} : vector<512x128xbf16>, vector<128x128xbf16>, vector<512x128xf32> -> vector<512x128xf32>
    %9 = arith.addf %3, %8 : vector<512x128xf32>
    %c0_8 = arith.constant 0 : index
    %c0_9 = arith.constant 0 : index
    %10 = vector.load %arg8[%c0_8, %c0_9] : memref<512x128xf32, #tpu.memory_space<vmem>>, vector<512x128xf32>
    tpu.vector_store %arg8[%c0_8, %c0_9], %9 {strides = array<i32>} : memref<512x128xf32, #tpu.memory_space<vmem>>, vector<512x128xf32>,
    %c0_i32_10 = arith.constant 0 : i32
    %11 = arith.cmpi eq, %arg3, %c0_i32_10 : i32
    %12 = arith.extui %11 : i1 to i32
    %c0_i32_11 = arith.constant 0 : i32
    %13 = arith.cmpi ne, %12, %c0_i32_11 : i32
    scf.if %13 {
      %c0_12 = arith.constant 0 : index
      %c0_13 = arith.constant 0 : index
      %14 = vector.load %arg8[%c0_12, %c0_13] : memref<512x128xf32, #tpu.memory_space<vmem>>, vector<512x128xf32>
      %c0_14 = arith.constant 0 : index
      %c0_15 = arith.constant 0 : index
      %15 = vector.load %arg6[%c0_14, %c0_15] : memref<1x128xf32, #tpu.memory_space<vmem>>, vector<1x128xf32>
      %16 = vector.broadcast %15 : vector<1x128xf32> to vector<512x128xf32>
      %17 = arith.addf %14, %16 : vector<512x128xf32>
      %18 = arith.truncf %17 : vector<512x128xf32> to vector<512x128xbf16>
      %c0_16 = arith.constant 0 : index
      %c0_17 = arith.constant 0 : index
      %c0_18 = arith.constant 0 : index
      %19 = vector.load %arg7[%c0_16, %c0_17, %c0_18] : memref<1x512x128xbf16, #tpu.memory_space<vmem>>, vector<1x512x128xbf16>
      %20 = vector.shape_cast %19 : vector<1x512x128xbf16> to vector<512x128xbf16>
      %21 = vector.shape_cast %18 : vector<512x128xbf16> to vector<1x512x128xbf16>
      tpu.vector_store %arg7[%c0_16, %c0_17, %c0_18], %21 {strides = array<i32>} : memref<1x512x128xbf16, #tpu.memory_space<vmem>>, vector<1x512x128xbf16>,
    } else {
    }
    return
  }
  func.func @transform_0(%arg0: i32, %arg1: i32, %arg2: i32, %arg3: i32) -> (i32, i32, i32) {
    %c0_i32 = arith.constant 0 : i32
    return %arg1, %arg2, %arg3 : i32, i32, i32
  }
  func.func @transform_1(%arg0: i32, %arg1: i32, %arg2: i32, %arg3: i32) -> (i32, i32, i32) {
    %c0_i32 = arith.constant 0 : i32
    return %arg1, %arg3, %arg0 : i32, i32, i32
  }
  func.func @transform_2(%arg0: i32, %arg1: i32, %arg2: i32, %arg3: i32) -> (i32, i32) {
    %c0_i32 = arith.constant 0 : i32
    %c0_i32_0 = arith.constant 0 : i32
    return %c0_i32, %arg0 : i32, i32
  }
  func.func @transform_3(%arg0: i32, %arg1: i32, %arg2: i32, %arg3: i32) -> (i32, i32, i32) {
    %c0_i32 = arith.constant 0 : i32
    return %arg1, %arg2, %arg0 : i32, i32, i32
  }
}

module attributes {stable_mosaic.version = 11 : i64} {
  func.func @_mm_kernel(%arg0: i32, %arg1: i32, %arg2: i32, %arg3: i32, %arg4: memref<1x128x128xbf16, #tpu.memory_space<vmem>>, %arg5: memref<1x128x128xbf16, #tpu.memory_space<vmem>>, %arg6: memref<1x128xf32, #tpu.memory_space<vmem>>, %arg7: memref<1x128x128xbf16, #tpu.memory_space<vmem>>, %arg8: memref<1x128xf32, #tpu.memory_space<vmem>>, %arg9: memref<1x128xf32, #tpu.memory_space<vmem>>, %arg10: memref<128x128xf32, #tpu.memory_space<vmem>>) attributes {dimension_semantics = [#tpu.dimension_semantics<parallel>, #tpu.dimension_semantics<arbitrary>, #tpu.dimension_semantics<arbitrary>, #tpu.dimension_semantics<arbitrary>], iteration_bounds = array<i64: 1, 1, 1, 1>, scalar_prefetch = 0 : i64, scratch_operands = 1 : i64, tpu.core_type = #tpu.core_type<tc>, window_params = [{transform_indices = @transform_0, window_bounds = array<i64: 1, 128, 128>}, {transform_indices = @transform_1, window_bounds = array<i64: 1, 128, 128>}, {transform_indices = @transform_2, window_bounds = array<i64: 1, 128>}, {transform_indices = @transform_3, window_bounds = array<i64: 1, 128, 128>}, {transform_indices = @transform_4, window_bounds = array<i64: 1, 128>}, {transform_indices = @transform_5, window_bounds = array<i64: 1, 128>}]} {
    %c0_i32 = arith.constant 0 : i32
    %0 = arith.cmpi eq, %arg3, %c0_i32 : i32
    %1 = arith.extui %0 : i1 to i32
    %c0_i32_0 = arith.constant 0 : i32
    %2 = arith.cmpi ne, %1, %c0_i32_0 : i32
    scf.if %2 {
      %cst_16 = arith.constant 0.000000e+00 : f32
      %21 = vector.broadcast %cst_16 : f32 to vector<128x128xf32>
      %c0_17 = arith.constant 0 : index
      %c0_18 = arith.constant 0 : index
      %22 = vector.load %arg10[%c0_17, %c0_18] : memref<128x128xf32, #tpu.memory_space<vmem>>, vector<128x128xf32>
      tpu.vector_store %arg10[%c0_17, %c0_18], %21 {strides = array<i32>} : memref<128x128xf32, #tpu.memory_space<vmem>>, vector<128x128xf32>,
    } else {
    }
    %c0_i32_1 = arith.constant 0 : i32
    %3 = arith.cmpi eq, %arg1, %c0_i32_1 : i32
    %c0_i32_2 = arith.constant 0 : i32
    %4 = arith.cmpi eq, %arg2, %c0_i32_2 : i32
    %5 = arith.andi %3, %4 : i1
    %c0_i32_3 = arith.constant 0 : i32
    %6 = arith.cmpi eq, %arg3, %c0_i32_3 : i32
    %7 = arith.andi %5, %6 : i1
    %8 = arith.extui %7 : i1 to i32
    %c0_i32_4 = arith.constant 0 : i32
    %9 = arith.cmpi ne, %8, %c0_i32_4 : i32
    scf.if %9 {
      %cst_16 = arith.constant 0.000000e+00 : f32
      %21 = vector.broadcast %cst_16 : f32 to vector<1x128xf32>
      %c0_17 = arith.constant 0 : index
      %c0_18 = arith.constant 0 : index
      %22 = vector.load %arg8[%c0_17, %c0_18] : memref<1x128xf32, #tpu.memory_space<vmem>>, vector<1x128xf32>
      tpu.vector_store %arg8[%c0_17, %c0_18], %21 {strides = array<i32>} : memref<1x128xf32, #tpu.memory_space<vmem>>, vector<1x128xf32>,
      %cst_19 = arith.constant 0.000000e+00 : f32
      %23 = vector.broadcast %cst_19 : f32 to vector<1x128xf32>
      %c0_20 = arith.constant 0 : index
      %c0_21 = arith.constant 0 : index
      %24 = vector.load %arg9[%c0_20, %c0_21] : memref<1x128xf32, #tpu.memory_space<vmem>>, vector<1x128xf32>
      tpu.vector_store %arg9[%c0_20, %c0_21], %23 {strides = array<i32>} : memref<1x128xf32, #tpu.memory_space<vmem>>, vector<1x128xf32>,
    } else {
    }
    %c0 = arith.constant 0 : index
    %c0_5 = arith.constant 0 : index
    %10 = vector.load %arg10[%c0, %c0_5] : memref<128x128xf32, #tpu.memory_space<vmem>>, vector<128x128xf32>
    %c0_6 = arith.constant 0 : index
    %c0_7 = arith.constant 0 : index
    %c0_8 = arith.constant 0 : index
    %11 = vector.load %arg4[%c0_6, %c0_7, %c0_8] : memref<1x128x128xbf16, #tpu.memory_space<vmem>>, vector<1x128x128xbf16>
    %12 = vector.shape_cast %11 : vector<1x128x128xbf16> to vector<128x128xbf16>
    %c0_9 = arith.constant 0 : index
    %c0_10 = arith.constant 0 : index
    %c0_11 = arith.constant 0 : index
    %13 = vector.load %arg5[%c0_9, %c0_10, %c0_11] : memref<1x128x128xbf16, #tpu.memory_space<vmem>>, vector<1x128x128xbf16>
    %14 = vector.shape_cast %13 : vector<1x128x128xbf16> to vector<128x128xbf16>
    %cst = arith.constant dense<0.000000e+00> : vector<128x128xf32>
    %15 = tpu.matmul %12, %14, %cst {dimension_numbers = #tpu.dot_dimension_numbers<[1], [0], [0], [1], [0, 0, 1, 1], [], []>} : vector<128x128xbf16>, vector<128x128xbf16>, vector<128x128xf32> -> vector<128x128xf32>
    %16 = arith.addf %10, %15 : vector<128x128xf32>
    %c0_12 = arith.constant 0 : index
    %c0_13 = arith.constant 0 : index
    %17 = vector.load %arg10[%c0_12, %c0_13] : memref<128x128xf32, #tpu.memory_space<vmem>>, vector<128x128xf32>
    tpu.vector_store %arg10[%c0_12, %c0_13], %16 {strides = array<i32>} : memref<128x128xf32, #tpu.memory_space<vmem>>, vector<128x128xf32>,
    %c0_i32_14 = arith.constant 0 : i32
    %18 = arith.cmpi eq, %arg3, %c0_i32_14 : i32
    %19 = arith.extui %18 : i1 to i32
    %c0_i32_15 = arith.constant 0 : i32
    %20 = arith.cmpi ne, %19, %c0_i32_15 : i32
    scf.if %20 {
      %c0_16 = arith.constant 0 : index
      %c0_17 = arith.constant 0 : index
      %21 = vector.load %arg10[%c0_16, %c0_17] : memref<128x128xf32, #tpu.memory_space<vmem>>, vector<128x128xf32>
      %c0_18 = arith.constant 0 : index
      %c0_19 = arith.constant 0 : index
      %22 = vector.load %arg6[%c0_18, %c0_19] : memref<1x128xf32, #tpu.memory_space<vmem>>, vector<1x128xf32>
      %23 = vector.broadcast %22 : vector<1x128xf32> to vector<128x128xf32>
      %24 = arith.addf %21, %23 : vector<128x128xf32>
      %25 = tpu.iota {dimensions = array<i32: 0>} : vector<128x128xi32>
      %c128_i32 = arith.constant 128 : i32
      %26 = arith.muli %arg2, %c128_i32 : i32
      %27 = vector.broadcast %26 : i32 to vector<128x128xi32>
      %28 = arith.addi %25, %27 : vector<128x128xi32>
      %c128_i32_20 = arith.constant 128 : i32
      %29 = vector.broadcast %c128_i32_20 : i32 to vector<128x128xi32>
      %30 = arith.cmpi slt, %28, %29 : vector<128x128xi32>
      %cst_21 = arith.constant 0.000000e+00 : f32
      %31 = vector.broadcast %cst_21 : f32 to vector<128x128xf32>
      %32 = arith.select %30, %24, %31 : vector<128x128xi1>, vector<128x128xf32>
      %c0_22 = arith.constant 0 : index
      %c0_23 = arith.constant 0 : index
      %33 = vector.load %arg8[%c0_22, %c0_23] : memref<1x128xf32, #tpu.memory_space<vmem>>, vector<1x128xf32>
      %cst_24 = arith.constant dense<0.000000e+00> : vector<128xf32>
      %34 = vector.multi_reduction <add>, %32, %cst_24 [0] : vector<128x128xf32> to vector<128xf32>
      %35 = vector.shape_cast %34 : vector<128xf32> to vector<1x128xf32>
      %36 = arith.addf %33, %35 : vector<1x128xf32>
      %c0_25 = arith.constant 0 : index
      %c0_26 = arith.constant 0 : index
      %37 = vector.load %arg8[%c0_25, %c0_26] : memref<1x128xf32, #tpu.memory_space<vmem>>, vector<1x128xf32>
      tpu.vector_store %arg8[%c0_25, %c0_26], %36 {strides = array<i32>} : memref<1x128xf32, #tpu.memory_space<vmem>>, vector<1x128xf32>,
      %c0_27 = arith.constant 0 : index
      %c0_28 = arith.constant 0 : index
      %38 = vector.load %arg9[%c0_27, %c0_28] : memref<1x128xf32, #tpu.memory_space<vmem>>, vector<1x128xf32>
      %39 = arith.mulf %32, %32 : vector<128x128xf32>
      %cst_29 = arith.constant dense<0.000000e+00> : vector<128xf32>
      %40 = vector.multi_reduction <add>, %39, %cst_29 [0] : vector<128x128xf32> to vector<128xf32>
      %41 = vector.shape_cast %40 : vector<128xf32> to vector<1x128xf32>
      %42 = arith.addf %38, %41 : vector<1x128xf32>
      %c0_30 = arith.constant 0 : index
      %c0_31 = arith.constant 0 : index
      %43 = vector.load %arg9[%c0_30, %c0_31] : memref<1x128xf32, #tpu.memory_space<vmem>>, vector<1x128xf32>
      tpu.vector_store %arg9[%c0_30, %c0_31], %42 {strides = array<i32>} : memref<1x128xf32, #tpu.memory_space<vmem>>, vector<1x128xf32>,
      %44 = arith.truncf %24 : vector<128x128xf32> to vector<128x128xbf16>
      %c0_32 = arith.constant 0 : index
      %c0_33 = arith.constant 0 : index
      %c0_34 = arith.constant 0 : index
      %45 = vector.load %arg7[%c0_32, %c0_33, %c0_34] : memref<1x128x128xbf16, #tpu.memory_space<vmem>>, vector<1x128x128xbf16>
      %46 = vector.shape_cast %45 : vector<1x128x128xbf16> to vector<128x128xbf16>
      %47 = vector.shape_cast %44 : vector<128x128xbf16> to vector<1x128x128xbf16>
      tpu.vector_store %arg7[%c0_32, %c0_33, %c0_34], %47 {strides = array<i32>} : memref<1x128x128xbf16, #tpu.memory_space<vmem>>, vector<1x128x128xbf16>,
    } else {
    }
    return
  }
  func.func @transform_0(%arg0: i32, %arg1: i32, %arg2: i32, %arg3: i32) -> (i32, i32, i32) {
    %c0_i32 = arith.constant 0 : i32
    return %arg1, %arg2, %arg3 : i32, i32, i32
  }
  func.func @transform_1(%arg0: i32, %arg1: i32, %arg2: i32, %arg3: i32) -> (i32, i32, i32) {
    %c0_i32 = arith.constant 0 : i32
    return %arg1, %arg3, %arg0 : i32, i32, i32
  }
  func.func @transform_2(%arg0: i32, %arg1: i32, %arg2: i32, %arg3: i32) -> (i32, i32) {
    %c0_i32 = arith.constant 0 : i32
    %c0_i32_0 = arith.constant 0 : i32
    return %c0_i32, %arg0 : i32, i32
  }
  func.func @transform_3(%arg0: i32, %arg1: i32, %arg2: i32, %arg3: i32) -> (i32, i32, i32) {
    %c0_i32 = arith.constant 0 : i32
    return %arg1, %arg2, %arg0 : i32, i32, i32
  }
  func.func @transform_4(%arg0: i32, %arg1: i32, %arg2: i32, %arg3: i32) -> (i32, i32) {
    %c0_i32 = arith.constant 0 : i32
    %c0_i32_0 = arith.constant 0 : i32
    return %c0_i32, %arg0 : i32, i32
  }
  func.func @transform_5(%arg0: i32, %arg1: i32, %arg2: i32, %arg3: i32) -> (i32, i32) {
    %c0_i32 = arith.constant 0 : i32
    %c0_i32_0 = arith.constant 0 : i32
    return %c0_i32, %arg0 : i32, i32
  }
}

module attributes {stable_mosaic.version = 11 : i64} {
  func.func @_affine_kernel(%arg0: i32, %arg1: memref<128x128xbf16, #tpu.memory_space<vmem>>, %arg2: memref<1x128xf32, #tpu.memory_space<vmem>>, %arg3: memref<1x128xf32, #tpu.memory_space<vmem>>, %arg4: memref<128x128xbf16, #tpu.memory_space<vmem>>) attributes {dimension_semantics = [#tpu.dimension_semantics<parallel>], iteration_bounds = array<i64: 1>, scalar_prefetch = 0 : i64, scratch_operands = 0 : i64, tpu.core_type = #tpu.core_type<tc>, window_params = [{transform_indices = @transform_0, window_bounds = array<i64: 128, 128>}, {pipeline_mode = #tpu.pipeline_mode<synchronous>, transform_indices = @transform_1, window_bounds = array<i64: 1, 128>}, {pipeline_mode = #tpu.pipeline_mode<synchronous>, transform_indices = @transform_2, window_bounds = array<i64: 1, 128>}, {transform_indices = @transform_3, window_bounds = array<i64: 128, 128>}]} {
    %c0 = arith.constant 0 : index
    %c0_0 = arith.constant 0 : index
    %0 = vector.load %arg1[%c0, %c0_0] : memref<128x128xbf16, #tpu.memory_space<vmem>>, vector<128x128xbf16>
    %1 = arith.extf %0 : vector<128x128xbf16> to vector<128x128xf32>
    %c0_1 = arith.constant 0 : index
    %c0_2 = arith.constant 0 : index
    %2 = vector.load %arg2[%c0_1, %c0_2] : memref<1x128xf32, #tpu.memory_space<vmem>>, vector<1x128xf32>
    %3 = vector.broadcast %2 : vector<1x128xf32> to vector<128x128xf32>
    %4 = arith.mulf %1, %3 : vector<128x128xf32>
    %c0_3 = arith.constant 0 : index
    %c0_4 = arith.constant 0 : index
    %5 = vector.load %arg3[%c0_3, %c0_4] : memref<1x128xf32, #tpu.memory_space<vmem>>, vector<1x128xf32>
    %6 = vector.broadcast %5 : vector<1x128xf32> to vector<128x128xf32>
    %7 = arith.addf %4, %6 : vector<128x128xf32>
    %8 = arith.truncf %7 : vector<128x128xf32> to vector<128x128xbf16>
    %c0_5 = arith.constant 0 : index
    %c0_6 = arith.constant 0 : index
    %9 = vector.load %arg4[%c0_5, %c0_6] : memref<128x128xbf16, #tpu.memory_space<vmem>>, vector<128x128xbf16>
    tpu.vector_store %arg4[%c0_5, %c0_6], %8 {strides = array<i32>} : memref<128x128xbf16, #tpu.memory_space<vmem>>, vector<128x128xbf16>,
    return
  }
  func.func @transform_0(%arg0: i32) -> (i32, i32) {
    %c0_i32 = arith.constant 0 : i32
    %c0_i32_0 = arith.constant 0 : i32
    return %arg0, %c0_i32 : i32, i32
  }
  func.func @transform_1(%arg0: i32) -> (i32, i32) {
    %c0_i32 = arith.constant 0 : i32
    %c0_i32_0 = arith.constant 0 : i32
    %c0_i32_1 = arith.constant 0 : i32
    return %c0_i32, %c0_i32_0 : i32, i32
  }
  func.func @transform_2(%arg0: i32) -> (i32, i32) {
    %c0_i32 = arith.constant 0 : i32
    %c0_i32_0 = arith.constant 0 : i32
    %c0_i32_1 = arith.constant 0 : i32
    return %c0_i32, %c0_i32_0 : i32, i32
  }
  func.func @transform_3(%arg0: i32) -> (i32, i32) {
    %c0_i32 = arith.constant 0 : i32
    %c0_i32_0 = arith.constant 0 : i32
    return %arg0, %c0_i32 : i32, i32
  }
}

module attributes {stable_mosaic.version = 11 : i64} {
  func.func @_mm_kernel(%arg0: i32, %arg1: i32, %arg2: i32, %arg3: i32, %arg4: memref<1x32x256xbf16, #tpu.memory_space<vmem>>, %arg5: memref<1x256x128xbf16, #tpu.memory_space<vmem>>, %arg6: memref<1x128xf32, #tpu.memory_space<vmem>>, %arg7: memref<1x32x128xbf16, #tpu.memory_space<vmem>>, %arg8: memref<1x128xf32, #tpu.memory_space<vmem>>, %arg9: memref<1x128xf32, #tpu.memory_space<vmem>>, %arg10: memref<32x128xf32, #tpu.memory_space<vmem>>) attributes {dimension_semantics = [#tpu.dimension_semantics<parallel>, #tpu.dimension_semantics<arbitrary>, #tpu.dimension_semantics<arbitrary>, #tpu.dimension_semantics<arbitrary>], iteration_bounds = array<i64: 1, 1, 1, 1>, scalar_prefetch = 0 : i64, scratch_operands = 1 : i64, tpu.core_type = #tpu.core_type<tc>, window_params = [{transform_indices = @transform_0, window_bounds = array<i64: 1, 32, 256>}, {transform_indices = @transform_1, window_bounds = array<i64: 1, 256, 128>}, {transform_indices = @transform_2, window_bounds = array<i64: 1, 128>}, {transform_indices = @transform_3, window_bounds = array<i64: 1, 32, 128>}, {transform_indices = @transform_4, window_bounds = array<i64: 1, 128>}, {transform_indices = @transform_5, window_bounds = array<i64: 1, 128>}]} {
    %c0_i32 = arith.constant 0 : i32
    %0 = arith.cmpi eq, %arg3, %c0_i32 : i32
    %1 = arith.extui %0 : i1 to i32
    %c0_i32_0 = arith.constant 0 : i32
    %2 = arith.cmpi ne, %1, %c0_i32_0 : i32
    scf.if %2 {
      %cst_16 = arith.constant 0.000000e+00 : f32
      %21 = vector.broadcast %cst_16 : f32 to vector<32x128xf32>
      %c0_17 = arith.constant 0 : index
      %c0_18 = arith.constant 0 : index
      %22 = vector.load %arg10[%c0_17, %c0_18] : memref<32x128xf32, #tpu.memory_space<vmem>>, vector<32x128xf32>
      tpu.vector_store %arg10[%c0_17, %c0_18], %21 {strides = array<i32>} : memref<32x128xf32, #tpu.memory_space<vmem>>, vector<32x128xf32>,
    } else {
    }
    %c0_i32_1 = arith.constant 0 : i32
    %3 = arith.cmpi eq, %arg1, %c0_i32_1 : i32
    %c0_i32_2 = arith.constant 0 : i32
    %4 = arith.cmpi eq, %arg2, %c0_i32_2 : i32
    %5 = arith.andi %3, %4 : i1
    %c0_i32_3 = arith.constant 0 : i32
    %6 = arith.cmpi eq, %arg3, %c0_i32_3 : i32
    %7 = arith.andi %5, %6 : i1
    %8 = arith.extui %7 : i1 to i32
    %c0_i32_4 = arith.constant 0 : i32
    %9 = arith.cmpi ne, %8, %c0_i32_4 : i32
    scf.if %9 {
      %cst_16 = arith.constant 0.000000e+00 : f32
      %21 = vector.broadcast %cst_16 : f32 to vector<1x128xf32>
      %c0_17 = arith.constant 0 : index
      %c0_18 = arith.constant 0 : index
      %22 = vector.load %arg8[%c0_17, %c0_18] : memref<1x128xf32, #tpu.memory_space<vmem>>, vector<1x128xf32>
      tpu.vector_store %arg8[%c0_17, %c0_18], %21 {strides = array<i32>} : memref<1x128xf32, #tpu.memory_space<vmem>>, vector<1x128xf32>,
      %cst_19 = arith.constant 0.000000e+00 : f32
      %23 = vector.broadcast %cst_19 : f32 to vector<1x128xf32>
      %c0_20 = arith.constant 0 : index
      %c0_21 = arith.constant 0 : index
      %24 = vector.load %arg9[%c0_20, %c0_21] : memref<1x128xf32, #tpu.memory_space<vmem>>, vector<1x128xf32>
      tpu.vector_store %arg9[%c0_20, %c0_21], %23 {strides = array<i32>} : memref<1x128xf32, #tpu.memory_space<vmem>>, vector<1x128xf32>,
    } else {
    }
    %c0 = arith.constant 0 : index
    %c0_5 = arith.constant 0 : index
    %10 = vector.load %arg10[%c0, %c0_5] : memref<32x128xf32, #tpu.memory_space<vmem>>, vector<32x128xf32>
    %c0_6 = arith.constant 0 : index
    %c0_7 = arith.constant 0 : index
    %c0_8 = arith.constant 0 : index
    %11 = vector.load %arg4[%c0_6, %c0_7, %c0_8] : memref<1x32x256xbf16, #tpu.memory_space<vmem>>, vector<1x32x256xbf16>
    %12 = vector.shape_cast %11 : vector<1x32x256xbf16> to vector<32x256xbf16>
    %c0_9 = arith.constant 0 : index
    %c0_10 = arith.constant 0 : index
    %c0_11 = arith.constant 0 : index
    %13 = vector.load %arg5[%c0_9, %c0_10, %c0_11] : memref<1x256x128xbf16, #tpu.memory_space<vmem>>, vector<1x256x128xbf16>
    %14 = vector.shape_cast %13 : vector<1x256x128xbf16> to vector<256x128xbf16>
    %cst = arith.constant dense<0.000000e+00> : vector<32x128xf32>
    %15 = tpu.matmul %12, %14, %cst {dimension_numbers = #tpu.dot_dimension_numbers<[1], [0], [0], [1], [0, 0, 1, 1], [], []>} : vector<32x256xbf16>, vector<256x128xbf16>, vector<32x128xf32> -> vector<32x128xf32>
    %16 = arith.addf %10, %15 : vector<32x128xf32>
    %c0_12 = arith.constant 0 : index
    %c0_13 = arith.constant 0 : index
    %17 = vector.load %arg10[%c0_12, %c0_13] : memref<32x128xf32, #tpu.memory_space<vmem>>, vector<32x128xf32>
    tpu.vector_store %arg10[%c0_12, %c0_13], %16 {strides = array<i32>} : memref<32x128xf32, #tpu.memory_space<vmem>>, vector<32x128xf32>,
    %c0_i32_14 = arith.constant 0 : i32
    %18 = arith.cmpi eq, %arg3, %c0_i32_14 : i32
    %19 = arith.extui %18 : i1 to i32
    %c0_i32_15 = arith.constant 0 : i32
    %20 = arith.cmpi ne, %19, %c0_i32_15 : i32
    scf.if %20 {
      %c0_16 = arith.constant 0 : index
      %c0_17 = arith.constant 0 : index
      %21 = vector.load %arg10[%c0_16, %c0_17] : memref<32x128xf32, #tpu.memory_space<vmem>>, vector<32x128xf32>
      %c0_18 = arith.constant 0 : index
      %c0_19 = arith.constant 0 : index
      %22 = vector.load %arg6[%c0_18, %c0_19] : memref<1x128xf32, #tpu.memory_space<vmem>>, vector<1x128xf32>
      %23 = vector.broadcast %22 : vector<1x128xf32> to vector<32x128xf32>
      %24 = arith.addf %21, %23 : vector<32x128xf32>
      %25 = tpu.iota {dimensions = array<i32: 0>} : vector<32x128xi32>
      %c32_i32 = arith.constant 32 : i32
      %26 = arith.muli %arg2, %c32_i32 : i32
      %27 = vector.broadcast %26 : i32 to vector<32x128xi32>
      %28 = arith.addi %25, %27 : vector<32x128xi32>
      %c32_i32_20 = arith.constant 32 : i32
      %29 = vector.broadcast %c32_i32_20 : i32 to vector<32x128xi32>
      %30 = arith.cmpi slt, %28, %29 : vector<32x128xi32>
      %cst_21 = arith.constant 0.000000e+00 : f32
      %31 = vector.broadcast %cst_21 : f32 to vector<32x128xf32>
      %32 = arith.select %30, %24, %31 : vector<32x128xi1>, vector<32x128xf32>
      %c0_22 = arith.constant 0 : index
      %c0_23 = arith.constant 0 : index
      %33 = vector.load %arg8[%c0_22, %c0_23] : memref<1x128xf32, #tpu.memory_space<vmem>>, vector<1x128xf32>
      %cst_24 = arith.constant dense<0.000000e+00> : vector<128xf32>
      %34 = vector.multi_reduction <add>, %32, %cst_24 [0] : vector<32x128xf32> to vector<128xf32>
      %35 = vector.shape_cast %34 : vector<128xf32> to vector<1x128xf32>
      %36 = arith.addf %33, %35 : vector<1x128xf32>
      %c0_25 = arith.constant 0 : index
      %c0_26 = arith.constant 0 : index
      %37 = vector.load %arg8[%c0_25, %c0_26] : memref<1x128xf32, #tpu.memory_space<vmem>>, vector<1x128xf32>
      tpu.vector_store %arg8[%c0_25, %c0_26], %36 {strides = array<i32>} : memref<1x128xf32, #tpu.memory_space<vmem>>, vector<1x128xf32>,
      %c0_27 = arith.constant 0 : index
      %c0_28 = arith.constant 0 : index
      %38 = vector.load %arg9[%c0_27, %c0_28] : memref<1x128xf32, #tpu.memory_space<vmem>>, vector<1x128xf32>
      %39 = arith.mulf %32, %32 : vector<32x128xf32>
      %cst_29 = arith.constant dense<0.000000e+00> : vector<128xf32>
      %40 = vector.multi_reduction <add>, %39, %cst_29 [0] : vector<32x128xf32> to vector<128xf32>
      %41 = vector.shape_cast %40 : vector<128xf32> to vector<1x128xf32>
      %42 = arith.addf %38, %41 : vector<1x128xf32>
      %c0_30 = arith.constant 0 : index
      %c0_31 = arith.constant 0 : index
      %43 = vector.load %arg9[%c0_30, %c0_31] : memref<1x128xf32, #tpu.memory_space<vmem>>, vector<1x128xf32>
      tpu.vector_store %arg9[%c0_30, %c0_31], %42 {strides = array<i32>} : memref<1x128xf32, #tpu.memory_space<vmem>>, vector<1x128xf32>,
      %44 = arith.truncf %24 : vector<32x128xf32> to vector<32x128xbf16>
      %c0_32 = arith.constant 0 : index
      %c0_33 = arith.constant 0 : index
      %c0_34 = arith.constant 0 : index
      %45 = vector.load %arg7[%c0_32, %c0_33, %c0_34] : memref<1x32x128xbf16, #tpu.memory_space<vmem>>, vector<1x32x128xbf16>
      %46 = vector.shape_cast %45 : vector<1x32x128xbf16> to vector<32x128xbf16>
      %47 = vector.shape_cast %44 : vector<32x128xbf16> to vector<1x32x128xbf16>
      tpu.vector_store %arg7[%c0_32, %c0_33, %c0_34], %47 {strides = array<i32>} : memref<1x32x128xbf16, #tpu.memory_space<vmem>>, vector<1x32x128xbf16>,
    } else {
    }
    return
  }
  func.func @transform_0(%arg0: i32, %arg1: i32, %arg2: i32, %arg3: i32) -> (i32, i32, i32) {
    %c0_i32 = arith.constant 0 : i32
    return %arg1, %arg2, %arg3 : i32, i32, i32
  }
  func.func @transform_1(%arg0: i32, %arg1: i32, %arg2: i32, %arg3: i32) -> (i32, i32, i32) {
    %c0_i32 = arith.constant 0 : i32
    return %arg1, %arg3, %arg0 : i32, i32, i32
  }
  func.func @transform_2(%arg0: i32, %arg1: i32, %arg2: i32, %arg3: i32) -> (i32, i32) {
    %c0_i32 = arith.constant 0 : i32
    %c0_i32_0 = arith.constant 0 : i32
    return %c0_i32, %arg0 : i32, i32
  }
  func.func @transform_3(%arg0: i32, %arg1: i32, %arg2: i32, %arg3: i32) -> (i32, i32, i32) {
    %c0_i32 = arith.constant 0 : i32
    return %arg1, %arg2, %arg0 : i32, i32, i32
  }
  func.func @transform_4(%arg0: i32, %arg1: i32, %arg2: i32, %arg3: i32) -> (i32, i32) {
    %c0_i32 = arith.constant 0 : i32
    %c0_i32_0 = arith.constant 0 : i32
    return %c0_i32, %arg0 : i32, i32
  }
  func.func @transform_5(%arg0: i32, %arg1: i32, %arg2: i32, %arg3: i32) -> (i32, i32) {
    %c0_i32 = arith.constant 0 : i32
    %c0_i32_0 = arith.constant 0 : i32
    return %c0_i32, %arg0 : i32, i32
  }
}

module attributes {stable_mosaic.version = 11 : i64} {
  func.func @_affine_kernel(%arg0: i32, %arg1: memref<32x128xbf16, #tpu.memory_space<vmem>>, %arg2: memref<1x128xf32, #tpu.memory_space<vmem>>, %arg3: memref<1x128xf32, #tpu.memory_space<vmem>>, %arg4: memref<32x128xbf16, #tpu.memory_space<vmem>>) attributes {dimension_semantics = [#tpu.dimension_semantics<parallel>], iteration_bounds = array<i64: 1>, scalar_prefetch = 0 : i64, scratch_operands = 0 : i64, tpu.core_type = #tpu.core_type<tc>, window_params = [{transform_indices = @transform_0, window_bounds = array<i64: 32, 128>}, {pipeline_mode = #tpu.pipeline_mode<synchronous>, transform_indices = @transform_1, window_bounds = array<i64: 1, 128>}, {pipeline_mode = #tpu.pipeline_mode<synchronous>, transform_indices = @transform_2, window_bounds = array<i64: 1, 128>}, {transform_indices = @transform_3, window_bounds = array<i64: 32, 128>}]} {
    %c0 = arith.constant 0 : index
    %c0_0 = arith.constant 0 : index
    %0 = vector.load %arg1[%c0, %c0_0] : memref<32x128xbf16, #tpu.memory_space<vmem>>, vector<32x128xbf16>
    %1 = arith.extf %0 : vector<32x128xbf16> to vector<32x128xf32>
    %c0_1 = arith.constant 0 : index
    %c0_2 = arith.constant 0 : index
    %2 = vector.load %arg2[%c0_1, %c0_2] : memref<1x128xf32, #tpu.memory_space<vmem>>, vector<1x128xf32>
    %3 = vector.broadcast %2 : vector<1x128xf32> to vector<32x128xf32>
    %4 = arith.mulf %1, %3 : vector<32x128xf32>
    %c0_3 = arith.constant 0 : index
    %c0_4 = arith.constant 0 : index
    %5 = vector.load %arg3[%c0_3, %c0_4] : memref<1x128xf32, #tpu.memory_space<vmem>>, vector<1x128xf32>
    %6 = vector.broadcast %5 : vector<1x128xf32> to vector<32x128xf32>
    %7 = arith.addf %4, %6 : vector<32x128xf32>
    %8 = arith.truncf %7 : vector<32x128xf32> to vector<32x128xbf16>
    %c0_5 = arith.constant 0 : index
    %c0_6 = arith.constant 0 : index
    %9 = vector.load %arg4[%c0_5, %c0_6] : memref<32x128xbf16, #tpu.memory_space<vmem>>, vector<32x128xbf16>
    tpu.vector_store %arg4[%c0_5, %c0_6], %8 {strides = array<i32>} : memref<32x128xbf16, #tpu.memory_space<vmem>>, vector<32x128xbf16>,
    return
  }
  func.func @transform_0(%arg0: i32) -> (i32, i32) {
    %c0_i32 = arith.constant 0 : i32
    %c0_i32_0 = arith.constant 0 : i32
    return %arg0, %c0_i32 : i32, i32
  }
  func.func @transform_1(%arg0: i32) -> (i32, i32) {
    %c0_i32 = arith.constant 0 : i32
    %c0_i32_0 = arith.constant 0 : i32
    %c0_i32_1 = arith.constant 0 : i32
    return %c0_i32, %c0_i32_0 : i32, i32
  }
  func.func @transform_2(%arg0: i32) -> (i32, i32) {
    %c0_i32 = arith.constant 0 : i32
    %c0_i32_0 = arith.constant 0 : i32
    %c0_i32_1 = arith.constant 0 : i32
    return %c0_i32, %c0_i32_0 : i32, i32
  }
  func.func @transform_3(%arg0: i32) -> (i32, i32) {
    %c0_i32 = arith.constant 0 : i32
    %c0_i32_0 = arith.constant 0 : i32
    return %arg0, %c0_i32 : i32, i32
  }
}

module attributes {stable_mosaic.version = 11 : i64} {
  func.func @_mm_kernel(%arg0: i32, %arg1: i32, %arg2: i32, %arg3: i32, %arg4: memref<1x16x512xbf16, #tpu.memory_space<vmem>>, %arg5: memref<1x512x128xbf16, #tpu.memory_space<vmem>>, %arg6: memref<1x128xf32, #tpu.memory_space<vmem>>, %arg7: memref<1x16x128xbf16, #tpu.memory_space<vmem>>, %arg8: memref<1x128xf32, #tpu.memory_space<vmem>>, %arg9: memref<1x128xf32, #tpu.memory_space<vmem>>, %arg10: memref<16x128xf32, #tpu.memory_space<vmem>>) attributes {dimension_semantics = [#tpu.dimension_semantics<parallel>, #tpu.dimension_semantics<arbitrary>, #tpu.dimension_semantics<arbitrary>, #tpu.dimension_semantics<arbitrary>], iteration_bounds = array<i64: 1, 1, 1, 1>, scalar_prefetch = 0 : i64, scratch_operands = 1 : i64, tpu.core_type = #tpu.core_type<tc>, window_params = [{transform_indices = @transform_0, window_bounds = array<i64: 1, 16, 512>}, {transform_indices = @transform_1, window_bounds = array<i64: 1, 512, 128>}, {transform_indices = @transform_2, window_bounds = array<i64: 1, 128>}, {transform_indices = @transform_3, window_bounds = array<i64: 1, 16, 128>}, {transform_indices = @transform_4, window_bounds = array<i64: 1, 128>}, {transform_indices = @transform_5, window_bounds = array<i64: 1, 128>}]} {
    %c0_i32 = arith.constant 0 : i32
    %0 = arith.cmpi eq, %arg3, %c0_i32 : i32
    %1 = arith.extui %0 : i1 to i32
    %c0_i32_0 = arith.constant 0 : i32
    %2 = arith.cmpi ne, %1, %c0_i32_0 : i32
    scf.if %2 {
      %cst_16 = arith.constant 0.000000e+00 : f32
      %21 = vector.broadcast %cst_16 : f32 to vector<16x128xf32>
      %c0_17 = arith.constant 0 : index
      %c0_18 = arith.constant 0 : index
      %22 = vector.load %arg10[%c0_17, %c0_18] : memref<16x128xf32, #tpu.memory_space<vmem>>, vector<16x128xf32>
      tpu.vector_store %arg10[%c0_17, %c0_18], %21 {strides = array<i32>} : memref<16x128xf32, #tpu.memory_space<vmem>>, vector<16x128xf32>,
    } else {
    }
    %c0_i32_1 = arith.constant 0 : i32
    %3 = arith.cmpi eq, %arg1, %c0_i32_1 : i32
    %c0_i32_2 = arith.constant 0 : i32
    %4 = arith.cmpi eq, %arg2, %c0_i32_2 : i32
    %5 = arith.andi %3, %4 : i1
    %c0_i32_3 = arith.constant 0 : i32
    %6 = arith.cmpi eq, %arg3, %c0_i32_3 : i32
    %7 = arith.andi %5, %6 : i1
    %8 = arith.extui %7 : i1 to i32
    %c0_i32_4 = arith.constant 0 : i32
    %9 = arith.cmpi ne, %8, %c0_i32_4 : i32
    scf.if %9 {
      %cst_16 = arith.constant 0.000000e+00 : f32
      %21 = vector.broadcast %cst_16 : f32 to vector<1x128xf32>
      %c0_17 = arith.constant 0 : index
      %c0_18 = arith.constant 0 : index
      %22 = vector.load %arg8[%c0_17, %c0_18] : memref<1x128xf32, #tpu.memory_space<vmem>>, vector<1x128xf32>
      tpu.vector_store %arg8[%c0_17, %c0_18], %21 {strides = array<i32>} : memref<1x128xf32, #tpu.memory_space<vmem>>, vector<1x128xf32>,
      %cst_19 = arith.constant 0.000000e+00 : f32
      %23 = vector.broadcast %cst_19 : f32 to vector<1x128xf32>
      %c0_20 = arith.constant 0 : index
      %c0_21 = arith.constant 0 : index
      %24 = vector.load %arg9[%c0_20, %c0_21] : memref<1x128xf32, #tpu.memory_space<vmem>>, vector<1x128xf32>
      tpu.vector_store %arg9[%c0_20, %c0_21], %23 {strides = array<i32>} : memref<1x128xf32, #tpu.memory_space<vmem>>, vector<1x128xf32>,
    } else {
    }
    %c0 = arith.constant 0 : index
    %c0_5 = arith.constant 0 : index
    %10 = vector.load %arg10[%c0, %c0_5] : memref<16x128xf32, #tpu.memory_space<vmem>>, vector<16x128xf32>
    %c0_6 = arith.constant 0 : index
    %c0_7 = arith.constant 0 : index
    %c0_8 = arith.constant 0 : index
    %11 = vector.load %arg4[%c0_6, %c0_7, %c0_8] : memref<1x16x512xbf16, #tpu.memory_space<vmem>>, vector<1x16x512xbf16>
    %12 = vector.shape_cast %11 : vector<1x16x512xbf16> to vector<16x512xbf16>
    %c0_9 = arith.constant 0 : index
    %c0_10 = arith.constant 0 : index
    %c0_11 = arith.constant 0 : index
    %13 = vector.load %arg5[%c0_9, %c0_10, %c0_11] : memref<1x512x128xbf16, #tpu.memory_space<vmem>>, vector<1x512x128xbf16>
    %14 = vector.shape_cast %13 : vector<1x512x128xbf16> to vector<512x128xbf16>
    %cst = arith.constant dense<0.000000e+00> : vector<16x128xf32>
    %15 = tpu.matmul %12, %14, %cst {dimension_numbers = #tpu.dot_dimension_numbers<[1], [0], [0], [1], [0, 0, 1, 1], [], []>} : vector<16x512xbf16>, vector<512x128xbf16>, vector<16x128xf32> -> vector<16x128xf32>
    %16 = arith.addf %10, %15 : vector<16x128xf32>
    %c0_12 = arith.constant 0 : index
    %c0_13 = arith.constant 0 : index
    %17 = vector.load %arg10[%c0_12, %c0_13] : memref<16x128xf32, #tpu.memory_space<vmem>>, vector<16x128xf32>
    tpu.vector_store %arg10[%c0_12, %c0_13], %16 {strides = array<i32>} : memref<16x128xf32, #tpu.memory_space<vmem>>, vector<16x128xf32>,
    %c0_i32_14 = arith.constant 0 : i32
    %18 = arith.cmpi eq, %arg3, %c0_i32_14 : i32
    %19 = arith.extui %18 : i1 to i32
    %c0_i32_15 = arith.constant 0 : i32
    %20 = arith.cmpi ne, %19, %c0_i32_15 : i32
    scf.if %20 {
      %c0_16 = arith.constant 0 : index
      %c0_17 = arith.constant 0 : index
      %21 = vector.load %arg10[%c0_16, %c0_17] : memref<16x128xf32, #tpu.memory_space<vmem>>, vector<16x128xf32>
      %c0_18 = arith.constant 0 : index
      %c0_19 = arith.constant 0 : index
      %22 = vector.load %arg6[%c0_18, %c0_19] : memref<1x128xf32, #tpu.memory_space<vmem>>, vector<1x128xf32>
      %23 = vector.broadcast %22 : vector<1x128xf32> to vector<16x128xf32>
      %24 = arith.addf %21, %23 : vector<16x128xf32>
      %25 = tpu.iota {dimensions = array<i32: 0>} : vector<16x128xi32>
      %c16_i32 = arith.constant 16 : i32
      %26 = arith.muli %arg2, %c16_i32 : i32
      %27 = vector.broadcast %26 : i32 to vector<16x128xi32>
      %28 = arith.addi %25, %27 : vector<16x128xi32>
      %c8_i32 = arith.constant 8 : i32
      %29 = vector.broadcast %c8_i32 : i32 to vector<16x128xi32>
      %30 = arith.cmpi slt, %28, %29 : vector<16x128xi32>
      %cst_20 = arith.constant 0.000000e+00 : f32
      %31 = vector.broadcast %cst_20 : f32 to vector<16x128xf32>
      %32 = arith.select %30, %24, %31 : vector<16x128xi1>, vector<16x128xf32>
      %c0_21 = arith.constant 0 : index
      %c0_22 = arith.constant 0 : index
      %33 = vector.load %arg8[%c0_21, %c0_22] : memref<1x128xf32, #tpu.memory_space<vmem>>, vector<1x128xf32>
      %cst_23 = arith.constant dense<0.000000e+00> : vector<128xf32>
      %34 = vector.multi_reduction <add>, %32, %cst_23 [0] : vector<16x128xf32> to vector<128xf32>
      %35 = vector.shape_cast %34 : vector<128xf32> to vector<1x128xf32>
      %36 = arith.addf %33, %35 : vector<1x128xf32>
      %c0_24 = arith.constant 0 : index
      %c0_25 = arith.constant 0 : index
      %37 = vector.load %arg8[%c0_24, %c0_25] : memref<1x128xf32, #tpu.memory_space<vmem>>, vector<1x128xf32>
      tpu.vector_store %arg8[%c0_24, %c0_25], %36 {strides = array<i32>} : memref<1x128xf32, #tpu.memory_space<vmem>>, vector<1x128xf32>,
      %c0_26 = arith.constant 0 : index
      %c0_27 = arith.constant 0 : index
      %38 = vector.load %arg9[%c0_26, %c0_27] : memref<1x128xf32, #tpu.memory_space<vmem>>, vector<1x128xf32>
      %39 = arith.mulf %32, %32 : vector<16x128xf32>
      %cst_28 = arith.constant dense<0.000000e+00> : vector<128xf32>
      %40 = vector.multi_reduction <add>, %39, %cst_28 [0] : vector<16x128xf32> to vector<128xf32>
      %41 = vector.shape_cast %40 : vector<128xf32> to vector<1x128xf32>
      %42 = arith.addf %38, %41 : vector<1x128xf32>
      %c0_29 = arith.constant 0 : index
      %c0_30 = arith.constant 0 : index
      %43 = vector.load %arg9[%c0_29, %c0_30] : memref<1x128xf32, #tpu.memory_space<vmem>>, vector<1x128xf32>
      tpu.vector_store %arg9[%c0_29, %c0_30], %42 {strides = array<i32>} : memref<1x128xf32, #tpu.memory_space<vmem>>, vector<1x128xf32>,
      %44 = arith.truncf %24 : vector<16x128xf32> to vector<16x128xbf16>
      %c0_31 = arith.constant 0 : index
      %c0_32 = arith.constant 0 : index
      %c0_33 = arith.constant 0 : index
      %45 = vector.load %arg7[%c0_31, %c0_32, %c0_33] : memref<1x16x128xbf16, #tpu.memory_space<vmem>>, vector<1x16x128xbf16>
      %46 = vector.shape_cast %45 : vector<1x16x128xbf16> to vector<16x128xbf16>
      %47 = vector.shape_cast %44 : vector<16x128xbf16> to vector<1x16x128xbf16>
      tpu.vector_store %arg7[%c0_31, %c0_32, %c0_33], %47 {strides = array<i32>} : memref<1x16x128xbf16, #tpu.memory_space<vmem>>, vector<1x16x128xbf16>,
    } else {
    }
    return
  }
  func.func @transform_0(%arg0: i32, %arg1: i32, %arg2: i32, %arg3: i32) -> (i32, i32, i32) {
    %c0_i32 = arith.constant 0 : i32
    return %arg1, %arg2, %arg3 : i32, i32, i32
  }
  func.func @transform_1(%arg0: i32, %arg1: i32, %arg2: i32, %arg3: i32) -> (i32, i32, i32) {
    %c0_i32 = arith.constant 0 : i32
    return %arg1, %arg3, %arg0 : i32, i32, i32
  }
  func.func @transform_2(%arg0: i32, %arg1: i32, %arg2: i32, %arg3: i32) -> (i32, i32) {
    %c0_i32 = arith.constant 0 : i32
    %c0_i32_0 = arith.constant 0 : i32
    return %c0_i32, %arg0 : i32, i32
  }
  func.func @transform_3(%arg0: i32, %arg1: i32, %arg2: i32, %arg3: i32) -> (i32, i32, i32) {
    %c0_i32 = arith.constant 0 : i32
    return %arg1, %arg2, %arg0 : i32, i32, i32
  }
  func.func @transform_4(%arg0: i32, %arg1: i32, %arg2: i32, %arg3: i32) -> (i32, i32) {
    %c0_i32 = arith.constant 0 : i32
    %c0_i32_0 = arith.constant 0 : i32
    return %c0_i32, %arg0 : i32, i32
  }
  func.func @transform_5(%arg0: i32, %arg1: i32, %arg2: i32, %arg3: i32) -> (i32, i32) {
    %c0_i32 = arith.constant 0 : i32
    %c0_i32_0 = arith.constant 0 : i32
    return %c0_i32, %arg0 : i32, i32
  }
}

module attributes {stable_mosaic.version = 11 : i64} {
  func.func @_affine_kernel(%arg0: i32, %arg1: memref<16x128xbf16, #tpu.memory_space<vmem>>, %arg2: memref<1x128xf32, #tpu.memory_space<vmem>>, %arg3: memref<1x128xf32, #tpu.memory_space<vmem>>, %arg4: memref<16x128xbf16, #tpu.memory_space<vmem>>) attributes {dimension_semantics = [#tpu.dimension_semantics<parallel>], iteration_bounds = array<i64: 1>, scalar_prefetch = 0 : i64, scratch_operands = 0 : i64, tpu.core_type = #tpu.core_type<tc>, window_params = [{transform_indices = @transform_0, window_bounds = array<i64: 16, 128>}, {pipeline_mode = #tpu.pipeline_mode<synchronous>, transform_indices = @transform_1, window_bounds = array<i64: 1, 128>}, {pipeline_mode = #tpu.pipeline_mode<synchronous>, transform_indices = @transform_2, window_bounds = array<i64: 1, 128>}, {transform_indices = @transform_3, window_bounds = array<i64: 16, 128>}]} {
    %c0 = arith.constant 0 : index
    %c0_0 = arith.constant 0 : index
    %0 = vector.load %arg1[%c0, %c0_0] : memref<16x128xbf16, #tpu.memory_space<vmem>>, vector<16x128xbf16>
    %1 = arith.extf %0 : vector<16x128xbf16> to vector<16x128xf32>
    %c0_1 = arith.constant 0 : index
    %c0_2 = arith.constant 0 : index
    %2 = vector.load %arg2[%c0_1, %c0_2] : memref<1x128xf32, #tpu.memory_space<vmem>>, vector<1x128xf32>
    %3 = vector.broadcast %2 : vector<1x128xf32> to vector<16x128xf32>
    %4 = arith.mulf %1, %3 : vector<16x128xf32>
    %c0_3 = arith.constant 0 : index
    %c0_4 = arith.constant 0 : index
    %5 = vector.load %arg3[%c0_3, %c0_4] : memref<1x128xf32, #tpu.memory_space<vmem>>, vector<1x128xf32>
    %6 = vector.broadcast %5 : vector<1x128xf32> to vector<16x128xf32>
    %7 = arith.addf %4, %6 : vector<16x128xf32>
    %8 = arith.truncf %7 : vector<16x128xf32> to vector<16x128xbf16>
    %c0_5 = arith.constant 0 : index
    %c0_6 = arith.constant 0 : index
    %9 = vector.load %arg4[%c0_5, %c0_6] : memref<16x128xbf16, #tpu.memory_space<vmem>>, vector<16x128xbf16>
    tpu.vector_store %arg4[%c0_5, %c0_6], %8 {strides = array<i32>} : memref<16x128xbf16, #tpu.memory_space<vmem>>, vector<16x128xbf16>,
    return
  }
  func.func @transform_0(%arg0: i32) -> (i32, i32) {
    %c0_i32 = arith.constant 0 : i32
    %c0_i32_0 = arith.constant 0 : i32
    return %arg0, %c0_i32 : i32, i32
  }
  func.func @transform_1(%arg0: i32) -> (i32, i32) {
    %c0_i32 = arith.constant 0 : i32
    %c0_i32_0 = arith.constant 0 : i32
    %c0_i32_1 = arith.constant 0 : i32
    return %c0_i32, %c0_i32_0 : i32, i32
  }
  func.func @transform_2(%arg0: i32) -> (i32, i32) {
    %c0_i32 = arith.constant 0 : i32
    %c0_i32_0 = arith.constant 0 : i32
    %c0_i32_1 = arith.constant 0 : i32
    return %c0_i32, %c0_i32_0 : i32, i32
  }
  func.func @transform_3(%arg0: i32) -> (i32, i32) {
    %c0_i32 = arith.constant 0 : i32
    %c0_i32_0 = arith.constant 0 : i32
    return %arg0, %c0_i32 : i32, i32
  }
}

module attributes {stable_mosaic.version = 11 : i64} {
  func.func @_mm_kernel(%arg0: i32, %arg1: i32, %arg2: i32, %arg3: i32, %arg4: memref<1x16x1024xbf16, #tpu.memory_space<vmem>>, %arg5: memref<1x1024x128xbf16, #tpu.memory_space<vmem>>, %arg6: memref<1x128xf32, #tpu.memory_space<vmem>>, %arg7: memref<1x16x128xbf16, #tpu.memory_space<vmem>>, %arg8: memref<16x128xf32, #tpu.memory_space<vmem>>) attributes {dimension_semantics = [#tpu.dimension_semantics<parallel>, #tpu.dimension_semantics<parallel>, #tpu.dimension_semantics<parallel>, #tpu.dimension_semantics<arbitrary>], iteration_bounds = array<i64: 1, 1, 1, 1>, scalar_prefetch = 0 : i64, scratch_operands = 1 : i64, tpu.core_type = #tpu.core_type<tc>, window_params = [{transform_indices = @transform_0, window_bounds = array<i64: 1, 16, 1024>}, {transform_indices = @transform_1, window_bounds = array<i64: 1, 1024, 128>}, {transform_indices = @transform_2, window_bounds = array<i64: 1, 128>}, {transform_indices = @transform_3, window_bounds = array<i64: 1, 16, 128>}]} {
    %c0_i32 = arith.constant 0 : i32
    %0 = arith.cmpi eq, %arg3, %c0_i32 : i32
    %1 = arith.extui %0 : i1 to i32
    %c0_i32_0 = arith.constant 0 : i32
    %2 = arith.cmpi ne, %1, %c0_i32_0 : i32
    scf.if %2 {
      %cst_12 = arith.constant 0.000000e+00 : f32
      %14 = vector.broadcast %cst_12 : f32 to vector<16x128xf32>
      %c0_13 = arith.constant 0 : index
      %c0_14 = arith.constant 0 : index
      %15 = vector.load %arg8[%c0_13, %c0_14] : memref<16x128xf32, #tpu.memory_space<vmem>>, vector<16x128xf32>
      tpu.vector_store %arg8[%c0_13, %c0_14], %14 {strides = array<i32>} : memref<16x128xf32, #tpu.memory_space<vmem>>, vector<16x128xf32>,
    } else {
    }
    %c0 = arith.constant 0 : index
    %c0_1 = arith.constant 0 : index
    %3 = vector.load %arg8[%c0, %c0_1] : memref<16x128xf32, #tpu.memory_space<vmem>>, vector<16x128xf32>
    %c0_2 = arith.constant 0 : index
    %c0_3 = arith.constant 0 : index
    %c0_4 = arith.constant 0 : index
    %4 = vector.load %arg4[%c0_2, %c0_3, %c0_4] : memref<1x16x1024xbf16, #tpu.memory_space<vmem>>, vector<1x16x1024xbf16>
    %5 = vector.shape_cast %4 : vector<1x16x1024xbf16> to vector<16x1024xbf16>
    %c0_5 = arith.constant 0 : index
    %c0_6 = arith.constant 0 : index
    %c0_7 = arith.constant 0 : index
    %6 = vector.load %arg5[%c0_5, %c0_6, %c0_7] : memref<1x1024x128xbf16, #tpu.memory_space<vmem>>, vector<1x1024x128xbf16>
    %7 = vector.shape_cast %6 : vector<1x1024x128xbf16> to vector<1024x128xbf16>
    %cst = arith.constant dense<0.000000e+00> : vector<16x128xf32>
    %8 = tpu.matmul %5, %7, %cst {dimension_numbers = #tpu.dot_dimension_numbers<[1], [0], [0], [1], [0, 0, 1, 1], [], []>} : vector<16x1024xbf16>, vector<1024x128xbf16>, vector<16x128xf32> -> vector<16x128xf32>
    %9 = arith.addf %3, %8 : vector<16x128xf32>
    %c0_8 = arith.constant 0 : index
    %c0_9 = arith.constant 0 : index
    %10 = vector.load %arg8[%c0_8, %c0_9] : memref<16x128xf32, #tpu.memory_space<vmem>>, vector<16x128xf32>
    tpu.vector_store %arg8[%c0_8, %c0_9], %9 {strides = array<i32>} : memref<16x128xf32, #tpu.memory_space<vmem>>, vector<16x128xf32>,
    %c0_i32_10 = arith.constant 0 : i32
    %11 = arith.cmpi eq, %arg3, %c0_i32_10 : i32
    %12 = arith.extui %11 : i1 to i32
    %c0_i32_11 = arith.constant 0 : i32
    %13 = arith.cmpi ne, %12, %c0_i32_11 : i32
    scf.if %13 {
      %c0_12 = arith.constant 0 : index
      %c0_13 = arith.constant 0 : index
      %14 = vector.load %arg8[%c0_12, %c0_13] : memref<16x128xf32, #tpu.memory_space<vmem>>, vector<16x128xf32>
      %c0_14 = arith.constant 0 : index
      %c0_15 = arith.constant 0 : index
      %15 = vector.load %arg6[%c0_14, %c0_15] : memref<1x128xf32, #tpu.memory_space<vmem>>, vector<1x128xf32>
      %16 = vector.broadcast %15 : vector<1x128xf32> to vector<16x128xf32>
      %17 = arith.addf %14, %16 : vector<16x128xf32>
      %18 = arith.truncf %17 : vector<16x128xf32> to vector<16x128xbf16>
      %c0_16 = arith.constant 0 : index
      %c0_17 = arith.constant 0 : index
      %c0_18 = arith.constant 0 : index
      %19 = vector.load %arg7[%c0_16, %c0_17, %c0_18] : memref<1x16x128xbf16, #tpu.memory_space<vmem>>, vector<1x16x128xbf16>
      %20 = vector.shape_cast %19 : vector<1x16x128xbf16> to vector<16x128xbf16>
      %21 = vector.shape_cast %18 : vector<16x128xbf16> to vector<1x16x128xbf16>
      tpu.vector_store %arg7[%c0_16, %c0_17, %c0_18], %21 {strides = array<i32>} : memref<1x16x128xbf16, #tpu.memory_space<vmem>>, vector<1x16x128xbf16>,
    } else {
    }
    return
  }
  func.func @transform_0(%arg0: i32, %arg1: i32, %arg2: i32, %arg3: i32) -> (i32, i32, i32) {
    %c0_i32 = arith.constant 0 : i32
    return %arg1, %arg2, %arg3 : i32, i32, i32
  }
  func.func @transform_1(%arg0: i32, %arg1: i32, %arg2: i32, %arg3: i32) -> (i32, i32, i32) {
    %c0_i32 = arith.constant 0 : i32
    return %arg1, %arg3, %arg0 : i32, i32, i32
  }
  func.func @transform_2(%arg0: i32, %arg1: i32, %arg2: i32, %arg3: i32) -> (i32, i32) {
    %c0_i32 = arith.constant 0 : i32
    %c0_i32_0 = arith.constant 0 : i32
    return %c0_i32, %arg0 : i32, i32
  }
  func.func @transform_3(%arg0: i32, %arg1: i32, %arg2: i32, %arg3: i32) -> (i32, i32, i32) {
    %c0_i32 = arith.constant 0 : i32
    return %arg1, %arg2, %arg0 : i32, i32, i32
  }
}

module attributes {stable_mosaic.version = 11 : i64} {
  func.func @_affine_kernel(%arg0: i32, %arg1: memref<16x128xbf16, #tpu.memory_space<vmem>>, %arg2: memref<1x128xf32, #tpu.memory_space<vmem>>, %arg3: memref<1x128xf32, #tpu.memory_space<vmem>>, %arg4: memref<16x128xbf16, #tpu.memory_space<vmem>>) attributes {dimension_semantics = [#tpu.dimension_semantics<parallel>], iteration_bounds = array<i64: 4>, scalar_prefetch = 0 : i64, scratch_operands = 0 : i64, tpu.core_type = #tpu.core_type<tc>, window_params = [{transform_indices = @transform_0, window_bounds = array<i64: 16, 128>}, {pipeline_mode = #tpu.pipeline_mode<synchronous>, transform_indices = @transform_1, window_bounds = array<i64: 1, 128>}, {pipeline_mode = #tpu.pipeline_mode<synchronous>, transform_indices = @transform_2, window_bounds = array<i64: 1, 128>}, {transform_indices = @transform_3, window_bounds = array<i64: 16, 128>}]} {
    %c0 = arith.constant 0 : index
    %c0_0 = arith.constant 0 : index
    %0 = vector.load %arg1[%c0, %c0_0] : memref<16x128xbf16, #tpu.memory_space<vmem>>, vector<16x128xbf16>
    %1 = arith.extf %0 : vector<16x128xbf16> to vector<16x128xf32>
    %c0_1 = arith.constant 0 : index
    %c0_2 = arith.constant 0 : index
    %2 = vector.load %arg2[%c0_1, %c0_2] : memref<1x128xf32, #tpu.memory_space<vmem>>, vector<1x128xf32>
    %3 = vector.broadcast %2 : vector<1x128xf32> to vector<16x128xf32>
    %4 = arith.mulf %1, %3 : vector<16x128xf32>
    %c0_3 = arith.constant 0 : index
    %c0_4 = arith.constant 0 : index
    %5 = vector.load %arg3[%c0_3, %c0_4] : memref<1x128xf32, #tpu.memory_space<vmem>>, vector<1x128xf32>
    %6 = vector.broadcast %5 : vector<1x128xf32> to vector<16x128xf32>
    %7 = arith.addf %4, %6 : vector<16x128xf32>
    %8 = arith.truncf %7 : vector<16x128xf32> to vector<16x128xbf16>
    %c0_5 = arith.constant 0 : index
    %c0_6 = arith.constant 0 : index
    %9 = vector.load %arg4[%c0_5, %c0_6] : memref<16x128xbf16, #tpu.memory_space<vmem>>, vector<16x128xbf16>
    tpu.vector_store %arg4[%c0_5, %c0_6], %8 {strides = array<i32>} : memref<16x128xbf16, #tpu.memory_space<vmem>>, vector<16x128xbf16>,
    return
  }
  func.func @transform_0(%arg0: i32) -> (i32, i32) {
    %c0_i32 = arith.constant 0 : i32
    %c0_i32_0 = arith.constant 0 : i32
    return %arg0, %c0_i32 : i32, i32
  }
  func.func @transform_1(%arg0: i32) -> (i32, i32) {
    %c0_i32 = arith.constant 0 : i32
    %c0_i32_0 = arith.constant 0 : i32
    %c0_i32_1 = arith.constant 0 : i32
    return %c0_i32, %c0_i32_0 : i32, i32
  }
  func.func @transform_2(%arg0: i32) -> (i32, i32) {
    %c0_i32 = arith.constant 0 : i32
    %c0_i32_0 = arith.constant 0 : i32
    %c0_i32_1 = arith.constant 0 : i32
    return %c0_i32, %c0_i32_0 : i32, i32
  }
  func.func @transform_3(%arg0: i32) -> (i32, i32) {
    %c0_i32 = arith.constant 0 : i32
    %c0_i32_0 = arith.constant 0 : i32
    return %arg0, %c0_i32 : i32, i32
  }
}

module attributes {stable_mosaic.version = 11 : i64} {
  func.func @_mm_kernel(%arg0: i32, %arg1: i32, %arg2: i32, %arg3: i32, %arg4: memref<1x16x256xbf16, #tpu.memory_space<vmem>>, %arg5: memref<1x256x128xbf16, #tpu.memory_space<vmem>>, %arg6: memref<1x128xf32, #tpu.memory_space<vmem>>, %arg7: memref<1x16x128xbf16, #tpu.memory_space<vmem>>, %arg8: memref<1x128xf32, #tpu.memory_space<vmem>>, %arg9: memref<1x128xf32, #tpu.memory_space<vmem>>, %arg10: memref<16x128xf32, #tpu.memory_space<vmem>>) attributes {dimension_semantics = [#tpu.dimension_semantics<parallel>, #tpu.dimension_semantics<arbitrary>, #tpu.dimension_semantics<arbitrary>, #tpu.dimension_semantics<arbitrary>], iteration_bounds = array<i64: 1, 4, 1, 1>, scalar_prefetch = 0 : i64, scratch_operands = 1 : i64, tpu.core_type = #tpu.core_type<tc>, window_params = [{transform_indices = @transform_0, window_bounds = array<i64: 1, 16, 256>}, {transform_indices = @transform_1, window_bounds = array<i64: 1, 256, 128>}, {transform_indices = @transform_2, window_bounds = array<i64: 1, 128>}, {transform_indices = @transform_3, window_bounds = array<i64: 1, 16, 128>}, {transform_indices = @transform_4, window_bounds = array<i64: 1, 128>}, {transform_indices = @transform_5, window_bounds = array<i64: 1, 128>}]} {
    %c0_i32 = arith.constant 0 : i32
    %0 = arith.cmpi eq, %arg3, %c0_i32 : i32
    %1 = arith.extui %0 : i1 to i32
    %c0_i32_0 = arith.constant 0 : i32
    %2 = arith.cmpi ne, %1, %c0_i32_0 : i32
    scf.if %2 {
      %cst_16 = arith.constant 0.000000e+00 : f32
      %21 = vector.broadcast %cst_16 : f32 to vector<16x128xf32>
      %c0_17 = arith.constant 0 : index
      %c0_18 = arith.constant 0 : index
      %22 = vector.load %arg10[%c0_17, %c0_18] : memref<16x128xf32, #tpu.memory_space<vmem>>, vector<16x128xf32>
      tpu.vector_store %arg10[%c0_17, %c0_18], %21 {strides = array<i32>} : memref<16x128xf32, #tpu.memory_space<vmem>>, vector<16x128xf32>,
    } else {
    }
    %c0_i32_1 = arith.constant 0 : i32
    %3 = arith.cmpi eq, %arg1, %c0_i32_1 : i32
    %c0_i32_2 = arith.constant 0 : i32
    %4 = arith.cmpi eq, %arg2, %c0_i32_2 : i32
    %5 = arith.andi %3, %4 : i1
    %c0_i32_3 = arith.constant 0 : i32
    %6 = arith.cmpi eq, %arg3, %c0_i32_3 : i32
    %7 = arith.andi %5, %6 : i1
    %8 = arith.extui %7 : i1 to i32
    %c0_i32_4 = arith.constant 0 : i32
    %9 = arith.cmpi ne, %8, %c0_i32_4 : i32
    scf.if %9 {
      %cst_16 = arith.constant 0.000000e+00 : f32
      %21 = vector.broadcast %cst_16 : f32 to vector<1x128xf32>
      %c0_17 = arith.constant 0 : index
      %c0_18 = arith.constant 0 : index
      %22 = vector.load %arg8[%c0_17, %c0_18] : memref<1x128xf32, #tpu.memory_space<vmem>>, vector<1x128xf32>
      tpu.vector_store %arg8[%c0_17, %c0_18], %21 {strides = array<i32>} : memref<1x128xf32, #tpu.memory_space<vmem>>, vector<1x128xf32>,
      %cst_19 = arith.constant 0.000000e+00 : f32
      %23 = vector.broadcast %cst_19 : f32 to vector<1x128xf32>
      %c0_20 = arith.constant 0 : index
      %c0_21 = arith.constant 0 : index
      %24 = vector.load %arg9[%c0_20, %c0_21] : memref<1x128xf32, #tpu.memory_space<vmem>>, vector<1x128xf32>
      tpu.vector_store %arg9[%c0_20, %c0_21], %23 {strides = array<i32>} : memref<1x128xf32, #tpu.memory_space<vmem>>, vector<1x128xf32>,
    } else {
    }
    %c0 = arith.constant 0 : index
    %c0_5 = arith.constant 0 : index
    %10 = vector.load %arg10[%c0, %c0_5] : memref<16x128xf32, #tpu.memory_space<vmem>>, vector<16x128xf32>
    %c0_6 = arith.constant 0 : index
    %c0_7 = arith.constant 0 : index
    %c0_8 = arith.constant 0 : index
    %11 = vector.load %arg4[%c0_6, %c0_7, %c0_8] : memref<1x16x256xbf16, #tpu.memory_space<vmem>>, vector<1x16x256xbf16>
    %12 = vector.shape_cast %11 : vector<1x16x256xbf16> to vector<16x256xbf16>
    %c0_9 = arith.constant 0 : index
    %c0_10 = arith.constant 0 : index
    %c0_11 = arith.constant 0 : index
    %13 = vector.load %arg5[%c0_9, %c0_10, %c0_11] : memref<1x256x128xbf16, #tpu.memory_space<vmem>>, vector<1x256x128xbf16>
    %14 = vector.shape_cast %13 : vector<1x256x128xbf16> to vector<256x128xbf16>
    %cst = arith.constant dense<0.000000e+00> : vector<16x128xf32>
    %15 = tpu.matmul %12, %14, %cst {dimension_numbers = #tpu.dot_dimension_numbers<[1], [0], [0], [1], [0, 0, 1, 1], [], []>} : vector<16x256xbf16>, vector<256x128xbf16>, vector<16x128xf32> -> vector<16x128xf32>
    %16 = arith.addf %10, %15 : vector<16x128xf32>
    %c0_12 = arith.constant 0 : index
    %c0_13 = arith.constant 0 : index
    %17 = vector.load %arg10[%c0_12, %c0_13] : memref<16x128xf32, #tpu.memory_space<vmem>>, vector<16x128xf32>
    tpu.vector_store %arg10[%c0_12, %c0_13], %16 {strides = array<i32>} : memref<16x128xf32, #tpu.memory_space<vmem>>, vector<16x128xf32>,
    %c0_i32_14 = arith.constant 0 : i32
    %18 = arith.cmpi eq, %arg3, %c0_i32_14 : i32
    %19 = arith.extui %18 : i1 to i32
    %c0_i32_15 = arith.constant 0 : i32
    %20 = arith.cmpi ne, %19, %c0_i32_15 : i32
    scf.if %20 {
      %c0_16 = arith.constant 0 : index
      %c0_17 = arith.constant 0 : index
      %21 = vector.load %arg10[%c0_16, %c0_17] : memref<16x128xf32, #tpu.memory_space<vmem>>, vector<16x128xf32>
      %c0_18 = arith.constant 0 : index
      %c0_19 = arith.constant 0 : index
      %22 = vector.load %arg6[%c0_18, %c0_19] : memref<1x128xf32, #tpu.memory_space<vmem>>, vector<1x128xf32>
      %23 = vector.broadcast %22 : vector<1x128xf32> to vector<16x128xf32>
      %24 = arith.addf %21, %23 : vector<16x128xf32>
      %25 = tpu.iota {dimensions = array<i32: 0>} : vector<16x128xi32>
      %c16_i32 = arith.constant 16 : i32
      %26 = arith.muli %arg2, %c16_i32 : i32
      %27 = vector.broadcast %26 : i32 to vector<16x128xi32>
      %28 = arith.addi %25, %27 : vector<16x128xi32>
      %c2_i32 = arith.constant 2 : i32
      %29 = vector.broadcast %c2_i32 : i32 to vector<16x128xi32>
      %30 = arith.cmpi slt, %28, %29 : vector<16x128xi32>
      %cst_20 = arith.constant 0.000000e+00 : f32
      %31 = vector.broadcast %cst_20 : f32 to vector<16x128xf32>
      %32 = arith.select %30, %24, %31 : vector<16x128xi1>, vector<16x128xf32>
      %c0_21 = arith.constant 0 : index
      %c0_22 = arith.constant 0 : index
      %33 = vector.load %arg8[%c0_21, %c0_22] : memref<1x128xf32, #tpu.memory_space<vmem>>, vector<1x128xf32>
      %cst_23 = arith.constant dense<0.000000e+00> : vector<128xf32>
      %34 = vector.multi_reduction <add>, %32, %cst_23 [0] : vector<16x128xf32> to vector<128xf32>
      %35 = vector.shape_cast %34 : vector<128xf32> to vector<1x128xf32>
      %36 = arith.addf %33, %35 : vector<1x128xf32>
      %c0_24 = arith.constant 0 : index
      %c0_25 = arith.constant 0 : index
      %37 = vector.load %arg8[%c0_24, %c0_25] : memref<1x128xf32, #tpu.memory_space<vmem>>, vector<1x128xf32>
      tpu.vector_store %arg8[%c0_24, %c0_25], %36 {strides = array<i32>} : memref<1x128xf32, #tpu.memory_space<vmem>>, vector<1x128xf32>,
      %c0_26 = arith.constant 0 : index
      %c0_27 = arith.constant 0 : index
      %38 = vector.load %arg9[%c0_26, %c0_27] : memref<1x128xf32, #tpu.memory_space<vmem>>, vector<1x128xf32>
      %39 = arith.mulf %32, %32 : vector<16x128xf32>
      %cst_28 = arith.constant dense<0.000000e+00> : vector<128xf32>
      %40 = vector.multi_reduction <add>, %39, %cst_28 [0] : vector<16x128xf32> to vector<128xf32>
      %41 = vector.shape_cast %40 : vector<128xf32> to vector<1x128xf32>
      %42 = arith.addf %38, %41 : vector<1x128xf32>
      %c0_29 = arith.constant 0 : index
      %c0_30 = arith.constant 0 : index
      %43 = vector.load %arg9[%c0_29, %c0_30] : memref<1x128xf32, #tpu.memory_space<vmem>>, vector<1x128xf32>
      tpu.vector_store %arg9[%c0_29, %c0_30], %42 {strides = array<i32>} : memref<1x128xf32, #tpu.memory_space<vmem>>, vector<1x128xf32>,
      %44 = arith.truncf %24 : vector<16x128xf32> to vector<16x128xbf16>
      %c0_31 = arith.constant 0 : index
      %c0_32 = arith.constant 0 : index
      %c0_33 = arith.constant 0 : index
      %45 = vector.load %arg7[%c0_31, %c0_32, %c0_33] : memref<1x16x128xbf16, #tpu.memory_space<vmem>>, vector<1x16x128xbf16>
      %46 = vector.shape_cast %45 : vector<1x16x128xbf16> to vector<16x128xbf16>
      %47 = vector.shape_cast %44 : vector<16x128xbf16> to vector<1x16x128xbf16>
      tpu.vector_store %arg7[%c0_31, %c0_32, %c0_33], %47 {strides = array<i32>} : memref<1x16x128xbf16, #tpu.memory_space<vmem>>, vector<1x16x128xbf16>,
    } else {
    }
    return
  }
  func.func @transform_0(%arg0: i32, %arg1: i32, %arg2: i32, %arg3: i32) -> (i32, i32, i32) {
    %c0_i32 = arith.constant 0 : i32
    return %arg1, %arg2, %arg3 : i32, i32, i32
  }
  func.func @transform_1(%arg0: i32, %arg1: i32, %arg2: i32, %arg3: i32) -> (i32, i32, i32) {
    %c0_i32 = arith.constant 0 : i32
    return %arg1, %arg3, %arg0 : i32, i32, i32
  }
  func.func @transform_2(%arg0: i32, %arg1: i32, %arg2: i32, %arg3: i32) -> (i32, i32) {
    %c0_i32 = arith.constant 0 : i32
    %c0_i32_0 = arith.constant 0 : i32
    return %c0_i32, %arg0 : i32, i32
  }
  func.func @transform_3(%arg0: i32, %arg1: i32, %arg2: i32, %arg3: i32) -> (i32, i32, i32) {
    %c0_i32 = arith.constant 0 : i32
    return %arg1, %arg2, %arg0 : i32, i32, i32
  }
  func.func @transform_4(%arg0: i32, %arg1: i32, %arg2: i32, %arg3: i32) -> (i32, i32) {
    %c0_i32 = arith.constant 0 : i32
    %c0_i32_0 = arith.constant 0 : i32
    return %c0_i32, %arg0 : i32, i32
  }
  func.func @transform_5(%arg0: i32, %arg1: i32, %arg2: i32, %arg3: i32) -> (i32, i32) {
    %c0_i32 = arith.constant 0 : i32
    %c0_i32_0 = arith.constant 0 : i32
    return %c0_i32, %arg0 : i32, i32
  }
}

module attributes {stable_mosaic.version = 11 : i64} {
  func.func @_mm_kernel(%arg0: i32, %arg1: i32, %arg2: i32, %arg3: i32, %arg4: memref<1x16x512xbf16, #tpu.memory_space<vmem>>, %arg5: memref<1x512x128xbf16, #tpu.memory_space<vmem>>, %arg6: memref<1x128xf32, #tpu.memory_space<vmem>>, %arg7: memref<1x16x128xbf16, #tpu.memory_space<vmem>>, %arg8: memref<1x128xf32, #tpu.memory_space<vmem>>, %arg9: memref<1x128xf32, #tpu.memory_space<vmem>>, %arg10: memref<16x128xf32, #tpu.memory_space<vmem>>) attributes {dimension_semantics = [#tpu.dimension_semantics<parallel>, #tpu.dimension_semantics<arbitrary>, #tpu.dimension_semantics<arbitrary>, #tpu.dimension_semantics<arbitrary>], iteration_bounds = array<i64: 1, 4, 1, 1>, scalar_prefetch = 0 : i64, scratch_operands = 1 : i64, tpu.core_type = #tpu.core_type<tc>, window_params = [{transform_indices = @transform_0, window_bounds = array<i64: 1, 16, 512>}, {transform_indices = @transform_1, window_bounds = array<i64: 1, 512, 128>}, {transform_indices = @transform_2, window_bounds = array<i64: 1, 128>}, {transform_indices = @transform_3, window_bounds = array<i64: 1, 16, 128>}, {transform_indices = @transform_4, window_bounds = array<i64: 1, 128>}, {transform_indices = @transform_5, window_bounds = array<i64: 1, 128>}]} {
    %c0_i32 = arith.constant 0 : i32
    %0 = arith.cmpi eq, %arg3, %c0_i32 : i32
    %1 = arith.extui %0 : i1 to i32
    %c0_i32_0 = arith.constant 0 : i32
    %2 = arith.cmpi ne, %1, %c0_i32_0 : i32
    scf.if %2 {
      %cst_16 = arith.constant 0.000000e+00 : f32
      %21 = vector.broadcast %cst_16 : f32 to vector<16x128xf32>
      %c0_17 = arith.constant 0 : index
      %c0_18 = arith.constant 0 : index
      %22 = vector.load %arg10[%c0_17, %c0_18] : memref<16x128xf32, #tpu.memory_space<vmem>>, vector<16x128xf32>
      tpu.vector_store %arg10[%c0_17, %c0_18], %21 {strides = array<i32>} : memref<16x128xf32, #tpu.memory_space<vmem>>, vector<16x128xf32>,
    } else {
    }
    %c0_i32_1 = arith.constant 0 : i32
    %3 = arith.cmpi eq, %arg1, %c0_i32_1 : i32
    %c0_i32_2 = arith.constant 0 : i32
    %4 = arith.cmpi eq, %arg2, %c0_i32_2 : i32
    %5 = arith.andi %3, %4 : i1
    %c0_i32_3 = arith.constant 0 : i32
    %6 = arith.cmpi eq, %arg3, %c0_i32_3 : i32
    %7 = arith.andi %5, %6 : i1
    %8 = arith.extui %7 : i1 to i32
    %c0_i32_4 = arith.constant 0 : i32
    %9 = arith.cmpi ne, %8, %c0_i32_4 : i32
    scf.if %9 {
      %cst_16 = arith.constant 0.000000e+00 : f32
      %21 = vector.broadcast %cst_16 : f32 to vector<1x128xf32>
      %c0_17 = arith.constant 0 : index
      %c0_18 = arith.constant 0 : index
      %22 = vector.load %arg8[%c0_17, %c0_18] : memref<1x128xf32, #tpu.memory_space<vmem>>, vector<1x128xf32>
      tpu.vector_store %arg8[%c0_17, %c0_18], %21 {strides = array<i32>} : memref<1x128xf32, #tpu.memory_space<vmem>>, vector<1x128xf32>,
      %cst_19 = arith.constant 0.000000e+00 : f32
      %23 = vector.broadcast %cst_19 : f32 to vector<1x128xf32>
      %c0_20 = arith.constant 0 : index
      %c0_21 = arith.constant 0 : index
      %24 = vector.load %arg9[%c0_20, %c0_21] : memref<1x128xf32, #tpu.memory_space<vmem>>, vector<1x128xf32>
      tpu.vector_store %arg9[%c0_20, %c0_21], %23 {strides = array<i32>} : memref<1x128xf32, #tpu.memory_space<vmem>>, vector<1x128xf32>,
    } else {
    }
    %c0 = arith.constant 0 : index
    %c0_5 = arith.constant 0 : index
    %10 = vector.load %arg10[%c0, %c0_5] : memref<16x128xf32, #tpu.memory_space<vmem>>, vector<16x128xf32>
    %c0_6 = arith.constant 0 : index
    %c0_7 = arith.constant 0 : index
    %c0_8 = arith.constant 0 : index
    %11 = vector.load %arg4[%c0_6, %c0_7, %c0_8] : memref<1x16x512xbf16, #tpu.memory_space<vmem>>, vector<1x16x512xbf16>
    %12 = vector.shape_cast %11 : vector<1x16x512xbf16> to vector<16x512xbf16>
    %c0_9 = arith.constant 0 : index
    %c0_10 = arith.constant 0 : index
    %c0_11 = arith.constant 0 : index
    %13 = vector.load %arg5[%c0_9, %c0_10, %c0_11] : memref<1x512x128xbf16, #tpu.memory_space<vmem>>, vector<1x512x128xbf16>
    %14 = vector.shape_cast %13 : vector<1x512x128xbf16> to vector<512x128xbf16>
    %cst = arith.constant dense<0.000000e+00> : vector<16x128xf32>
    %15 = tpu.matmul %12, %14, %cst {dimension_numbers = #tpu.dot_dimension_numbers<[1], [0], [0], [1], [0, 0, 1, 1], [], []>} : vector<16x512xbf16>, vector<512x128xbf16>, vector<16x128xf32> -> vector<16x128xf32>
    %16 = arith.addf %10, %15 : vector<16x128xf32>
    %c0_12 = arith.constant 0 : index
    %c0_13 = arith.constant 0 : index
    %17 = vector.load %arg10[%c0_12, %c0_13] : memref<16x128xf32, #tpu.memory_space<vmem>>, vector<16x128xf32>
    tpu.vector_store %arg10[%c0_12, %c0_13], %16 {strides = array<i32>} : memref<16x128xf32, #tpu.memory_space<vmem>>, vector<16x128xf32>,
    %c0_i32_14 = arith.constant 0 : i32
    %18 = arith.cmpi eq, %arg3, %c0_i32_14 : i32
    %19 = arith.extui %18 : i1 to i32
    %c0_i32_15 = arith.constant 0 : i32
    %20 = arith.cmpi ne, %19, %c0_i32_15 : i32
    scf.if %20 {
      %c0_16 = arith.constant 0 : index
      %c0_17 = arith.constant 0 : index
      %21 = vector.load %arg10[%c0_16, %c0_17] : memref<16x128xf32, #tpu.memory_space<vmem>>, vector<16x128xf32>
      %c0_18 = arith.constant 0 : index
      %c0_19 = arith.constant 0 : index
      %22 = vector.load %arg6[%c0_18, %c0_19] : memref<1x128xf32, #tpu.memory_space<vmem>>, vector<1x128xf32>
      %23 = vector.broadcast %22 : vector<1x128xf32> to vector<16x128xf32>
      %24 = arith.addf %21, %23 : vector<16x128xf32>
      %25 = tpu.iota {dimensions = array<i32: 0>} : vector<16x128xi32>
      %c16_i32 = arith.constant 16 : i32
      %26 = arith.muli %arg2, %c16_i32 : i32
      %27 = vector.broadcast %26 : i32 to vector<16x128xi32>
      %28 = arith.addi %25, %27 : vector<16x128xi32>
      %c8_i32 = arith.constant 8 : i32
      %29 = vector.broadcast %c8_i32 : i32 to vector<16x128xi32>
      %30 = arith.cmpi slt, %28, %29 : vector<16x128xi32>
      %cst_20 = arith.constant 0.000000e+00 : f32
      %31 = vector.broadcast %cst_20 : f32 to vector<16x128xf32>
      %32 = arith.select %30, %24, %31 : vector<16x128xi1>, vector<16x128xf32>
      %c0_21 = arith.constant 0 : index
      %c0_22 = arith.constant 0 : index
      %33 = vector.load %arg8[%c0_21, %c0_22] : memref<1x128xf32, #tpu.memory_space<vmem>>, vector<1x128xf32>
      %cst_23 = arith.constant dense<0.000000e+00> : vector<128xf32>
      %34 = vector.multi_reduction <add>, %32, %cst_23 [0] : vector<16x128xf32> to vector<128xf32>
      %35 = vector.shape_cast %34 : vector<128xf32> to vector<1x128xf32>
      %36 = arith.addf %33, %35 : vector<1x128xf32>
      %c0_24 = arith.constant 0 : index
      %c0_25 = arith.constant 0 : index
      %37 = vector.load %arg8[%c0_24, %c0_25] : memref<1x128xf32, #tpu.memory_space<vmem>>, vector<1x128xf32>
      tpu.vector_store %arg8[%c0_24, %c0_25], %36 {strides = array<i32>} : memref<1x128xf32, #tpu.memory_space<vmem>>, vector<1x128xf32>,
      %c0_26 = arith.constant 0 : index
      %c0_27 = arith.constant 0 : index
      %38 = vector.load %arg9[%c0_26, %c0_27] : memref<1x128xf32, #tpu.memory_space<vmem>>, vector<1x128xf32>
      %39 = arith.mulf %32, %32 : vector<16x128xf32>
      %cst_28 = arith.constant dense<0.000000e+00> : vector<128xf32>
      %40 = vector.multi_reduction <add>, %39, %cst_28 [0] : vector<16x128xf32> to vector<128xf32>
      %41 = vector.shape_cast %40 : vector<128xf32> to vector<1x128xf32>
      %42 = arith.addf %38, %41 : vector<1x128xf32>
      %c0_29 = arith.constant 0 : index
      %c0_30 = arith.constant 0 : index
      %43 = vector.load %arg9[%c0_29, %c0_30] : memref<1x128xf32, #tpu.memory_space<vmem>>, vector<1x128xf32>
      tpu.vector_store %arg9[%c0_29, %c0_30], %42 {strides = array<i32>} : memref<1x128xf32, #tpu.memory_space<vmem>>, vector<1x128xf32>,
      %44 = arith.truncf %24 : vector<16x128xf32> to vector<16x128xbf16>
      %c0_31 = arith.constant 0 : index
      %c0_32 = arith.constant 0 : index
      %c0_33 = arith.constant 0 : index
      %45 = vector.load %arg7[%c0_31, %c0_32, %c0_33] : memref<1x16x128xbf16, #tpu.memory_space<vmem>>, vector<1x16x128xbf16>
      %46 = vector.shape_cast %45 : vector<1x16x128xbf16> to vector<16x128xbf16>
      %47 = vector.shape_cast %44 : vector<16x128xbf16> to vector<1x16x128xbf16>
      tpu.vector_store %arg7[%c0_31, %c0_32, %c0_33], %47 {strides = array<i32>} : memref<1x16x128xbf16, #tpu.memory_space<vmem>>, vector<1x16x128xbf16>,
    } else {
    }
    return
  }
  func.func @transform_0(%arg0: i32, %arg1: i32, %arg2: i32, %arg3: i32) -> (i32, i32, i32) {
    %c0_i32 = arith.constant 0 : i32
    return %arg1, %arg2, %arg3 : i32, i32, i32
  }
  func.func @transform_1(%arg0: i32, %arg1: i32, %arg2: i32, %arg3: i32) -> (i32, i32, i32) {
    %c0_i32 = arith.constant 0 : i32
    return %arg1, %arg3, %arg0 : i32, i32, i32
  }
  func.func @transform_2(%arg0: i32, %arg1: i32, %arg2: i32, %arg3: i32) -> (i32, i32) {
    %c0_i32 = arith.constant 0 : i32
    %c0_i32_0 = arith.constant 0 : i32
    return %c0_i32, %arg0 : i32, i32
  }
  func.func @transform_3(%arg0: i32, %arg1: i32, %arg2: i32, %arg3: i32) -> (i32, i32, i32) {
    %c0_i32 = arith.constant 0 : i32
    return %arg1, %arg2, %arg0 : i32, i32, i32
  }
  func.func @transform_4(%arg0: i32, %arg1: i32, %arg2: i32, %arg3: i32) -> (i32, i32) {
    %c0_i32 = arith.constant 0 : i32
    %c0_i32_0 = arith.constant 0 : i32
    return %c0_i32, %arg0 : i32, i32
  }
  func.func @transform_5(%arg0: i32, %arg1: i32, %arg2: i32, %arg3: i32) -> (i32, i32) {
    %c0_i32 = arith.constant 0 : i32
    %c0_i32_0 = arith.constant 0 : i32
    return %c0_i32, %arg0 : i32, i32
  }
}

module attributes {stable_mosaic.version = 11 : i64} {
  func.func @_affine_kernel(%arg0: i32, %arg1: memref<32x128xbf16, #tpu.memory_space<vmem>>, %arg2: memref<1x128xf32, #tpu.memory_space<vmem>>, %arg3: memref<1x128xf32, #tpu.memory_space<vmem>>, %arg4: memref<32x128xbf16, #tpu.memory_space<vmem>>) attributes {dimension_semantics = [#tpu.dimension_semantics<parallel>], iteration_bounds = array<i64: 4>, scalar_prefetch = 0 : i64, scratch_operands = 0 : i64, tpu.core_type = #tpu.core_type<tc>, window_params = [{transform_indices = @transform_0, window_bounds = array<i64: 32, 128>}, {pipeline_mode = #tpu.pipeline_mode<synchronous>, transform_indices = @transform_1, window_bounds = array<i64: 1, 128>}, {pipeline_mode = #tpu.pipeline_mode<synchronous>, transform_indices = @transform_2, window_bounds = array<i64: 1, 128>}, {transform_indices = @transform_3, window_bounds = array<i64: 32, 128>}]} {
    %c0 = arith.constant 0 : index
    %c0_0 = arith.constant 0 : index
    %0 = vector.load %arg1[%c0, %c0_0] : memref<32x128xbf16, #tpu.memory_space<vmem>>, vector<32x128xbf16>
    %1 = arith.extf %0 : vector<32x128xbf16> to vector<32x128xf32>
    %c0_1 = arith.constant 0 : index
    %c0_2 = arith.constant 0 : index
    %2 = vector.load %arg2[%c0_1, %c0_2] : memref<1x128xf32, #tpu.memory_space<vmem>>, vector<1x128xf32>
    %3 = vector.broadcast %2 : vector<1x128xf32> to vector<32x128xf32>
    %4 = arith.mulf %1, %3 : vector<32x128xf32>
    %c0_3 = arith.constant 0 : index
    %c0_4 = arith.constant 0 : index
    %5 = vector.load %arg3[%c0_3, %c0_4] : memref<1x128xf32, #tpu.memory_space<vmem>>, vector<1x128xf32>
    %6 = vector.broadcast %5 : vector<1x128xf32> to vector<32x128xf32>
    %7 = arith.addf %4, %6 : vector<32x128xf32>
    %8 = arith.truncf %7 : vector<32x128xf32> to vector<32x128xbf16>
    %c0_5 = arith.constant 0 : index
    %c0_6 = arith.constant 0 : index
    %9 = vector.load %arg4[%c0_5, %c0_6] : memref<32x128xbf16, #tpu.memory_space<vmem>>, vector<32x128xbf16>
    tpu.vector_store %arg4[%c0_5, %c0_6], %8 {strides = array<i32>} : memref<32x128xbf16, #tpu.memory_space<vmem>>, vector<32x128xbf16>,
    return
  }
  func.func @transform_0(%arg0: i32) -> (i32, i32) {
    %c0_i32 = arith.constant 0 : i32
    %c0_i32_0 = arith.constant 0 : i32
    return %arg0, %c0_i32 : i32, i32
  }
  func.func @transform_1(%arg0: i32) -> (i32, i32) {
    %c0_i32 = arith.constant 0 : i32
    %c0_i32_0 = arith.constant 0 : i32
    %c0_i32_1 = arith.constant 0 : i32
    return %c0_i32, %c0_i32_0 : i32, i32
  }
  func.func @transform_2(%arg0: i32) -> (i32, i32) {
    %c0_i32 = arith.constant 0 : i32
    %c0_i32_0 = arith.constant 0 : i32
    %c0_i32_1 = arith.constant 0 : i32
    return %c0_i32, %c0_i32_0 : i32, i32
  }
  func.func @transform_3(%arg0: i32) -> (i32, i32) {
    %c0_i32 = arith.constant 0 : i32
    %c0_i32_0 = arith.constant 0 : i32
    return %arg0, %c0_i32 : i32, i32
  }
}

module attributes {stable_mosaic.version = 11 : i64} {
  func.func @_mm_kernel(%arg0: i32, %arg1: i32, %arg2: i32, %arg3: i32, %arg4: memref<1x32x256xbf16, #tpu.memory_space<vmem>>, %arg5: memref<1x256x128xbf16, #tpu.memory_space<vmem>>, %arg6: memref<1x128xf32, #tpu.memory_space<vmem>>, %arg7: memref<1x32x128xbf16, #tpu.memory_space<vmem>>, %arg8: memref<1x128xf32, #tpu.memory_space<vmem>>, %arg9: memref<1x128xf32, #tpu.memory_space<vmem>>, %arg10: memref<32x128xf32, #tpu.memory_space<vmem>>) attributes {dimension_semantics = [#tpu.dimension_semantics<parallel>, #tpu.dimension_semantics<arbitrary>, #tpu.dimension_semantics<arbitrary>, #tpu.dimension_semantics<arbitrary>], iteration_bounds = array<i64: 1, 4, 1, 1>, scalar_prefetch = 0 : i64, scratch_operands = 1 : i64, tpu.core_type = #tpu.core_type<tc>, window_params = [{transform_indices = @transform_0, window_bounds = array<i64: 1, 32, 256>}, {transform_indices = @transform_1, window_bounds = array<i64: 1, 256, 128>}, {transform_indices = @transform_2, window_bounds = array<i64: 1, 128>}, {transform_indices = @transform_3, window_bounds = array<i64: 1, 32, 128>}, {transform_indices = @transform_4, window_bounds = array<i64: 1, 128>}, {transform_indices = @transform_5, window_bounds = array<i64: 1, 128>}]} {
    %c0_i32 = arith.constant 0 : i32
    %0 = arith.cmpi eq, %arg3, %c0_i32 : i32
    %1 = arith.extui %0 : i1 to i32
    %c0_i32_0 = arith.constant 0 : i32
    %2 = arith.cmpi ne, %1, %c0_i32_0 : i32
    scf.if %2 {
      %cst_16 = arith.constant 0.000000e+00 : f32
      %21 = vector.broadcast %cst_16 : f32 to vector<32x128xf32>
      %c0_17 = arith.constant 0 : index
      %c0_18 = arith.constant 0 : index
      %22 = vector.load %arg10[%c0_17, %c0_18] : memref<32x128xf32, #tpu.memory_space<vmem>>, vector<32x128xf32>
      tpu.vector_store %arg10[%c0_17, %c0_18], %21 {strides = array<i32>} : memref<32x128xf32, #tpu.memory_space<vmem>>, vector<32x128xf32>,
    } else {
    }
    %c0_i32_1 = arith.constant 0 : i32
    %3 = arith.cmpi eq, %arg1, %c0_i32_1 : i32
    %c0_i32_2 = arith.constant 0 : i32
    %4 = arith.cmpi eq, %arg2, %c0_i32_2 : i32
    %5 = arith.andi %3, %4 : i1
    %c0_i32_3 = arith.constant 0 : i32
    %6 = arith.cmpi eq, %arg3, %c0_i32_3 : i32
    %7 = arith.andi %5, %6 : i1
    %8 = arith.extui %7 : i1 to i32
    %c0_i32_4 = arith.constant 0 : i32
    %9 = arith.cmpi ne, %8, %c0_i32_4 : i32
    scf.if %9 {
      %cst_16 = arith.constant 0.000000e+00 : f32
      %21 = vector.broadcast %cst_16 : f32 to vector<1x128xf32>
      %c0_17 = arith.constant 0 : index
      %c0_18 = arith.constant 0 : index
      %22 = vector.load %arg8[%c0_17, %c0_18] : memref<1x128xf32, #tpu.memory_space<vmem>>, vector<1x128xf32>
      tpu.vector_store %arg8[%c0_17, %c0_18], %21 {strides = array<i32>} : memref<1x128xf32, #tpu.memory_space<vmem>>, vector<1x128xf32>,
      %cst_19 = arith.constant 0.000000e+00 : f32
      %23 = vector.broadcast %cst_19 : f32 to vector<1x128xf32>
      %c0_20 = arith.constant 0 : index
      %c0_21 = arith.constant 0 : index
      %24 = vector.load %arg9[%c0_20, %c0_21] : memref<1x128xf32, #tpu.memory_space<vmem>>, vector<1x128xf32>
      tpu.vector_store %arg9[%c0_20, %c0_21], %23 {strides = array<i32>} : memref<1x128xf32, #tpu.memory_space<vmem>>, vector<1x128xf32>,
    } else {
    }
    %c0 = arith.constant 0 : index
    %c0_5 = arith.constant 0 : index
    %10 = vector.load %arg10[%c0, %c0_5] : memref<32x128xf32, #tpu.memory_space<vmem>>, vector<32x128xf32>
    %c0_6 = arith.constant 0 : index
    %c0_7 = arith.constant 0 : index
    %c0_8 = arith.constant 0 : index
    %11 = vector.load %arg4[%c0_6, %c0_7, %c0_8] : memref<1x32x256xbf16, #tpu.memory_space<vmem>>, vector<1x32x256xbf16>
    %12 = vector.shape_cast %11 : vector<1x32x256xbf16> to vector<32x256xbf16>
    %c0_9 = arith.constant 0 : index
    %c0_10 = arith.constant 0 : index
    %c0_11 = arith.constant 0 : index
    %13 = vector.load %arg5[%c0_9, %c0_10, %c0_11] : memref<1x256x128xbf16, #tpu.memory_space<vmem>>, vector<1x256x128xbf16>
    %14 = vector.shape_cast %13 : vector<1x256x128xbf16> to vector<256x128xbf16>
    %cst = arith.constant dense<0.000000e+00> : vector<32x128xf32>
    %15 = tpu.matmul %12, %14, %cst {dimension_numbers = #tpu.dot_dimension_numbers<[1], [0], [0], [1], [0, 0, 1, 1], [], []>} : vector<32x256xbf16>, vector<256x128xbf16>, vector<32x128xf32> -> vector<32x128xf32>
    %16 = arith.addf %10, %15 : vector<32x128xf32>
    %c0_12 = arith.constant 0 : index
    %c0_13 = arith.constant 0 : index
    %17 = vector.load %arg10[%c0_12, %c0_13] : memref<32x128xf32, #tpu.memory_space<vmem>>, vector<32x128xf32>
    tpu.vector_store %arg10[%c0_12, %c0_13], %16 {strides = array<i32>} : memref<32x128xf32, #tpu.memory_space<vmem>>, vector<32x128xf32>,
    %c0_i32_14 = arith.constant 0 : i32
    %18 = arith.cmpi eq, %arg3, %c0_i32_14 : i32
    %19 = arith.extui %18 : i1 to i32
    %c0_i32_15 = arith.constant 0 : i32
    %20 = arith.cmpi ne, %19, %c0_i32_15 : i32
    scf.if %20 {
      %c0_16 = arith.constant 0 : index
      %c0_17 = arith.constant 0 : index
      %21 = vector.load %arg10[%c0_16, %c0_17] : memref<32x128xf32, #tpu.memory_space<vmem>>, vector<32x128xf32>
      %c0_18 = arith.constant 0 : index
      %c0_19 = arith.constant 0 : index
      %22 = vector.load %arg6[%c0_18, %c0_19] : memref<1x128xf32, #tpu.memory_space<vmem>>, vector<1x128xf32>
      %23 = vector.broadcast %22 : vector<1x128xf32> to vector<32x128xf32>
      %24 = arith.addf %21, %23 : vector<32x128xf32>
      %25 = tpu.iota {dimensions = array<i32: 0>} : vector<32x128xi32>
      %c32_i32 = arith.constant 32 : i32
      %26 = arith.muli %arg2, %c32_i32 : i32
      %27 = vector.broadcast %26 : i32 to vector<32x128xi32>
      %28 = arith.addi %25, %27 : vector<32x128xi32>
      %c32_i32_20 = arith.constant 32 : i32
      %29 = vector.broadcast %c32_i32_20 : i32 to vector<32x128xi32>
      %30 = arith.cmpi slt, %28, %29 : vector<32x128xi32>
      %cst_21 = arith.constant 0.000000e+00 : f32
      %31 = vector.broadcast %cst_21 : f32 to vector<32x128xf32>
      %32 = arith.select %30, %24, %31 : vector<32x128xi1>, vector<32x128xf32>
      %c0_22 = arith.constant 0 : index
      %c0_23 = arith.constant 0 : index
      %33 = vector.load %arg8[%c0_22, %c0_23] : memref<1x128xf32, #tpu.memory_space<vmem>>, vector<1x128xf32>
      %cst_24 = arith.constant dense<0.000000e+00> : vector<128xf32>
      %34 = vector.multi_reduction <add>, %32, %cst_24 [0] : vector<32x128xf32> to vector<128xf32>
      %35 = vector.shape_cast %34 : vector<128xf32> to vector<1x128xf32>
      %36 = arith.addf %33, %35 : vector<1x128xf32>
      %c0_25 = arith.constant 0 : index
      %c0_26 = arith.constant 0 : index
      %37 = vector.load %arg8[%c0_25, %c0_26] : memref<1x128xf32, #tpu.memory_space<vmem>>, vector<1x128xf32>
      tpu.vector_store %arg8[%c0_25, %c0_26], %36 {strides = array<i32>} : memref<1x128xf32, #tpu.memory_space<vmem>>, vector<1x128xf32>,
      %c0_27 = arith.constant 0 : index
      %c0_28 = arith.constant 0 : index
      %38 = vector.load %arg9[%c0_27, %c0_28] : memref<1x128xf32, #tpu.memory_space<vmem>>, vector<1x128xf32>
      %39 = arith.mulf %32, %32 : vector<32x128xf32>
      %cst_29 = arith.constant dense<0.000000e+00> : vector<128xf32>
      %40 = vector.multi_reduction <add>, %39, %cst_29 [0] : vector<32x128xf32> to vector<128xf32>
      %41 = vector.shape_cast %40 : vector<128xf32> to vector<1x128xf32>
      %42 = arith.addf %38, %41 : vector<1x128xf32>
      %c0_30 = arith.constant 0 : index
      %c0_31 = arith.constant 0 : index
      %43 = vector.load %arg9[%c0_30, %c0_31] : memref<1x128xf32, #tpu.memory_space<vmem>>, vector<1x128xf32>
      tpu.vector_store %arg9[%c0_30, %c0_31], %42 {strides = array<i32>} : memref<1x128xf32, #tpu.memory_space<vmem>>, vector<1x128xf32>,
      %44 = arith.truncf %24 : vector<32x128xf32> to vector<32x128xbf16>
      %c0_32 = arith.constant 0 : index
      %c0_33 = arith.constant 0 : index
      %c0_34 = arith.constant 0 : index
      %45 = vector.load %arg7[%c0_32, %c0_33, %c0_34] : memref<1x32x128xbf16, #tpu.memory_space<vmem>>, vector<1x32x128xbf16>
      %46 = vector.shape_cast %45 : vector<1x32x128xbf16> to vector<32x128xbf16>
      %47 = vector.shape_cast %44 : vector<32x128xbf16> to vector<1x32x128xbf16>
      tpu.vector_store %arg7[%c0_32, %c0_33, %c0_34], %47 {strides = array<i32>} : memref<1x32x128xbf16, #tpu.memory_space<vmem>>, vector<1x32x128xbf16>,
    } else {
    }
    return
  }
  func.func @transform_0(%arg0: i32, %arg1: i32, %arg2: i32, %arg3: i32) -> (i32, i32, i32) {
    %c0_i32 = arith.constant 0 : i32
    return %arg1, %arg2, %arg3 : i32, i32, i32
  }
  func.func @transform_1(%arg0: i32, %arg1: i32, %arg2: i32, %arg3: i32) -> (i32, i32, i32) {
    %c0_i32 = arith.constant 0 : i32
    return %arg1, %arg3, %arg0 : i32, i32, i32
  }
  func.func @transform_2(%arg0: i32, %arg1: i32, %arg2: i32, %arg3: i32) -> (i32, i32) {
    %c0_i32 = arith.constant 0 : i32
    %c0_i32_0 = arith.constant 0 : i32
    return %c0_i32, %arg0 : i32, i32
  }
  func.func @transform_3(%arg0: i32, %arg1: i32, %arg2: i32, %arg3: i32) -> (i32, i32, i32) {
    %c0_i32 = arith.constant 0 : i32
    return %arg1, %arg2, %arg0 : i32, i32, i32
  }
  func.func @transform_4(%arg0: i32, %arg1: i32, %arg2: i32, %arg3: i32) -> (i32, i32) {
    %c0_i32 = arith.constant 0 : i32
    %c0_i32_0 = arith.constant 0 : i32
    return %c0_i32, %arg0 : i32, i32
  }
  func.func @transform_5(%arg0: i32, %arg1: i32, %arg2: i32, %arg3: i32) -> (i32, i32) {
    %c0_i32 = arith.constant 0 : i32
    %c0_i32_0 = arith.constant 0 : i32
    return %c0_i32, %arg0 : i32, i32
  }
}

module attributes {stable_mosaic.version = 11 : i64} {
  func.func @_mm_kernel(%arg0: i32, %arg1: i32, %arg2: i32, %arg3: i32, %arg4: memref<1x128x128xbf16, #tpu.memory_space<vmem>>, %arg5: memref<1x128x128xbf16, #tpu.memory_space<vmem>>, %arg6: memref<1x128xf32, #tpu.memory_space<vmem>>, %arg7: memref<1x128x128xbf16, #tpu.memory_space<vmem>>, %arg8: memref<1x128xf32, #tpu.memory_space<vmem>>, %arg9: memref<1x128xf32, #tpu.memory_space<vmem>>, %arg10: memref<128x128xf32, #tpu.memory_space<vmem>>) attributes {dimension_semantics = [#tpu.dimension_semantics<parallel>, #tpu.dimension_semantics<arbitrary>, #tpu.dimension_semantics<arbitrary>, #tpu.dimension_semantics<arbitrary>], iteration_bounds = array<i64: 1, 4, 1, 1>, scalar_prefetch = 0 : i64, scratch_operands = 1 : i64, tpu.core_type = #tpu.core_type<tc>, window_params = [{transform_indices = @transform_0, window_bounds = array<i64: 1, 128, 128>}, {transform_indices = @transform_1, window_bounds = array<i64: 1, 128, 128>}, {transform_indices = @transform_2, window_bounds = array<i64: 1, 128>}, {transform_indices = @transform_3, window_bounds = array<i64: 1, 128, 128>}, {transform_indices = @transform_4, window_bounds = array<i64: 1, 128>}, {transform_indices = @transform_5, window_bounds = array<i64: 1, 128>}]} {
    %c0_i32 = arith.constant 0 : i32
    %0 = arith.cmpi eq, %arg3, %c0_i32 : i32
    %1 = arith.extui %0 : i1 to i32
    %c0_i32_0 = arith.constant 0 : i32
    %2 = arith.cmpi ne, %1, %c0_i32_0 : i32
    scf.if %2 {
      %cst_16 = arith.constant 0.000000e+00 : f32
      %21 = vector.broadcast %cst_16 : f32 to vector<128x128xf32>
      %c0_17 = arith.constant 0 : index
      %c0_18 = arith.constant 0 : index
      %22 = vector.load %arg10[%c0_17, %c0_18] : memref<128x128xf32, #tpu.memory_space<vmem>>, vector<128x128xf32>
      tpu.vector_store %arg10[%c0_17, %c0_18], %21 {strides = array<i32>} : memref<128x128xf32, #tpu.memory_space<vmem>>, vector<128x128xf32>,
    } else {
    }
    %c0_i32_1 = arith.constant 0 : i32
    %3 = arith.cmpi eq, %arg1, %c0_i32_1 : i32
    %c0_i32_2 = arith.constant 0 : i32
    %4 = arith.cmpi eq, %arg2, %c0_i32_2 : i32
    %5 = arith.andi %3, %4 : i1
    %c0_i32_3 = arith.constant 0 : i32
    %6 = arith.cmpi eq, %arg3, %c0_i32_3 : i32
    %7 = arith.andi %5, %6 : i1
    %8 = arith.extui %7 : i1 to i32
    %c0_i32_4 = arith.constant 0 : i32
    %9 = arith.cmpi ne, %8, %c0_i32_4 : i32
    scf.if %9 {
      %cst_16 = arith.constant 0.000000e+00 : f32
      %21 = vector.broadcast %cst_16 : f32 to vector<1x128xf32>
      %c0_17 = arith.constant 0 : index
      %c0_18 = arith.constant 0 : index
      %22 = vector.load %arg8[%c0_17, %c0_18] : memref<1x128xf32, #tpu.memory_space<vmem>>, vector<1x128xf32>
      tpu.vector_store %arg8[%c0_17, %c0_18], %21 {strides = array<i32>} : memref<1x128xf32, #tpu.memory_space<vmem>>, vector<1x128xf32>,
      %cst_19 = arith.constant 0.000000e+00 : f32
      %23 = vector.broadcast %cst_19 : f32 to vector<1x128xf32>
      %c0_20 = arith.constant 0 : index
      %c0_21 = arith.constant 0 : index
      %24 = vector.load %arg9[%c0_20, %c0_21] : memref<1x128xf32, #tpu.memory_space<vmem>>, vector<1x128xf32>
      tpu.vector_store %arg9[%c0_20, %c0_21], %23 {strides = array<i32>} : memref<1x128xf32, #tpu.memory_space<vmem>>, vector<1x128xf32>,
    } else {
    }
    %c0 = arith.constant 0 : index
    %c0_5 = arith.constant 0 : index
    %10 = vector.load %arg10[%c0, %c0_5] : memref<128x128xf32, #tpu.memory_space<vmem>>, vector<128x128xf32>
    %c0_6 = arith.constant 0 : index
    %c0_7 = arith.constant 0 : index
    %c0_8 = arith.constant 0 : index
    %11 = vector.load %arg4[%c0_6, %c0_7, %c0_8] : memref<1x128x128xbf16, #tpu.memory_space<vmem>>, vector<1x128x128xbf16>
    %12 = vector.shape_cast %11 : vector<1x128x128xbf16> to vector<128x128xbf16>
    %c0_9 = arith.constant 0 : index
    %c0_10 = arith.constant 0 : index
    %c0_11 = arith.constant 0 : index
    %13 = vector.load %arg5[%c0_9, %c0_10, %c0_11] : memref<1x128x128xbf16, #tpu.memory_space<vmem>>, vector<1x128x128xbf16>
    %14 = vector.shape_cast %13 : vector<1x128x128xbf16> to vector<128x128xbf16>
    %cst = arith.constant dense<0.000000e+00> : vector<128x128xf32>
    %15 = tpu.matmul %12, %14, %cst {dimension_numbers = #tpu.dot_dimension_numbers<[1], [0], [0], [1], [0, 0, 1, 1], [], []>} : vector<128x128xbf16>, vector<128x128xbf16>, vector<128x128xf32> -> vector<128x128xf32>
    %16 = arith.addf %10, %15 : vector<128x128xf32>
    %c0_12 = arith.constant 0 : index
    %c0_13 = arith.constant 0 : index
    %17 = vector.load %arg10[%c0_12, %c0_13] : memref<128x128xf32, #tpu.memory_space<vmem>>, vector<128x128xf32>
    tpu.vector_store %arg10[%c0_12, %c0_13], %16 {strides = array<i32>} : memref<128x128xf32, #tpu.memory_space<vmem>>, vector<128x128xf32>,
    %c0_i32_14 = arith.constant 0 : i32
    %18 = arith.cmpi eq, %arg3, %c0_i32_14 : i32
    %19 = arith.extui %18 : i1 to i32
    %c0_i32_15 = arith.constant 0 : i32
    %20 = arith.cmpi ne, %19, %c0_i32_15 : i32
    scf.if %20 {
      %c0_16 = arith.constant 0 : index
      %c0_17 = arith.constant 0 : index
      %21 = vector.load %arg10[%c0_16, %c0_17] : memref<128x128xf32, #tpu.memory_space<vmem>>, vector<128x128xf32>
      %c0_18 = arith.constant 0 : index
      %c0_19 = arith.constant 0 : index
      %22 = vector.load %arg6[%c0_18, %c0_19] : memref<1x128xf32, #tpu.memory_space<vmem>>, vector<1x128xf32>
      %23 = vector.broadcast %22 : vector<1x128xf32> to vector<128x128xf32>
      %24 = arith.addf %21, %23 : vector<128x128xf32>
      %25 = tpu.iota {dimensions = array<i32: 0>} : vector<128x128xi32>
      %c128_i32 = arith.constant 128 : i32
      %26 = arith.muli %arg2, %c128_i32 : i32
      %27 = vector.broadcast %26 : i32 to vector<128x128xi32>
      %28 = arith.addi %25, %27 : vector<128x128xi32>
      %c128_i32_20 = arith.constant 128 : i32
      %29 = vector.broadcast %c128_i32_20 : i32 to vector<128x128xi32>
      %30 = arith.cmpi slt, %28, %29 : vector<128x128xi32>
      %cst_21 = arith.constant 0.000000e+00 : f32
      %31 = vector.broadcast %cst_21 : f32 to vector<128x128xf32>
      %32 = arith.select %30, %24, %31 : vector<128x128xi1>, vector<128x128xf32>
      %c0_22 = arith.constant 0 : index
      %c0_23 = arith.constant 0 : index
      %33 = vector.load %arg8[%c0_22, %c0_23] : memref<1x128xf32, #tpu.memory_space<vmem>>, vector<1x128xf32>
      %cst_24 = arith.constant dense<0.000000e+00> : vector<128xf32>
      %34 = vector.multi_reduction <add>, %32, %cst_24 [0] : vector<128x128xf32> to vector<128xf32>
      %35 = vector.shape_cast %34 : vector<128xf32> to vector<1x128xf32>
      %36 = arith.addf %33, %35 : vector<1x128xf32>
      %c0_25 = arith.constant 0 : index
      %c0_26 = arith.constant 0 : index
      %37 = vector.load %arg8[%c0_25, %c0_26] : memref<1x128xf32, #tpu.memory_space<vmem>>, vector<1x128xf32>
      tpu.vector_store %arg8[%c0_25, %c0_26], %36 {strides = array<i32>} : memref<1x128xf32, #tpu.memory_space<vmem>>, vector<1x128xf32>,
      %c0_27 = arith.constant 0 : index
      %c0_28 = arith.constant 0 : index
      %38 = vector.load %arg9[%c0_27, %c0_28] : memref<1x128xf32, #tpu.memory_space<vmem>>, vector<1x128xf32>
      %39 = arith.mulf %32, %32 : vector<128x128xf32>
      %cst_29 = arith.constant dense<0.000000e+00> : vector<128xf32>
      %40 = vector.multi_reduction <add>, %39, %cst_29 [0] : vector<128x128xf32> to vector<128xf32>
      %41 = vector.shape_cast %40 : vector<128xf32> to vector<1x128xf32>
      %42 = arith.addf %38, %41 : vector<1x128xf32>
      %c0_30 = arith.constant 0 : index
      %c0_31 = arith.constant 0 : index
      %43 = vector.load %arg9[%c0_30, %c0_31] : memref<1x128xf32, #tpu.memory_space<vmem>>, vector<1x128xf32>
      tpu.vector_store %arg9[%c0_30, %c0_31], %42 {strides = array<i32>} : memref<1x128xf32, #tpu.memory_space<vmem>>, vector<1x128xf32>,
      %44 = arith.truncf %24 : vector<128x128xf32> to vector<128x128xbf16>
      %c0_32 = arith.constant 0 : index
      %c0_33 = arith.constant 0 : index
      %c0_34 = arith.constant 0 : index
      %45 = vector.load %arg7[%c0_32, %c0_33, %c0_34] : memref<1x128x128xbf16, #tpu.memory_space<vmem>>, vector<1x128x128xbf16>
      %46 = vector.shape_cast %45 : vector<1x128x128xbf16> to vector<128x128xbf16>
      %47 = vector.shape_cast %44 : vector<128x128xbf16> to vector<1x128x128xbf16>
      tpu.vector_store %arg7[%c0_32, %c0_33, %c0_34], %47 {strides = array<i32>} : memref<1x128x128xbf16, #tpu.memory_space<vmem>>, vector<1x128x128xbf16>,
    } else {
    }
    return
  }
  func.func @transform_0(%arg0: i32, %arg1: i32, %arg2: i32, %arg3: i32) -> (i32, i32, i32) {
    %c0_i32 = arith.constant 0 : i32
    return %arg1, %arg2, %arg3 : i32, i32, i32
  }
  func.func @transform_1(%arg0: i32, %arg1: i32, %arg2: i32, %arg3: i32) -> (i32, i32, i32) {
    %c0_i32 = arith.constant 0 : i32
    return %arg1, %arg3, %arg0 : i32, i32, i32
  }
  func.func @transform_2(%arg0: i32, %arg1: i32, %arg2: i32, %arg3: i32) -> (i32, i32) {
    %c0_i32 = arith.constant 0 : i32
    %c0_i32_0 = arith.constant 0 : i32
    return %c0_i32, %arg0 : i32, i32
  }
  func.func @transform_3(%arg0: i32, %arg1: i32, %arg2: i32, %arg3: i32) -> (i32, i32, i32) {
    %c0_i32 = arith.constant 0 : i32
    return %arg1, %arg2, %arg0 : i32, i32, i32
  }
  func.func @transform_4(%arg0: i32, %arg1: i32, %arg2: i32, %arg3: i32) -> (i32, i32) {
    %c0_i32 = arith.constant 0 : i32
    %c0_i32_0 = arith.constant 0 : i32
    return %c0_i32, %arg0 : i32, i32
  }
  func.func @transform_5(%arg0: i32, %arg1: i32, %arg2: i32, %arg3: i32) -> (i32, i32) {
    %c0_i32 = arith.constant 0 : i32
    %c0_i32_0 = arith.constant 0 : i32
    return %c0_i32, %arg0 : i32, i32
  }
}

module attributes {stable_mosaic.version = 11 : i64} {
  func.func @_affine_kernel(%arg0: i32, %arg1: memref<128x128xbf16, #tpu.memory_space<vmem>>, %arg2: memref<1x128xf32, #tpu.memory_space<vmem>>, %arg3: memref<1x128xf32, #tpu.memory_space<vmem>>, %arg4: memref<128x128xbf16, #tpu.memory_space<vmem>>) attributes {dimension_semantics = [#tpu.dimension_semantics<parallel>], iteration_bounds = array<i64: 4>, scalar_prefetch = 0 : i64, scratch_operands = 0 : i64, tpu.core_type = #tpu.core_type<tc>, window_params = [{transform_indices = @transform_0, window_bounds = array<i64: 128, 128>}, {pipeline_mode = #tpu.pipeline_mode<synchronous>, transform_indices = @transform_1, window_bounds = array<i64: 1, 128>}, {pipeline_mode = #tpu.pipeline_mode<synchronous>, transform_indices = @transform_2, window_bounds = array<i64: 1, 128>}, {transform_indices = @transform_3, window_bounds = array<i64: 128, 128>}]} {
    %c0 = arith.constant 0 : index
    %c0_0 = arith.constant 0 : index
    %0 = vector.load %arg1[%c0, %c0_0] : memref<128x128xbf16, #tpu.memory_space<vmem>>, vector<128x128xbf16>
    %1 = arith.extf %0 : vector<128x128xbf16> to vector<128x128xf32>
    %c0_1 = arith.constant 0 : index
    %c0_2 = arith.constant 0 : index
    %2 = vector.load %arg2[%c0_1, %c0_2] : memref<1x128xf32, #tpu.memory_space<vmem>>, vector<1x128xf32>
    %3 = vector.broadcast %2 : vector<1x128xf32> to vector<128x128xf32>
    %4 = arith.mulf %1, %3 : vector<128x128xf32>
    %c0_3 = arith.constant 0 : index
    %c0_4 = arith.constant 0 : index
    %5 = vector.load %arg3[%c0_3, %c0_4] : memref<1x128xf32, #tpu.memory_space<vmem>>, vector<1x128xf32>
    %6 = vector.broadcast %5 : vector<1x128xf32> to vector<128x128xf32>
    %7 = arith.addf %4, %6 : vector<128x128xf32>
    %8 = arith.truncf %7 : vector<128x128xf32> to vector<128x128xbf16>
    %c0_5 = arith.constant 0 : index
    %c0_6 = arith.constant 0 : index
    %9 = vector.load %arg4[%c0_5, %c0_6] : memref<128x128xbf16, #tpu.memory_space<vmem>>, vector<128x128xbf16>
    tpu.vector_store %arg4[%c0_5, %c0_6], %8 {strides = array<i32>} : memref<128x128xbf16, #tpu.memory_space<vmem>>, vector<128x128xbf16>,
    return
  }
  func.func @transform_0(%arg0: i32) -> (i32, i32) {
    %c0_i32 = arith.constant 0 : i32
    %c0_i32_0 = arith.constant 0 : i32
    return %arg0, %c0_i32 : i32, i32
  }
  func.func @transform_1(%arg0: i32) -> (i32, i32) {
    %c0_i32 = arith.constant 0 : i32
    %c0_i32_0 = arith.constant 0 : i32
    %c0_i32_1 = arith.constant 0 : i32
    return %c0_i32, %c0_i32_0 : i32, i32
  }
  func.func @transform_2(%arg0: i32) -> (i32, i32) {
    %c0_i32 = arith.constant 0 : i32
    %c0_i32_0 = arith.constant 0 : i32
    %c0_i32_1 = arith.constant 0 : i32
    return %c0_i32, %c0_i32_0 : i32, i32
  }
  func.func @transform_3(%arg0: i32) -> (i32, i32) {
    %c0_i32 = arith.constant 0 : i32
    %c0_i32_0 = arith.constant 0 : i32
    return %arg0, %c0_i32 : i32, i32
  }
}

module attributes {stable_mosaic.version = 11 : i64} {
  func.func @_mm_kernel(%arg0: i32, %arg1: i32, %arg2: i32, %arg3: i32, %arg4: memref<1x512x128xbf16, #tpu.memory_space<vmem>>, %arg5: memref<1x128x128xbf16, #tpu.memory_space<vmem>>, %arg6: memref<1x128xf32, #tpu.memory_space<vmem>>, %arg7: memref<1x512x128xf32, #tpu.memory_space<vmem>>, %arg8: memref<512x128xf32, #tpu.memory_space<vmem>>) attributes {dimension_semantics = [#tpu.dimension_semantics<parallel>, #tpu.dimension_semantics<parallel>, #tpu.dimension_semantics<parallel>, #tpu.dimension_semantics<arbitrary>], iteration_bounds = array<i64: 1, 4, 1, 1>, scalar_prefetch = 0 : i64, scratch_operands = 1 : i64, tpu.core_type = #tpu.core_type<tc>, window_params = [{transform_indices = @transform_0, window_bounds = array<i64: 1, 512, 128>}, {transform_indices = @transform_1, window_bounds = array<i64: 1, 128, 128>}, {transform_indices = @transform_2, window_bounds = array<i64: 1, 128>}, {transform_indices = @transform_3, window_bounds = array<i64: 1, 512, 128>}]} {
    %c0_i32 = arith.constant 0 : i32
    %0 = arith.cmpi eq, %arg3, %c0_i32 : i32
    %1 = arith.extui %0 : i1 to i32
    %c0_i32_0 = arith.constant 0 : i32
    %2 = arith.cmpi ne, %1, %c0_i32_0 : i32
    scf.if %2 {
      %cst_12 = arith.constant 0.000000e+00 : f32
      %14 = vector.broadcast %cst_12 : f32 to vector<512x128xf32>
      %c0_13 = arith.constant 0 : index
      %c0_14 = arith.constant 0 : index
      %15 = vector.load %arg8[%c0_13, %c0_14] : memref<512x128xf32, #tpu.memory_space<vmem>>, vector<512x128xf32>
      tpu.vector_store %arg8[%c0_13, %c0_14], %14 {strides = array<i32>} : memref<512x128xf32, #tpu.memory_space<vmem>>, vector<512x128xf32>,
    } else {
    }
    %c0 = arith.constant 0 : index
    %c0_1 = arith.constant 0 : index
    %3 = vector.load %arg8[%c0, %c0_1] : memref<512x128xf32, #tpu.memory_space<vmem>>, vector<512x128xf32>
    %c0_2 = arith.constant 0 : index
    %c0_3 = arith.constant 0 : index
    %c0_4 = arith.constant 0 : index
    %4 = vector.load %arg4[%c0_2, %c0_3, %c0_4] : memref<1x512x128xbf16, #tpu.memory_space<vmem>>, vector<1x512x128xbf16>
    %5 = vector.shape_cast %4 : vector<1x512x128xbf16> to vector<512x128xbf16>
    %c0_5 = arith.constant 0 : index
    %c0_6 = arith.constant 0 : index
    %c0_7 = arith.constant 0 : index
    %6 = vector.load %arg5[%c0_5, %c0_6, %c0_7] : memref<1x128x128xbf16, #tpu.memory_space<vmem>>, vector<1x128x128xbf16>
    %7 = vector.shape_cast %6 : vector<1x128x128xbf16> to vector<128x128xbf16>
    %cst = arith.constant dense<0.000000e+00> : vector<512x128xf32>
    %8 = tpu.matmul %5, %7, %cst {dimension_numbers = #tpu.dot_dimension_numbers<[1], [0], [0], [1], [0, 0, 1, 1], [], []>} : vector<512x128xbf16>, vector<128x128xbf16>, vector<512x128xf32> -> vector<512x128xf32>
    %9 = arith.addf %3, %8 : vector<512x128xf32>
    %c0_8 = arith.constant 0 : index
    %c0_9 = arith.constant 0 : index
    %10 = vector.load %arg8[%c0_8, %c0_9] : memref<512x128xf32, #tpu.memory_space<vmem>>, vector<512x128xf32>
    tpu.vector_store %arg8[%c0_8, %c0_9], %9 {strides = array<i32>} : memref<512x128xf32, #tpu.memory_space<vmem>>, vector<512x128xf32>,
    %c0_i32_10 = arith.constant 0 : i32
    %11 = arith.cmpi eq, %arg3, %c0_i32_10 : i32
    %12 = arith.extui %11 : i1 to i32
    %c0_i32_11 = arith.constant 0 : i32
    %13 = arith.cmpi ne, %12, %c0_i32_11 : i32
    scf.if %13 {
      %c0_12 = arith.constant 0 : index
      %c0_13 = arith.constant 0 : index
      %14 = vector.load %arg8[%c0_12, %c0_13] : memref<512x128xf32, #tpu.memory_space<vmem>>, vector<512x128xf32>
      %c0_14 = arith.constant 0 : index
      %c0_15 = arith.constant 0 : index
      %15 = vector.load %arg6[%c0_14, %c0_15] : memref<1x128xf32, #tpu.memory_space<vmem>>, vector<1x128xf32>
      %16 = vector.broadcast %15 : vector<1x128xf32> to vector<512x128xf32>
      %17 = arith.addf %14, %16 : vector<512x128xf32>
      %18 = math.tanh %17 : vector<512x128xf32>
      %c0_16 = arith.constant 0 : index
      %c0_17 = arith.constant 0 : index
      %c0_18 = arith.constant 0 : index
      %19 = vector.load %arg7[%c0_16, %c0_17, %c0_18] : memref<1x512x128xf32, #tpu.memory_space<vmem>>, vector<1x512x128xf32>
      %20 = vector.shape_cast %19 : vector<1x512x128xf32> to vector<512x128xf32>
      %21 = vector.shape_cast %18 : vector<512x128xf32> to vector<1x512x128xf32>
      tpu.vector_store %arg7[%c0_16, %c0_17, %c0_18], %21 {strides = array<i32>} : memref<1x512x128xf32, #tpu.memory_space<vmem>>, vector<1x512x128xf32>,
    } else {
    }
    return
  }
  func.func @transform_0(%arg0: i32, %arg1: i32, %arg2: i32, %arg3: i32) -> (i32, i32, i32) {
    %c0_i32 = arith.constant 0 : i32
    return %arg1, %arg2, %arg3 : i32, i32, i32
  }
  func.func @transform_1(%arg0: i32, %arg1: i32, %arg2: i32, %arg3: i32) -> (i32, i32, i32) {
    %c0_i32 = arith.constant 0 : i32
    return %arg1, %arg3, %arg0 : i32, i32, i32
  }
  func.func @transform_2(%arg0: i32, %arg1: i32, %arg2: i32, %arg3: i32) -> (i32, i32) {
    %c0_i32 = arith.constant 0 : i32
    %c0_i32_0 = arith.constant 0 : i32
    return %c0_i32, %arg0 : i32, i32
  }
  func.func @transform_3(%arg0: i32, %arg1: i32, %arg2: i32, %arg3: i32) -> (i32, i32, i32) {
    %c0_i32 = arith.constant 0 : i32
    return %arg1, %arg2, %arg0 : i32, i32, i32
  }
}

</mosaic_0001>

<bundles_post_ra>
// kernel: _lambda_.17
= control target key start
LH: loop header
LB: loop body
LE: loop exit
PB: predicated region body
PF: predicated region fallthrough
CT: control target
= control target key end

     0   :  { %s2187_s1 = inlined_call_operand.vmem [shape: bf16[1,128,128], index: 1, kind: input, shape index: {}]   ;;  %s2188_s0 = inlined_call_operand.vmem [shape: bf16[1,512,128], index: 0, kind: input, shape index: {}]   ;;  %s2189_s2 = inlined_call_operand.vmem [shape: f32[1,128], index: 2, kind: input, shape index: {}]   ;;  %s2190_s3 = inlined_call_operand.vmem [shape: bf16[1,512,128], index: 3, kind: output, shape index: {}]  }
   0x1   :  { %v1842_v0 = vld [vmem:[%s2187_s1] sm:$0xff]   ;;  %v1843_v1 = vld [vmem:[%s2187_s1 + $0x8] sm:$0xff]   ;;  %v1844_v2 = vld [vmem:[%s2187_s1 + $0x10] sm:$0xff]  }
   0x2   :  { %1746 = vmatprep.subr.bf16.mxu0 %v1842_v0  ;;  %1826 = vmatprep.subr.bf16.mxu1 %v1842_v0  ;;  %v1845_v3 = vld [vmem:[%s2187_s1 + $0x18] sm:$0xff]   ;;  %v1850_v4 = vld [vmem:[%s2188_s0] sm:$0xff]   ;;  %v1847_v7 = vld [vmem:[%s2187_s1 + $0x28] sm:$0xff]  }
   0x3   :  { %1747 = vmatpush3.bf16.msra.mxu0 %v1842_v0  ;;  %1834 = vmatpush3.bf16.msra.mxu1 %v1842_v0  ;;  %v1851_v5 = vld [vmem:[%s2188_s0 + $0x80] sm:$0xff]   ;;  %v1848_v8 = vld [vmem:[%s2187_s1 + $0x30] sm:$0xff]   ;;  %v1849_v9 = vld [vmem:[%s2187_s1 + $0x38] sm:$0xff]  }
   0x4   :  { %1748 = vmatprep.subr.bf16.mxu0 %v1843_v1  ;;  %1827 = vmatprep.subr.bf16.mxu1 %v1843_v1  ;;  %v1846_v6 = vld [vmem:[%s2187_s1 + $0x20] sm:$0xff]   ;;  %v1852_v10 = vld [vmem:[%s2188_s0 + $0x8] sm:$0xff]   ;;  %v1854_v12 = vld [vmem:[%s2188_s0 + $0x10] sm:$0xff]  }
   0x5   :  { %1762 = vmatprep.mubr.bf16.mxu0 %v1850_v4  ;;  %1794 = vmatprep.mubr.bf16.mxu1 %v1851_v5  ;;  %v1853_v11 = vld [vmem:[%s2188_s0 + $0x88] sm:$0xff]   ;;  %v1855_v13 = vld [vmem:[%s2188_s0 + $0x90] sm:$0xff]   ;;  %v1856_v14 = vld [vmem:[%s2188_s0 + $0x18] sm:$0xff]  }
   0x6   :  { %v1857_v15 = vld [vmem:[%s2188_s0 + $0x98] sm:$0xff]   ;;  %v1858_v16 = vld [vmem:[%s2188_s0 + $0x20] sm:$0xff]   ;;  %v1860_v18 = vld [vmem:[%s2188_s0 + $0x28] sm:$0xff]  }
   0x7   :  { %1749 = vmatpush3.bf16.msra.mxu0 %v1843_v1  ;;  %1835 = vmatpush3.bf16.msra.mxu1 %v1843_v1  ;;  %v1859_v17 = vld [vmem:[%s2188_s0 + $0xa0] sm:$0xff]   ;;  %v1861_v19 = vld [vmem:[%s2188_s0 + $0xa8] sm:$0xff]   ;;  %v1862_v20 = vld [vmem:[%s2188_s0 + $0x30] sm:$0xff]  }
   0x8   :  { %1750 = vmatprep.subr.bf16.mxu0 %v1844_v2  ;;  %1828 = vmatprep.subr.bf16.mxu1 %v1844_v2  ;;  %v1863_v21 = vld [vmem:[%s2188_s0 + $0xb0] sm:$0xff]   ;;  %v1864_v22 = vld [vmem:[%s2188_s0 + $0x38] sm:$0xff]   ;;  %v1866_v24 = vld [vmem:[%s2188_s0 + $0x40] sm:$0xff]  }
   0x9   :  { %v1865_v23 = vld [vmem:[%s2188_s0 + $0xb8] sm:$0xff]   ;;  %v1867_v25 = vld [vmem:[%s2188_s0 + $0xc0] sm:$0xff]   ;;  %v1868_v26 = vld [vmem:[%s2188_s0 + $0x48] sm:$0xff]  }
   0xa   :  { %v1869_v27 = vld [vmem:[%s2188_s0 + $0xc8] sm:$0xff]   ;;  %v1870_v28 = vld [vmem:[%s2188_s0 + $0x50] sm:$0xff]   ;;  %v1872_v30 = vld [vmem:[%s2188_s0 + $0x58] sm:$0xff]  }
   0xb   :  { %1751 = vmatpush3.bf16.msra.mxu0 %v1844_v2  ;;  %1836 = vmatpush3.bf16.msra.mxu1 %v1844_v2  ;;  %v1871_v29 = vld [vmem:[%s2188_s0 + $0xd0] sm:$0xff]   ;;  %v1873_v31 = vld [vmem:[%s2188_s0 + $0xd8] sm:$0xff]   ;;  %v1874_v32 = vld [vmem:[%s2188_s0 + $0x60] sm:$0xff]  }
   0xc   :  { %1752 = vmatprep.subr.bf16.mxu0 %v1845_v3  ;;  %1829 = vmatprep.subr.bf16.mxu1 %v1845_v3  ;;  %v1875_v33 = vld [vmem:[%s2188_s0 + $0xe0] sm:$0xff]   ;;  %v1876_v34 = vld [vmem:[%s2188_s0 + $0x68] sm:$0xff]   ;;  %v1878_v36 = vld [vmem:[%s2188_s0 + $0x70] sm:$0xff]  }
   0xd   :  { %v1877_v35 = vld [vmem:[%s2188_s0 + $0xe8] sm:$0xff]   ;;  %v1879_v37 = vld [vmem:[%s2188_s0 + $0xf0] sm:$0xff]   ;;  %v1880_v38 = vld [vmem:[%s2188_s0 + $0x78] sm:$0xff]  }
   0xe   :  { %v1881_v39 = vld [vmem:[%s2188_s0 + $0xf8] sm:$0xff]   ;;  %v2025_v41 = vld [vmem:[%s2189_s2] ss:$0 sm:$0xff] }
   0xf   :  { %1753 = vmatpush3.bf16.msra.mxu0 %v1845_v3  ;;  %1837 = vmatpush3.bf16.msra.mxu1 %v1845_v3 }
  0x10   :  { %1754 = vmatprep.subr.bf16.mxu0 %v1846_v6  ;;  %1830 = vmatprep.subr.bf16.mxu1 %v1846_v6 }
  0x13   :  { %1755 = vmatpush3.bf16.msra.mxu0 %v1846_v6  ;;  %1838 = vmatpush3.bf16.msra.mxu1 %v1846_v6 }
  0x14   :  { %1756 = vmatprep.subr.bf16.mxu0 %v1847_v7  ;;  %1831 = vmatprep.subr.bf16.mxu1 %v1847_v7 }
  0x17   :  { %1757 = vmatpush3.bf16.msra.mxu0 %v1847_v7  ;;  %1839 = vmatpush3.bf16.msra.mxu1 %v1847_v7 }
  0x18   :  { %1758 = vmatprep.subr.bf16.mxu0 %v1848_v8  ;;  %1832 = vmatprep.subr.bf16.mxu1 %v1848_v8 }
  0x1b   :  { %1759 = vmatpush3.bf16.msra.mxu0 %v1848_v8  ;;  %1840 = vmatpush3.bf16.msra.mxu1 %v1848_v8 }
  0x1c   :  { %1760 = vmatprep.subr.bf16.mxu0 %v1849_v9  ;;  %1833 = vmatprep.subr.bf16.mxu1 %v1849_v9 }
  0x1f   :  { %1761 = vmatpush3.bf16.msra.mxu0 %v1849_v9  ;;  %1841 = vmatpush3.bf16.msra.mxu1 %v1849_v9 }
  0x22   :  { %1763 = vmatmul.mubr.bf16.vlgmr.msra.gmra.mrb[0].mxu0 %v1852_v10  ;;  %1795 = vmatmul.mubr.bf16.vlgmr.msra.gmra.mrb[0].mxu1 %v1853_v11 }
  0x23   :  { %1766 = vmatprep.mubr.bf16.mxu0 %v1854_v12  ;;  %1798 = vmatprep.mubr.bf16.mxu1 %v1855_v13 }
  0x2a   :  { %1767 = vmatmul.mubr.bf16.gmra.mrb[4].mxu0 %v1856_v14  ;;  %1799 = vmatmul.mubr.bf16.gmra.mrb[4].mxu1 %v1857_v15 }
  0x2b   :  { %1770 = vmatprep.mubr.bf16.mxu0 %v1858_v16  ;;  %1802 = vmatprep.mubr.bf16.mxu1 %v1859_v17 }
  0x32   :  { %1771 = vmatmul.mubr.bf16.gmra.mrb[8].mxu0 %v1860_v18  ;;  %1803 = vmatmul.mubr.bf16.gmra.mrb[8].mxu1 %v1861_v19 }
  0x33   :  { %1774 = vmatprep.mubr.bf16.mxu0 %v1862_v20  ;;  %1806 = vmatprep.mubr.bf16.mxu1 %v1863_v21 }
  0x3a   :  { %1775 = vmatmul.mubr.bf16.gmra.mrb[12].mxu0 %v1864_v22  ;;  %1807 = vmatmul.mubr.bf16.gmra.mrb[12].mxu1 %v1865_v23 }
  0x3b   :  { %1778 = vmatprep.mubr.bf16.mxu0 %v1866_v24  ;;  %1810 = vmatprep.mubr.bf16.mxu1 %v1867_v25 }
  0x42   :  { %1779 = vmatmul.mubr.bf16.gmra.mrb[16].mxu0 %v1868_v26  ;;  %1811 = vmatmul.mubr.bf16.gmra.mrb[16].mxu1 %v1869_v27 }
  0x43   :  { %1782 = vmatprep.mubr.bf16.mxu0 %v1870_v28  ;;  %1814 = vmatprep.mubr.bf16.mxu1 %v1871_v29 }
  0x4a   :  { %1783 = vmatmul.mubr.bf16.gmra.mrb[20].mxu0 %v1872_v30  ;;  %1815 = vmatmul.mubr.bf16.gmra.mrb[20].mxu1 %v1873_v31 }
  0x4b   :  { %1786 = vmatprep.mubr.bf16.mxu0 %v1874_v32  ;;  %1818 = vmatprep.mubr.bf16.mxu1 %v1875_v33 }
  0x52   :  { %1787 = vmatmul.mubr.bf16.gmra.mrb[24].mxu0 %v1876_v34  ;;  %1819 = vmatmul.mubr.bf16.gmra.mrb[24].mxu1 %v1877_v35 }
  0x53   :  { %1790 = vmatprep.mubr.bf16.mxu0 %v1878_v36  ;;  %1822 = vmatprep.mubr.bf16.mxu1 %v1879_v37 }
  0x5a   :  { %1791 = vmatmul.mubr.bf16.gmra.mrb[28].mxu0 %v1880_v38  ;;  %1823 = vmatmul.mubr.bf16.gmra.mrb[28].mxu1 %v1881_v39 }
  0xf5   :  { %v1764_v40 = vpop.f32.mrb[0].mxu0  ;;  %v1796_v42 = vpop.f32.mrb[0].mxu1 }
  0xf6   :  { %v501_v43 = vpop.f32.mrb[1].mxu0  ;;  %v629_v44 = vpop.f32.mrb[1].mxu1  ;;  %v960_v47 = vadd.f32 %v1764_v40, %v2025_v41  ;;  %v992_v48 = vadd.f32 %v1796_v42, %v2025_v41 }
  0xf7   :  { %v1765_v45 = vpop.f32.mrb[2].mxu0  ;;  %v1797_v46 = vpop.f32.mrb[2].mxu1  ;;  %v958_v53 = vadd.f32 %v2025_v41, %v501_v43  ;;  %v990_v54 = vadd.f32 %v2025_v41, %v629_v44 }
  0xf8   :  { %v961_v49 = vadd.f32 %v1765_v45, %v2025_v41  ;;  %v993_v50 = vadd.f32 %v1797_v46, %v2025_v41  ;;  %v504_v51 = vpop.f32.mrb[3].mxu0  ;;  %v632_v52 = vpop.f32.mrb[3].mxu1 }
  0xf9   :  { %v959_v55 = vadd.f32 %v2025_v41, %v504_v51  ;;  %v991_v56 = vadd.f32 %v2025_v41, %v632_v52 }
  0xfa   :  { %v1523_v57 = vpack.c.bf16 %v961_v49, %v960_v47  ;;  %v1603_v58 = vpack.c.bf16 %v993_v50, %v992_v48 }
  0xfb   :  { %v1518_v59 = vpack.c.bf16 %v959_v55, %v958_v53  ;;  %v1598_v60 = vpack.c.bf16 %v991_v56, %v990_v54 }
  0xfc   :  { %1675 = vst [vmem:[%s2190_s3 + $0x8] sm:$0xff] %v1523_v57   ;;  %1691 = vst [vmem:[%s2190_s3 + $0x88] sm:$0xff] %v1603_v58  }
  0xfd   :  { %1519 = vst [vmem:[%s2190_s3] sm:$0xff] %v1518_v59   ;;  %1690 = vst [vmem:[%s2190_s3 + $0x80] sm:$0xff] %v1598_v60   ;;  %v1768_v61 = vpop.f32.mrb[4].mxu0  ;;  %v1800_v62 = vpop.f32.mrb[4].mxu1 }
  0xfe   :  { %v517_v63 = vpop.f32.mrb[5].mxu0  ;;  %v645_v0 = vpop.f32.mrb[5].mxu1  ;;  %v964_v3 = vadd.f32 %v1768_v61, %v2025_v41  ;;  %v996_v4 = vadd.f32 %v1800_v62, %v2025_v41 }
  0xff   :  { %v1769_v1 = vpop.f32.mrb[6].mxu0  ;;  %v1801_v2 = vpop.f32.mrb[6].mxu1  ;;  %v962_v9 = vadd.f32 %v2025_v41, %v517_v63  ;;  %v994_v10 = vadd.f32 %v2025_v41, %v645_v0 }
 0x100   :  { %v965_v5 = vadd.f32 %v1769_v1, %v2025_v41  ;;  %v997_v6 = vadd.f32 %v1801_v2, %v2025_v41  ;;  %v520_v7 = vpop.f32.mrb[7].mxu0  ;;  %v648_v8 = vpop.f32.mrb[7].mxu1 }
 0x101   :  { %v963_v11 = vadd.f32 %v2025_v41, %v520_v7  ;;  %v995_v12 = vadd.f32 %v2025_v41, %v648_v8 }
 0x102   :  { %v1533_v13 = vpack.c.bf16 %v965_v5, %v964_v3  ;;  %v1613_v14 = vpack.c.bf16 %v997_v6, %v996_v4 }
 0x103   :  { %v1528_v15 = vpack.c.bf16 %v963_v11, %v962_v9  ;;  %v1608_v16 = vpack.c.bf16 %v995_v12, %v994_v10 }
 0x104   :  { %1677 = vst [vmem:[%s2190_s3 + $0x18] sm:$0xff] %v1533_v13   ;;  %1693 = vst [vmem:[%s2190_s3 + $0x98] sm:$0xff] %v1613_v14  }
 0x105   :  { %1676 = vst [vmem:[%s2190_s3 + $0x10] sm:$0xff] %v1528_v15   ;;  %1692 = vst [vmem:[%s2190_s3 + $0x90] sm:$0xff] %v1608_v16   ;;  %v1772_v17 = vpop.f32.mrb[8].mxu0  ;;  %v1804_v18 = vpop.f32.mrb[8].mxu1 }
 0x106   :  { %v533_v19 = vpop.f32.mrb[9].mxu0  ;;  %v661_v20 = vpop.f32.mrb[9].mxu1  ;;  %v968_v23 = vadd.f32 %v1772_v17, %v2025_v41  ;;  %v1000_v24 = vadd.f32 %v1804_v18, %v2025_v41 }
 0x107   :  { %v1773_v21 = vpop.f32.mrb[10].mxu0  ;;  %v1805_v22 = vpop.f32.mrb[10].mxu1  ;;  %v966_v29 = vadd.f32 %v2025_v41, %v533_v19  ;;  %v998_v30 = vadd.f32 %v2025_v41, %v661_v20 }
 0x108   :  { %v969_v25 = vadd.f32 %v1773_v21, %v2025_v41  ;;  %v1001_v26 = vadd.f32 %v1805_v22, %v2025_v41  ;;  %v536_v27 = vpop.f32.mrb[11].mxu0  ;;  %v664_v28 = vpop.f32.mrb[11].mxu1 }
 0x109   :  { %v967_v31 = vadd.f32 %v2025_v41, %v536_v27  ;;  %v999_v32 = vadd.f32 %v2025_v41, %v664_v28 }
 0x10a   :  { %v1543_v33 = vpack.c.bf16 %v969_v25, %v968_v23  ;;  %v1623_v34 = vpack.c.bf16 %v1001_v26, %v1000_v24 }
 0x10b   :  { %v1538_v35 = vpack.c.bf16 %v967_v31, %v966_v29  ;;  %v1618_v36 = vpack.c.bf16 %v999_v32, %v998_v30 }
 0x10c   :  { %1679 = vst [vmem:[%s2190_s3 + $0x28] sm:$0xff] %v1543_v33   ;;  %1695 = vst [vmem:[%s2190_s3 + $0xa8] sm:$0xff] %v1623_v34  }
 0x10d   :  { %1678 = vst [vmem:[%s2190_s3 + $0x20] sm:$0xff] %v1538_v35   ;;  %1694 = vst [vmem:[%s2190_s3 + $0xa0] sm:$0xff] %v1618_v36   ;;  %v1776_v37 = vpop.f32.mrb[12].mxu0  ;;  %v1808_v38 = vpop.f32.mrb[12].mxu1 }
 0x10e   :  { %v549_v39 = vpop.f32.mrb[13].mxu0  ;;  %v677_v40 = vpop.f32.mrb[13].mxu1  ;;  %v972_v44 = vadd.f32 %v1776_v37, %v2025_v41  ;;  %v1004_v45 = vadd.f32 %v1808_v38, %v2025_v41 }
 0x10f   :  { %v1777_v42 = vpop.f32.mrb[14].mxu0  ;;  %v1809_v43 = vpop.f32.mrb[14].mxu1  ;;  %v970_v50 = vadd.f32 %v2025_v41, %v549_v39  ;;  %v1002_v51 = vadd.f32 %v2025_v41, %v677_v40 }
 0x110   :  { %v973_v46 = vadd.f32 %v1777_v42, %v2025_v41  ;;  %v1005_v47 = vadd.f32 %v1809_v43, %v2025_v41  ;;  %v552_v48 = vpop.f32.mrb[15].mxu0  ;;  %v680_v49 = vpop.f32.mrb[15].mxu1 }
 0x111   :  { %v971_v52 = vadd.f32 %v2025_v41, %v552_v48  ;;  %v1003_v53 = vadd.f32 %v2025_v41, %v680_v49 }
 0x112   :  { %v1553_v54 = vpack.c.bf16 %v973_v46, %v972_v44  ;;  %v1633_v55 = vpack.c.bf16 %v1005_v47, %v1004_v45 }
 0x113   :  { %v1548_v56 = vpack.c.bf16 %v971_v52, %v970_v50  ;;  %v1628_v57 = vpack.c.bf16 %v1003_v53, %v1002_v51 }
 0x114   :  { %1681 = vst [vmem:[%s2190_s3 + $0x38] sm:$0xff] %v1553_v54   ;;  %1697 = vst [vmem:[%s2190_s3 + $0xb8] sm:$0xff] %v1633_v55  }
 0x115   :  { %1680 = vst [vmem:[%s2190_s3 + $0x30] sm:$0xff] %v1548_v56   ;;  %1696 = vst [vmem:[%s2190_s3 + $0xb0] sm:$0xff] %v1628_v57   ;;  %v1780_v58 = vpop.f32.mrb[16].mxu0  ;;  %v1812_v59 = vpop.f32.mrb[16].mxu1 }
 0x116   :  { %v565_v60 = vpop.f32.mrb[17].mxu0  ;;  %v693_v61 = vpop.f32.mrb[17].mxu1  ;;  %v976_v0 = vadd.f32 %v1780_v58, %v2025_v41  ;;  %v1008_v1 = vadd.f32 %v1812_v59, %v2025_v41 }
 0x117   :  { %v1781_v62 = vpop.f32.mrb[18].mxu0  ;;  %v1813_v63 = vpop.f32.mrb[18].mxu1  ;;  %v974_v6 = vadd.f32 %v2025_v41, %v565_v60  ;;  %v1006_v7 = vadd.f32 %v2025_v41, %v693_v61 }
 0x118   :  { %v977_v2 = vadd.f32 %v1781_v62, %v2025_v41  ;;  %v1009_v3 = vadd.f32 %v1813_v63, %v2025_v41  ;;  %v568_v4 = vpop.f32.mrb[19].mxu0  ;;  %v696_v5 = vpop.f32.mrb[19].mxu1 }
 0x119   :  { %v975_v8 = vadd.f32 %v2025_v41, %v568_v4  ;;  %v1007_v9 = vadd.f32 %v2025_v41, %v696_v5 }
 0x11a   :  { %v1563_v10 = vpack.c.bf16 %v977_v2, %v976_v0  ;;  %v1643_v11 = vpack.c.bf16 %v1009_v3, %v1008_v1 }
 0x11b   :  { %v1558_v12 = vpack.c.bf16 %v975_v8, %v974_v6  ;;  %v1638_v13 = vpack.c.bf16 %v1007_v9, %v1006_v7 }
 0x11c   :  { %1683 = vst [vmem:[%s2190_s3 + $0x48] sm:$0xff] %v1563_v10   ;;  %1699 = vst [vmem:[%s2190_s3 + $0xc8] sm:$0xff] %v1643_v11  }
 0x11d   :  { %1682 = vst [vmem:[%s2190_s3 + $0x40] sm:$0xff] %v1558_v12   ;;  %1698 = vst [vmem:[%s2190_s3 + $0xc0] sm:$0xff] %v1638_v13   ;;  %v1784_v14 = vpop.f32.mrb[20].mxu0  ;;  %v1816_v15 = vpop.f32.mrb[20].mxu1 }
 0x11e   :  { %v581_v16 = vpop.f32.mrb[21].mxu0  ;;  %v709_v17 = vpop.f32.mrb[21].mxu1  ;;  %v980_v20 = vadd.f32 %v1784_v14, %v2025_v41  ;;  %v1012_v21 = vadd.f32 %v1816_v15, %v2025_v41 }
 0x11f   :  { %v1785_v18 = vpop.f32.mrb[22].mxu0  ;;  %v1817_v19 = vpop.f32.mrb[22].mxu1  ;;  %v978_v26 = vadd.f32 %v2025_v41, %v581_v16  ;;  %v1010_v27 = vadd.f32 %v2025_v41, %v709_v17 }
 0x120   :  { %v981_v22 = vadd.f32 %v1785_v18, %v2025_v41  ;;  %v1013_v23 = vadd.f32 %v1817_v19, %v2025_v41  ;;  %v584_v24 = vpop.f32.mrb[23].mxu0  ;;  %v712_v25 = vpop.f32.mrb[23].mxu1 }
 0x121   :  { %v979_v28 = vadd.f32 %v2025_v41, %v584_v24  ;;  %v1011_v29 = vadd.f32 %v2025_v41, %v712_v25 }
 0x122   :  { %v1573_v30 = vpack.c.bf16 %v981_v22, %v980_v20  ;;  %v1653_v31 = vpack.c.bf16 %v1013_v23, %v1012_v21 }
 0x123   :  { %v1568_v32 = vpack.c.bf16 %v979_v28, %v978_v26  ;;  %v1648_v33 = vpack.c.bf16 %v1011_v29, %v1010_v27 }
 0x124   :  { %1685 = vst [vmem:[%s2190_s3 + $0x58] sm:$0xff] %v1573_v30   ;;  %1701 = vst [vmem:[%s2190_s3 + $0xd8] sm:$0xff] %v1653_v31  }
 0x125   :  { %1684 = vst [vmem:[%s2190_s3 + $0x50] sm:$0xff] %v1568_v32   ;;  %1700 = vst [vmem:[%s2190_s3 + $0xd0] sm:$0xff] %v1648_v33   ;;  %v1788_v34 = vpop.f32.mrb[24].mxu0  ;;  %v1820_v35 = vpop.f32.mrb[24].mxu1 }
 0x126   :  { %v597_v36 = vpop.f32.mrb[25].mxu0  ;;  %v725_v37 = vpop.f32.mrb[25].mxu1  ;;  %v984_v40 = vadd.f32 %v1788_v34, %v2025_v41  ;;  %v1016_v42 = vadd.f32 %v1820_v35, %v2025_v41 }
 0x127   :  { %v1789_v38 = vpop.f32.mrb[26].mxu0  ;;  %v1821_v39 = vpop.f32.mrb[26].mxu1  ;;  %v982_v47 = vadd.f32 %v2025_v41, %v597_v36  ;;  %v1014_v48 = vadd.f32 %v2025_v41, %v725_v37 }
 0x128   :  { %v985_v43 = vadd.f32 %v1789_v38, %v2025_v41  ;;  %v1017_v44 = vadd.f32 %v1821_v39, %v2025_v41  ;;  %v600_v45 = vpop.f32.mrb[27].mxu0  ;;  %v728_v46 = vpop.f32.mrb[27].mxu1 }
 0x129   :  { %v983_v49 = vadd.f32 %v2025_v41, %v600_v45  ;;  %v1015_v50 = vadd.f32 %v2025_v41, %v728_v46 }
 0x12a   :  { %v1583_v51 = vpack.c.bf16 %v985_v43, %v984_v40  ;;  %v1663_v52 = vpack.c.bf16 %v1017_v44, %v1016_v42 }
 0x12b   :  { %v1578_v53 = vpack.c.bf16 %v983_v49, %v982_v47  ;;  %v1658_v54 = vpack.c.bf16 %v1015_v50, %v1014_v48 }
 0x12c   :  { %1687 = vst [vmem:[%s2190_s3 + $0x68] sm:$0xff] %v1583_v51   ;;  %1703 = vst [vmem:[%s2190_s3 + $0xe8] sm:$0xff] %v1663_v52  }
 0x12d   :  { %1686 = vst [vmem:[%s2190_s3 + $0x60] sm:$0xff] %v1578_v53   ;;  %1702 = vst [vmem:[%s2190_s3 + $0xe0] sm:$0xff] %v1658_v54   ;;  %v1792_v55 = vpop.f32.mrb[28].mxu0  ;;  %v1824_v56 = vpop.f32.mrb[28].mxu1 }
 0x12e   :  { %v613_v57 = vpop.f32.mrb[29].mxu0  ;;  %v741_v58 = vpop.f32.mrb[29].mxu1  ;;  %v988_v61 = vadd.f32 %v1792_v55, %v2025_v41  ;;  %v1020_v62 = vadd.f32 %v1824_v56, %v2025_v41 }
 0x12f   :  { %v1793_v59 = vpop.f32.mrb[30].mxu0  ;;  %v1825_v60 = vpop.f32.mrb[30].mxu1  ;;  %v986_v3 = vadd.f32 %v2025_v41, %v613_v57  ;;  %v1018_v4 = vadd.f32 %v2025_v41, %v741_v58 }
 0x130   :  { %v989_v63 = vadd.f32 %v1793_v59, %v2025_v41  ;;  %v1021_v0 = vadd.f32 %v1825_v60, %v2025_v41  ;;  %v616_v1 = vpop.f32.mrb[31].mxu0  ;;  %v744_v2 = vpop.f32.mrb[31].mxu1 }
 0x131   :  { %v987_v5 = vadd.f32 %v2025_v41, %v616_v1  ;;  %v1019_v6 = vadd.f32 %v2025_v41, %v744_v2 }
 0x132   :  { %v1593_v7 = vpack.c.bf16 %v989_v63, %v988_v61  ;;  %v1673_v8 = vpack.c.bf16 %v1021_v0, %v1020_v62 }
 0x133   :  { %v1588_v9 = vpack.c.bf16 %v987_v5, %v986_v3  ;;  %v1668_v10 = vpack.c.bf16 %v1019_v6, %v1018_v4 }
 0x134   :  { %1689 = vst [vmem:[%s2190_s3 + $0x78] sm:$0xff] %v1593_v7   ;;  %1705 = vst [vmem:[%s2190_s3 + $0xf8] sm:$0xff] %v1673_v8  }
 0x135   :  { %1688 = vst [vmem:[%s2190_s3 + $0x70] sm:$0xff] %v1588_v9   ;;  %1704 = vst [vmem:[%s2190_s3 + $0xf0] sm:$0xff] %v1668_v10  }

// kernel: _lambda_.18
= control target key start
LH: loop header
LB: loop body
LE: loop exit
PB: predicated region body
PF: predicated region fallthrough
CT: control target
= control target key end

     0   :  { %v763_v16 = vmov 0.0   ;;  %s899_s1 = inlined_call_operand.vmem [shape: bf16[1,128,128], index: 1, kind: input, shape index: {}]   ;;  %s900_s0 = inlined_call_operand.vmem [shape: bf16[1,128,128], index: 0, kind: input, shape index: {}]   ;;  %s901_s4 = inlined_call_operand.vmem [shape: f32[1,128], index: 4, kind: output, shape index: {1}]   ;;  %s902_s5 = inlined_call_operand.vmem [shape: f32[1,128], index: 5, kind: output, shape index: {2}]   ;;  %s903_s2 = inlined_call_operand.vmem [shape: f32[1,128], index: 2, kind: input, shape index: {}]   ;;  %s904_s3 = inlined_call_operand.vmem [shape: bf16[1,128,128], index: 3, kind: output, shape index: {0}]  }
   0x1   :  { %v747_v0 = vld [vmem:[%s899_s1] sm:$0xff]   ;;  %v748_v1 = vld [vmem:[%s899_s1 + $0x8] sm:$0xff]   ;;  %v749_v2 = vld [vmem:[%s899_s1 + $0x10] sm:$0xff]   ;;  %46 = vst [vmem:[%s901_s4] sm:$0x1] %v763_v16 }
   0x2   :  { %698 = vmatprep.subr.bf16.mxu0 %v747_v0  ;;  %730 = vmatprep.subr.bf16.mxu1 %v747_v0  ;;  %v750_v3 = vld [vmem:[%s899_s1 + $0x18] sm:$0xff]   ;;  %v755_v4 = vld [vmem:[%s900_s0] sm:$0xff]   ;;  %v752_v7 = vld [vmem:[%s899_s1 + $0x28] sm:$0xff]   ;;  %47 = vst [vmem:[%s902_s5] sm:$0x1] %v763_v16 }
   0x3   :  { %699 = vmatpush3.bf16.msra.mxu0 %v747_v0  ;;  %738 = vmatpush3.bf16.msra.mxu1 %v747_v0  ;;  %v751_v5 = vld [vmem:[%s899_s1 + $0x20] sm:$0xff]   ;;  %v753_v8 = vld [vmem:[%s899_s1 + $0x30] sm:$0xff]   ;;  %v754_v9 = vld [vmem:[%s899_s1 + $0x38] sm:$0xff]  }
   0x4   :  { %700 = vmatprep.subr.bf16.mxu0 %v748_v1  ;;  %731 = vmatprep.subr.bf16.mxu1 %v748_v1  ;;  %v759_v6 = vld [vmem:[%s900_s0 + $0x20] sm:$0xff]   ;;  %v756_v10 = vld [vmem:[%s900_s0 + $0x8] sm:$0xff]   ;;  %v757_v12 = vld [vmem:[%s900_s0 + $0x10] sm:$0xff]  }
   0x5   :  { %714 = vmatprep.mubr.bf16.mxu0 %v755_v4  ;;  %722 = vmatprep.mubr.bf16.mxu1 %v759_v6  ;;  %v760_v11 = vld [vmem:[%s900_s0 + $0x28] sm:$0xff]   ;;  %v761_v13 = vld [vmem:[%s900_s0 + $0x30] sm:$0xff]   ;;  %v758_v14 = vld [vmem:[%s900_s0 + $0x18] sm:$0xff]  }
   0x6   :  { %v762_v15 = vld [vmem:[%s900_s0 + $0x38] sm:$0xff]   ;;  %v602_v17 = vld [vmem:[%s903_s2] ss:$0 sm:$0xff] }
   0x7   :  { %701 = vmatpush3.bf16.msra.mxu0 %v748_v1  ;;  %739 = vmatpush3.bf16.msra.mxu1 %v748_v1 }
   0x8   :  { %702 = vmatprep.subr.bf16.mxu0 %v749_v2  ;;  %732 = vmatprep.subr.bf16.mxu1 %v749_v2 }
   0xb   :  { %703 = vmatpush3.bf16.msra.mxu0 %v749_v2  ;;  %740 = vmatpush3.bf16.msra.mxu1 %v749_v2 }
   0xc   :  { %704 = vmatprep.subr.bf16.mxu0 %v750_v3  ;;  %733 = vmatprep.subr.bf16.mxu1 %v750_v3 }
   0xf   :  { %705 = vmatpush3.bf16.msra.mxu0 %v750_v3  ;;  %741 = vmatpush3.bf16.msra.mxu1 %v750_v3 }
  0x10   :  { %706 = vmatprep.subr.bf16.mxu0 %v751_v5  ;;  %734 = vmatprep.subr.bf16.mxu1 %v751_v5 }
  0x13   :  { %707 = vmatpush3.bf16.msra.mxu0 %v751_v5  ;;  %742 = vmatpush3.bf16.msra.mxu1 %v751_v5 }
  0x14   :  { %708 = vmatprep.subr.bf16.mxu0 %v752_v7  ;;  %735 = vmatprep.subr.bf16.mxu1 %v752_v7 }
  0x17   :  { %709 = vmatpush3.bf16.msra.mxu0 %v752_v7  ;;  %743 = vmatpush3.bf16.msra.mxu1 %v752_v7 }
  0x18   :  { %710 = vmatprep.subr.bf16.mxu0 %v753_v8  ;;  %736 = vmatprep.subr.bf16.mxu1 %v753_v8 }
  0x1b   :  { %711 = vmatpush3.bf16.msra.mxu0 %v753_v8  ;;  %744 = vmatpush3.bf16.msra.mxu1 %v753_v8 }
  0x1c   :  { %712 = vmatprep.subr.bf16.mxu0 %v754_v9  ;;  %737 = vmatprep.subr.bf16.mxu1 %v754_v9 }
  0x1f   :  { %713 = vmatpush3.bf16.msra.mxu0 %v754_v9  ;;  %745 = vmatpush3.bf16.msra.mxu1 %v754_v9 }
  0x22   :  { %715 = vmatmul.mubr.bf16.vlgmr.msra.gmra.mrb[0].mxu0 %v756_v10  ;;  %723 = vmatmul.mubr.bf16.vlgmr.msra.gmra.mrb[0].mxu1 %v760_v11 }
  0x23   :  { %718 = vmatprep.mubr.bf16.mxu0 %v757_v12  ;;  %726 = vmatprep.mubr.bf16.mxu1 %v761_v13 }
  0x2a   :  { %719 = vmatmul.mubr.bf16.gmra.mrb[4].mxu0 %v758_v14  ;;  %727 = vmatmul.mubr.bf16.gmra.mrb[4].mxu1 %v762_v15 }
  0xf5   :  { %v716_v18 = vpop.f32.mrb[0].mxu0  ;;  %v724_v19 = vpop.f32.mrb[0].mxu1 }
  0xf6   :  { %v226_v20 = vpop.f32.mrb[1].mxu0  ;;  %v851_v21 = vadd.f32 %v724_v19, %v602_v17  ;;  %v258_v22 = vpop.f32.mrb[1].mxu1  ;;  %v349_v26 = vadd.f32 %v716_v18, %v602_v17 }
  0xf7   :  { %v347_v23 = vadd.f32 %v602_v17, %v226_v20  ;;  %v717_v24 = vpop.f32.mrb[2].mxu0  ;;  %v725_v25 = vpop.f32.mrb[2].mxu1  ;;  %v355_v29 = vadd.f32 %v602_v17, %v258_v22 }
  0xf8   :  { %v350_v27 = vadd.f32 %v717_v24, %v602_v17  ;;  %v229_v28 = vpop.f32.mrb[3].mxu0  ;;  %v853_v30 = vadd.f32 %v725_v25, %v602_v17  ;;  %v261_v31 = vpop.f32.mrb[3].mxu1  ;;  %v457_v41 = vmul.f32 %v349_v26, %v349_v26  ;;  %v465_v22 = vmul.f32 %v851_v21, %v851_v21 }
  0xf9   :  { %v348_v32 = vadd.f32 %v602_v17, %v229_v28  ;;  %v356_v33 = vadd.f32 %v602_v17, %v261_v31  ;;  %v455_v36 = vmul.f32 %v347_v23, %v347_v23  ;;  %v463_v15 = vmul.f32 %v355_v29, %v355_v29 }
  0xfa   :  { %v643_v34 = vpack.c.bf16 %v350_v27, %v349_v26  ;;  %v663_v35 = vpack.c.bf16 %v853_v30, %v851_v21  ;;  %v458_v48 = vmul.f32 %v350_v27, %v350_v27  ;;  %v466_v25 = vmul.f32 %v853_v30, %v853_v30 }
  0xfb   :  { %v431_v37 = vadd.f32 %v348_v32, %v347_v23  ;;  %v456_v38 = vmul.f32 %v348_v32, %v348_v32  ;;  %v638_v39 = vpack.c.bf16 %v348_v32, %v347_v23  ;;  %v658_v40 = vpack.c.bf16 %v356_v33, %v355_v29 }
  0xfc   :  { %675 = vst [vmem:[%s904_s3 + $0x8] sm:$0xff] %v643_v34   ;;  %679 = vst [vmem:[%s904_s3 + $0x28] sm:$0xff] %v663_v35   ;;  %v464_v20 = vmul.f32 %v356_v33, %v356_v33 }
  0xfd   :  { %v432_v42 = vadd.f32 %v431_v37, %v349_v26  ;;  %v471_v43 = vadd.f32 %v456_v38, %v455_v36  ;;  %639 = vst [vmem:[%s904_s3] sm:$0xff] %v638_v39   ;;  %v720_v44 = vpop.f32.mrb[4].mxu0  ;;  %v728_v45 = vpop.f32.mrb[4].mxu1  ;;  %678 = vst [vmem:[%s904_s3 + $0x20] sm:$0xff] %v658_v40  }
  0xfe   :  { %v242_v46 = vpop.f32.mrb[5].mxu0  ;;  %v274_v47 = vpop.f32.mrb[5].mxu1  ;;  %v353_v54 = vadd.f32 %v720_v44, %v602_v17  ;;  %v361_v57 = vadd.f32 %v728_v45, %v602_v17 }
  0xff   :  { %v472_v49 = vadd.f32 %v471_v43, %v457_v41  ;;  %v351_v50 = vadd.f32 %v602_v17, %v242_v46  ;;  %v433_v51 = vadd.f32 %v432_v42, %v350_v27  ;;  %v721_v52 = vpop.f32.mrb[6].mxu0  ;;  %v729_v53 = vpop.f32.mrb[6].mxu1  ;;  %v359_v1 = vadd.f32 %v602_v17, %v274_v47 }
 0x100   :  { %v354_v55 = vadd.f32 %v721_v52, %v602_v17  ;;  %v245_v56 = vpop.f32.mrb[7].mxu0  ;;  %v362_v58 = vadd.f32 %v729_v53, %v602_v17  ;;  %v277_v59 = vpop.f32.mrb[7].mxu1  ;;  %v461_v8 = vmul.f32 %v353_v54, %v353_v54  ;;  %v469_v36 = vmul.f32 %v361_v57, %v361_v57  ;;  %v454_v52 = vld [vmem:[%s902_s5] sm:$0x1] }
 0x101   :  { %v434_v60 = vadd.f32 %v433_v51, %v351_v50  ;;  %v459_v61 = vmul.f32 %v351_v50, %v351_v50  ;;  %v473_v62 = vadd.f32 %v472_v49, %v458_v48  ;;  %v352_v63 = vadd.f32 %v602_v17, %v245_v56  ;;  %v430_v49 = vld [vmem:[%s901_s4] sm:$0x1] }
 0x102   :  { %v653_v0 = vpack.c.bf16 %v354_v55, %v353_v54  ;;  %v673_v6 = vpack.c.bf16 %v362_v58, %v361_v57  ;;  %v360_v7 = vadd.f32 %v602_v17, %v277_v59  ;;  %v462_v12 = vmul.f32 %v354_v55, %v354_v55 }
 0x103   :  { %v474_v2 = vadd.f32 %v473_v62, %v459_v61  ;;  %v435_v3 = vadd.f32 %v434_v60, %v352_v63  ;;  %v460_v4 = vmul.f32 %v352_v63, %v352_v63  ;;  %v648_v5 = vpack.c.bf16 %v352_v63, %v351_v50 }
 0x104   :  { %677 = vst [vmem:[%s904_s3 + $0x18] sm:$0xff] %v653_v0   ;;  %681 = vst [vmem:[%s904_s3 + $0x38] sm:$0xff] %v673_v6   ;;  %v668_v11 = vpack.c.bf16 %v360_v7, %v359_v1  ;;  %v467_v28 = vmul.f32 %v359_v1, %v359_v1  ;;  %v468_v35 = vmul.f32 %v360_v7, %v360_v7 }
 0x105   :  { %v436_v9 = vadd.f32 %v435_v3, %v353_v54  ;;  %v475_v10 = vadd.f32 %v474_v2, %v460_v4  ;;  %676 = vst [vmem:[%s904_s3 + $0x10] sm:$0xff] %v648_v5   ;;  %v470_v38 = vmul.f32 %v362_v58, %v362_v58 }
 0x106   :  { %680 = vst [vmem:[%s904_s3 + $0x30] sm:$0xff] %v668_v11  }
 0x107   :  { %v476_v13 = vadd.f32 %v475_v10, %v461_v8  ;;  %v437_v14 = vadd.f32 %v436_v9, %v354_v55 }
 0x109   :  { %v438_v16 = vadd.f32 %v437_v14, %v355_v29  ;;  %v477_v17 = vadd.f32 %v476_v13, %v462_v12 }
 0x10b   :  { %v478_v18 = vadd.f32 %v477_v17, %v463_v15  ;;  %v439_v19 = vadd.f32 %v438_v16, %v356_v33 }
 0x10d   :  { %v440_v23 = vadd.f32 %v439_v19, %v851_v21  ;;  %v479_v24 = vadd.f32 %v478_v18, %v464_v20 }
 0x10f   :  { %v480_v26 = vadd.f32 %v479_v24, %v465_v22  ;;  %v441_v27 = vadd.f32 %v440_v23, %v853_v30 }
 0x111   :  { %v442_v31 = vadd.f32 %v441_v27, %v359_v1  ;;  %v481_v32 = vadd.f32 %v480_v26, %v466_v25 }
 0x113   :  { %v482_v29 = vadd.f32 %v481_v32, %v467_v28  ;;  %v443_v34 = vadd.f32 %v442_v31, %v360_v7 }
 0x115   :  { %v444_v33 = vadd.f32 %v443_v34, %v361_v57  ;;  %v483_v37 = vadd.f32 %v482_v29, %v468_v35 }
 0x117   :  { %v445_v39 = vadd.f32 %v444_v33, %v362_v58  ;;  %v484_v40 = vadd.f32 %v483_v37, %v469_v36 }
 0x119   :  { %v446_v21 = vrot.slane %v445_v39, 4  ;;  %v485_v41 = vadd.f32 %v484_v40, %v470_v38 }
 0x11b   :  { %v447_v42 = vadd.f32 %v446_v21, %v445_v39  ;;  %v486_v43 = vrot.slane %v485_v41, 4 }
 0x11d   :  { %v448_v44 = vrot.slane %v447_v42, 2  ;;  %v487_v45 = vadd.f32 %v486_v43, %v485_v41 }
 0x11f   :  { %v449_v46 = vadd.f32 %v448_v44, %v447_v42  ;;  %v488_v30 = vrot.slane %v487_v45, 2 }
 0x121   :  { %v450_v47 = vrot.slane %v449_v46, 1  ;;  %v489_v48 = vadd.f32 %v488_v30, %v487_v45 }
 0x123   :  { %v451_v50 = vadd.f32 %v450_v47, %v449_v46  ;;  %v490_v51 = vrot.slane %v489_v48, 1 }
 0x125   :  { %v452_v53 = vadd.f32 %v451_v50, %v430_v49  ;;  %v491_v54 = vadd.f32 %v490_v51, %v489_v48 }
 0x127   :  { %453 = vst [vmem:[%s901_s4] sm:$0x1] %v452_v53  ;;  %v492_v55 = vadd.f32 %v491_v54, %v454_v52 }
 0x129   :  { %493 = vst [vmem:[%s902_s5] sm:$0x1] %v492_v55 }

// kernel: _lambda_.19
= control target key start
LH: loop header
LB: loop body
LE: loop exit
PB: predicated region body
PF: predicated region fallthrough
CT: control target
= control target key end

     0   :  { %s370_s0 = inlined_call_operand.vmem [shape: bf16[128,128], index: 0, kind: input, shape index: {}]   ;;  %s371_s1 = inlined_call_operand.vmem [shape: f32[1,128], index: 1, kind: input, shape index: {}]   ;;  %s372_s2 = inlined_call_operand.vmem [shape: f32[1,128], index: 2, kind: input, shape index: {}]   ;;  %s373_s3 = inlined_call_operand.vmem [shape: bf16[128,128], index: 3, kind: output, shape index: {}]  }
   0x1   :  { %v211_v0 = vld [vmem:[%s370_s0] sm:$0xff]   ;;  %v282_v4 = vld [vmem:[%s370_s0 + $0x8] sm:$0xff]   ;;  %v283_v5 = vld [vmem:[%s370_s0 + $0x10] sm:$0xff]  }
   0x2   :  { %v176_v1 = vld [vmem:[%s371_s1] ss:$0 sm:$0xff]  ;;  %v212_v2 = vunpack.c.l.bf16 %v211_v0  ;;  %v213_v3 = vunpack.c.h.bf16 %v211_v0  ;;  %v284_v6 = vld [vmem:[%s370_s0 + $0x18] sm:$0xff]   ;;  %v216_v8 = vunpack.c.l.bf16 %v282_v4  ;;  %v217_v9 = vunpack.c.h.bf16 %v282_v4  ;;  %v286_v25 = vld [vmem:[%s370_s0 + $0x28] sm:$0xff]  }
   0x3   :  { %v177_v7 = vld [vmem:[%s372_s2] ss:$0 sm:$0xff]  ;;  %v220_v10 = vunpack.c.l.bf16 %v283_v5  ;;  %v221_v11 = vunpack.c.h.bf16 %v283_v5  ;;  %v224_v14 = vunpack.c.l.bf16 %v284_v6  ;;  %v225_v15 = vunpack.c.h.bf16 %v284_v6  ;;  %v287_v30 = vld [vmem:[%s370_s0 + $0x30] sm:$0xff]   ;;  %v288_v35 = vld [vmem:[%s370_s0 + $0x38] sm:$0xff]  }
   0x4   :  { %v53_v12 = vmul.f32 %v212_v2, %v176_v1  ;;  %v54_v13 = vmul.f32 %v213_v3, %v176_v1  ;;  %v55_v16 = vmul.f32 %v216_v8, %v176_v1  ;;  %v56_v17 = vmul.f32 %v217_v9, %v176_v1  ;;  %v285_v20 = vld [vmem:[%s370_s0 + $0x20] sm:$0xff]  }
   0x5   :  { %v57_v18 = vmul.f32 %v220_v10, %v176_v1  ;;  %v58_v19 = vmul.f32 %v221_v11, %v176_v1  ;;  %v59_v23 = vmul.f32 %v224_v14, %v176_v1  ;;  %v60_v24 = vmul.f32 %v225_v15, %v176_v1 }
   0x6   :  { %v76_v21 = vadd.f32 %v177_v7, %v53_v12  ;;  %v77_v22 = vadd.f32 %v177_v7, %v54_v13  ;;  %v78_v26 = vadd.f32 %v177_v7, %v55_v16  ;;  %v79_v27 = vadd.f32 %v177_v7, %v56_v17 }
   0x7   :  { %v80_v28 = vadd.f32 %v177_v7, %v57_v18  ;;  %v81_v29 = vadd.f32 %v177_v7, %v58_v19  ;;  %v82_v32 = vadd.f32 %v177_v7, %v59_v23  ;;  %v83_v33 = vadd.f32 %v177_v7, %v60_v24 }
   0x8   :  { %v245_v31 = vpack.c.bf16 %v77_v22, %v76_v21  ;;  %v228_v34 = vunpack.c.l.bf16 %v285_v20  ;;  %v250_v36 = vpack.c.bf16 %v79_v27, %v78_v26  ;;  %v229_v38 = vunpack.c.h.bf16 %v285_v20 }
   0x9   :  { %v255_v37 = vpack.c.bf16 %v81_v29, %v80_v28  ;;  %v232_v39 = vunpack.c.l.bf16 %v286_v25  ;;  %v260_v40 = vpack.c.bf16 %v83_v33, %v82_v32  ;;  %v233_v42 = vunpack.c.h.bf16 %v286_v25 }
   0xa   :  { %246 = vst [vmem:[%s373_s3] sm:$0xff] %v245_v31   ;;  %v61_v41 = vmul.f32 %v228_v34, %v176_v1  ;;  %v236_v43 = vunpack.c.l.bf16 %v287_v30  ;;  %289 = vst [vmem:[%s373_s3 + $0x8] sm:$0xff] %v250_v36   ;;  %v62_v44 = vmul.f32 %v229_v38, %v176_v1  ;;  %v237_v46 = vunpack.c.h.bf16 %v287_v30 }
   0xb   :  { %290 = vst [vmem:[%s373_s3 + $0x10] sm:$0xff] %v255_v37   ;;  %v63_v45 = vmul.f32 %v232_v39, %v176_v1  ;;  %v240_v47 = vunpack.c.l.bf16 %v288_v35  ;;  %291 = vst [vmem:[%s373_s3 + $0x18] sm:$0xff] %v260_v40   ;;  %v64_v49 = vmul.f32 %v233_v42, %v176_v1  ;;  %v241_v51 = vunpack.c.h.bf16 %v288_v35 }
   0xc   :  { %v84_v48 = vadd.f32 %v177_v7, %v61_v41  ;;  %v65_v50 = vmul.f32 %v236_v43, %v176_v1  ;;  %v85_v52 = vadd.f32 %v177_v7, %v62_v44  ;;  %v66_v54 = vmul.f32 %v237_v46, %v176_v1 }
   0xd   :  { %v86_v53 = vadd.f32 %v177_v7, %v63_v45  ;;  %v67_v55 = vmul.f32 %v240_v47, %v176_v1  ;;  %v87_v56 = vadd.f32 %v177_v7, %v64_v49  ;;  %v68_v58 = vmul.f32 %v241_v51, %v176_v1 }
   0xe   :  { %v88_v57 = vadd.f32 %v177_v7, %v65_v50  ;;  %v265_v59 = vpack.c.bf16 %v85_v52, %v84_v48  ;;  %v89_v60 = vadd.f32 %v177_v7, %v66_v54 }
   0xf   :  { %v90_v61 = vadd.f32 %v177_v7, %v67_v55  ;;  %v270_v62 = vpack.c.bf16 %v87_v56, %v86_v53  ;;  %v91_v63 = vadd.f32 %v177_v7, %v68_v58 }
  0x10   :  { %292 = vst [vmem:[%s373_s3 + $0x20] sm:$0xff] %v265_v59   ;;  %v275_v0 = vpack.c.bf16 %v89_v60, %v88_v57 }
  0x11   :  { %293 = vst [vmem:[%s373_s3 + $0x28] sm:$0xff] %v270_v62   ;;  %v280_v2 = vpack.c.bf16 %v91_v63, %v90_v61 }
  0x12   :  { %294 = vst [vmem:[%s373_s3 + $0x30] sm:$0xff] %v275_v0  }
  0x13   :  { %295 = vst [vmem:[%s373_s3 + $0x38] sm:$0xff] %v280_v2  }

// kernel: _lambda_.21
= control target key start
LH: loop header
LB: loop body
LE: loop exit
PB: predicated region body
PF: predicated region fallthrough
CT: control target
= control target key end

     0   :  { %s136_s0 = inlined_call_operand.vmem [shape: bf16[32,128], index: 0, kind: input, shape index: {}]   ;;  %s137_s1 = inlined_call_operand.vmem [shape: f32[1,128], index: 1, kind: input, shape index: {}]   ;;  %s138_s2 = inlined_call_operand.vmem [shape: f32[1,128], index: 2, kind: input, shape index: {}]   ;;  %s139_s3 = inlined_call_operand.vmem [shape: bf16[32,128], index: 3, kind: output, shape index: {}]  }
   0x1   :  { %v79_v0 = vld [vmem:[%s136_s0] sm:$0xff]   ;;  %v96_v4 = vld [vmem:[%s136_s0 + $0x8] sm:$0xff]  }
   0x2   :  { %v68_v1 = vld [vmem:[%s137_s1] ss:$0 sm:$0xff]  ;;  %v80_v2 = vunpack.c.l.bf16 %v79_v0  ;;  %v81_v3 = vunpack.c.h.bf16 %v79_v0  ;;  %v84_v6 = vunpack.c.l.bf16 %v96_v4  ;;  %v85_v7 = vunpack.c.h.bf16 %v96_v4 }
   0x3   :  { %v69_v5 = vld [vmem:[%s138_s2] ss:$0 sm:$0xff] }
   0x4   :  { %v29_v8 = vmul.f32 %v80_v2, %v68_v1  ;;  %v30_v9 = vmul.f32 %v81_v3, %v68_v1  ;;  %v31_v10 = vmul.f32 %v84_v6, %v68_v1  ;;  %v32_v11 = vmul.f32 %v85_v7, %v68_v1 }
   0x6   :  { %v40_v12 = vadd.f32 %v69_v5, %v29_v8  ;;  %v41_v13 = vadd.f32 %v69_v5, %v30_v9  ;;  %v42_v14 = vadd.f32 %v69_v5, %v31_v10  ;;  %v43_v15 = vadd.f32 %v69_v5, %v32_v11 }
   0x8   :  { %v89_v16 = vpack.c.bf16 %v41_v13, %v40_v12  ;;  %v94_v17 = vpack.c.bf16 %v43_v15, %v42_v14 }
   0xa   :  { %90 = vst [vmem:[%s139_s3] sm:$0xff] %v89_v16   ;;  %97 = vst [vmem:[%s139_s3 + $0x8] sm:$0xff] %v94_v17  }

// kernel: _lambda_.20
= control target key start
LH: loop header
LB: loop body
LE: loop exit
PB: predicated region body
PF: predicated region fallthrough
CT: control target
= control target key end

     0   :  { %v453_v20 = vmov 0.0   ;;  %s571_s1 = inlined_call_operand.vmem [shape: bf16[1,256,128], index: 1, kind: input, shape index: {}]   ;;  %s572_s0 = inlined_call_operand.vmem [shape: bf16[1,32,256], index: 0, kind: input, shape index: {}]   ;;  %s573_s4 = inlined_call_operand.vmem [shape: f32[1,128], index: 4, kind: output, shape index: {1}]   ;;  %s574_s5 = inlined_call_operand.vmem [shape: f32[1,128], index: 5, kind: output, shape index: {2}]   ;;  %s575_s2 = inlined_call_operand.vmem [shape: f32[1,128], index: 2, kind: input, shape index: {}]   ;;  %s576_s3 = inlined_call_operand.vmem [shape: bf16[1,32,128], index: 3, kind: output, shape index: {0}]  }
   0x1   :  { %v431_v0 = vld [vmem:[%s571_s1 + $0x40] sm:$0xff]   ;;  %v433_v2 = vld [vmem:[%s571_s1 + $0x48] sm:$0xff]   ;;  %v435_v4 = vld [vmem:[%s571_s1 + $0x50] sm:$0xff]   ;;  %34 = vst [vmem:[%s573_s4] sm:$0x1] %v453_v20 }
   0x2   :  { %v432_v1 = vld [vmem:[%s571_s1] sm:$0xff]   ;;  %386 = vmatprep.subr.bf16.mxu0 %v431_v0  ;;  %414 = vmatprep.subr.bf16.mxu1 %v431_v0  ;;  %v434_v3 = vld [vmem:[%s571_s1 + $0x8] sm:$0xff]   ;;  %v436_v5 = vld [vmem:[%s571_s1 + $0x10] sm:$0xff]   ;;  %35 = vst [vmem:[%s574_s5] sm:$0x1] %v453_v20 }
   0x3   :  { %387 = vmatpush3.bf16.msra.mxu0 %v432_v1  ;;  %422 = vmatpush3.bf16.msra.mxu1 %v432_v1  ;;  %v437_v6 = vld [vmem:[%s571_s1 + $0x58] sm:$0xff]   ;;  %v439_v8 = vld [vmem:[%s571_s1 + $0x60] sm:$0xff]   ;;  %v441_v10 = vld [vmem:[%s571_s1 + $0x68] sm:$0xff]  }
   0x4   :  { %388 = vmatprep.subr.bf16.mxu0 %v433_v2  ;;  %415 = vmatprep.subr.bf16.mxu1 %v433_v2  ;;  %v438_v7 = vld [vmem:[%s571_s1 + $0x18] sm:$0xff]   ;;  %v440_v9 = vld [vmem:[%s571_s1 + $0x20] sm:$0xff]   ;;  %v442_v13 = vld [vmem:[%s571_s1 + $0x28] sm:$0xff]  }
   0x5   :  { %v449_v11 = vld [vmem:[%s572_s0 + $0x4] ss:$8 sps:$4 sm:$0xff]   ;;  %v452_v12 = vld [vmem:[%s572_s0 + $0x14] ss:$8 sps:$4 sm:$0xff]   ;;  %v447_v18 = vld [vmem:[%s572_s0] ss:$8 sps:$4 sm:$0xff]  }
   0x6   :  { %v443_v14 = vld [vmem:[%s571_s1 + $0x70] sm:$0xff]   ;;  %224 = vmatprep.mubr.bf16.mxu0 %v449_v11  ;;  %232 = vmatprep.mubr.bf16.mxu1 %v452_v12  ;;  %v445_v16 = vld [vmem:[%s571_s1 + $0x78] sm:$0xff]   ;;  %v366_v24 = vld [vmem:[%s575_s2] ss:$0 sm:$0xff] }
   0x7   :  { %389 = vmatpush3.bf16.msra.mxu0 %v434_v3  ;;  %423 = vmatpush3.bf16.msra.mxu1 %v434_v3  ;;  %v444_v15 = vld [vmem:[%s571_s1 + $0x30] sm:$0xff]   ;;  %v446_v17 = vld [vmem:[%s571_s1 + $0x38] sm:$0xff]  }
   0x8   :  { %390 = vmatprep.subr.bf16.mxu0 %v435_v4  ;;  %416 = vmatprep.subr.bf16.mxu1 %v435_v4  ;;  %v450_v19 = vld [vmem:[%s572_s0 + $0x10] ss:$8 sps:$4 sm:$0xff]   ;;  %v286_v59 = vld [vmem:[%s573_s4] sm:$0x1] }
   0x9   :  { %v298_v62 = vld [vmem:[%s574_s5] sm:$0x1] }
   0xb   :  { %391 = vmatpush3.bf16.msra.mxu0 %v436_v5  ;;  %424 = vmatpush3.bf16.msra.mxu1 %v436_v5 }
   0xc   :  { %392 = vmatprep.subr.bf16.mxu0 %v437_v6  ;;  %417 = vmatprep.subr.bf16.mxu1 %v437_v6 }
   0xf   :  { %393 = vmatpush3.bf16.msra.mxu0 %v438_v7  ;;  %425 = vmatpush3.bf16.msra.mxu1 %v438_v7 }
  0x10   :  { %394 = vmatprep.subr.bf16.mxu0 %v439_v8  ;;  %418 = vmatprep.subr.bf16.mxu1 %v439_v8 }
  0x13   :  { %395 = vmatpush3.bf16.msra.mxu0 %v440_v9  ;;  %426 = vmatpush3.bf16.msra.mxu1 %v440_v9 }
  0x14   :  { %396 = vmatprep.subr.bf16.mxu0 %v441_v10  ;;  %419 = vmatprep.subr.bf16.mxu1 %v441_v10 }
  0x17   :  { %397 = vmatpush3.bf16.msra.mxu0 %v442_v13  ;;  %427 = vmatpush3.bf16.msra.mxu1 %v442_v13 }
  0x18   :  { %398 = vmatprep.subr.bf16.mxu0 %v443_v14  ;;  %420 = vmatprep.subr.bf16.mxu1 %v443_v14 }
  0x1b   :  { %399 = vmatpush3.bf16.msra.mxu0 %v444_v15  ;;  %428 = vmatpush3.bf16.msra.mxu1 %v444_v15 }
  0x1c   :  { %400 = vmatprep.subr.bf16.mxu0 %v445_v16  ;;  %421 = vmatprep.subr.bf16.mxu1 %v445_v16 }
  0x1f   :  { %401 = vmatpush3.bf16.msra.mxu0 %v446_v17  ;;  %429 = vmatpush3.bf16.msra.mxu1 %v446_v17 }
  0x22   :  { %225 = vmatmul.mubr.bf16.vlgmr.msra.gmra.mrb[0].mxu0 %v447_v18  ;;  %233 = vmatmul.mubr.bf16.vlgmr.msra.gmra.mrb[0].mxu1 %v450_v19 }
  0xf5   :  { %v402_v21 = vpop.f32.mrb[0].mxu0  ;;  %v408_v22 = vpop.f32.mrb[0].mxu1 }
  0xf6   :  { %v403_v23 = vpop.f32.mrb[1].mxu0  ;;  %v409_v25 = vpop.f32.mrb[1].mxu1 }
  0xf7   :  { %v404_v26 = vadd.f32 %v403_v23, %v402_v21  ;;  %v405_v27 = vpop.f32.mrb[2].mxu0  ;;  %v410_v28 = vadd.f32 %v409_v25, %v408_v22  ;;  %v411_v29 = vpop.f32.mrb[2].mxu1 }
  0xf8   :  { %v406_v30 = vpop.f32.mrb[3].mxu0  ;;  %v412_v31 = vpop.f32.mrb[3].mxu1 }
  0xf9   :  { %v263_v32 = vadd.f32 %v404_v26, %v366_v24  ;;  %v265_v33 = vadd.f32 %v410_v28, %v366_v24  ;;  %v407_v34 = vadd.f32 %v406_v30, %v405_v27  ;;  %v413_v35 = vadd.f32 %v412_v31, %v411_v29 }
  0xfb   :  { %v264_v36 = vadd.f32 %v407_v34, %v366_v24  ;;  %v266_v37 = vadd.f32 %v413_v35, %v366_v24  ;;  %v299_v38 = vmul.f32 %v263_v32, %v263_v32  ;;  %v301_v39 = vmul.f32 %v265_v33, %v265_v33 }
  0xfd   :  { %v287_v40 = vadd.f32 %v264_v36, %v263_v32  ;;  %v300_v41 = vmul.f32 %v264_v36, %v264_v36  ;;  %v378_v42 = vpack.c.bf16 %v264_v36, %v263_v32  ;;  %v383_v43 = vpack.c.bf16 %v266_v37, %v265_v33 }
  0xfe   :  { %v302_v47 = vmul.f32 %v266_v37, %v266_v37 }
  0xff   :  { %v303_v44 = vadd.f32 %v300_v41, %v299_v38  ;;  %379 = vst [vmem:[%s576_s3] sm:$0xff] %v378_v42   ;;  %v288_v45 = vadd.f32 %v287_v40, %v265_v33  ;;  %385 = vst [vmem:[%s576_s3 + $0x8] sm:$0xff] %v383_v43  }
 0x101   :  { %v289_v46 = vadd.f32 %v288_v45, %v266_v37  ;;  %v304_v48 = vadd.f32 %v303_v44, %v301_v39 }
 0x103   :  { %v290_v49 = vrot.slane %v289_v46, 4  ;;  %v305_v50 = vadd.f32 %v304_v48, %v302_v47 }
 0x105   :  { %v291_v51 = vadd.f32 %v290_v49, %v289_v46  ;;  %v306_v52 = vrot.slane %v305_v50, 4 }
 0x107   :  { %v292_v53 = vrot.slane %v291_v51, 2  ;;  %v307_v54 = vadd.f32 %v306_v52, %v305_v50 }
 0x109   :  { %v293_v55 = vadd.f32 %v292_v53, %v291_v51  ;;  %v308_v56 = vrot.slane %v307_v54, 2 }
 0x10b   :  { %v294_v57 = vrot.slane %v293_v55, 1  ;;  %v309_v58 = vadd.f32 %v308_v56, %v307_v54 }
 0x10d   :  { %v295_v60 = vadd.f32 %v294_v57, %v293_v55  ;;  %v310_v61 = vrot.slane %v309_v58, 1 }
 0x10f   :  { %v296_v63 = vadd.f32 %v295_v60, %v286_v59  ;;  %v311_v0 = vadd.f32 %v310_v61, %v309_v58 }
 0x111   :  { %297 = vst [vmem:[%s573_s4] sm:$0x1] %v296_v63  ;;  %v312_v1 = vadd.f32 %v311_v0, %v298_v62 }
 0x113   :  { %313 = vst [vmem:[%s574_s5] sm:$0x1] %v312_v1 }

// kernel: _lambda_.23
= control target key start
LH: loop header
LB: loop body
LE: loop exit
PB: predicated region body
PF: predicated region fallthrough
CT: control target
= control target key end

     0   :  { %s97_s0 = inlined_call_operand.vmem [shape: bf16[16,128], index: 0, kind: input, shape index: {}]   ;;  %s98_s1 = inlined_call_operand.vmem [shape: f32[1,128], index: 1, kind: input, shape index: {}]   ;;  %s99_s2 = inlined_call_operand.vmem [shape: f32[1,128], index: 2, kind: input, shape index: {}]   ;;  %s100_s3 = inlined_call_operand.vmem [shape: bf16[16,128], index: 3, kind: output, shape index: {}]  }
   0x1   :  { %v57_v0 = vld [vmem:[%s97_s0] sm:$0xff]  }
   0x2   :  { %v50_v1 = vld [vmem:[%s98_s1] ss:$0 sm:$0xff]  ;;  %v58_v2 = vunpack.c.l.bf16 %v57_v0  ;;  %v59_v3 = vunpack.c.h.bf16 %v57_v0 }
   0x3   :  { %v51_v4 = vld [vmem:[%s99_s2] ss:$0 sm:$0xff] }
   0x4   :  { %v25_v5 = vmul.f32 %v58_v2, %v50_v1  ;;  %v26_v6 = vmul.f32 %v59_v3, %v50_v1 }
   0x6   :  { %v34_v7 = vadd.f32 %v51_v4, %v25_v5  ;;  %v35_v8 = vadd.f32 %v51_v4, %v26_v6 }
   0x8   :  { %v63_v9 = vpack.c.bf16 %v35_v8, %v34_v7 }
   0xa   :  { %64 = vst [vmem:[%s100_s3] sm:$0xff] %v63_v9  }

// kernel: _lambda_.22
= control target key start
LH: loop header
LB: loop body
LE: loop exit
PB: predicated region body
PF: predicated region fallthrough
CT: control target
= control target key end

     0   :  { %v600_v36 = vmov 0.0   ;;  %s763_s1 = inlined_call_operand.vmem [shape: bf16[1,512,128], index: 1, kind: input, shape index: {}]   ;;  %s764_s0 = inlined_call_operand.vmem [shape: bf16[1,16,512], index: 0, kind: input, shape index: {}]   ;;  %s765_s4 = inlined_call_operand.vmem [shape: f32[1,128], index: 4, kind: output, shape index: {1}]   ;;  %s766_s5 = inlined_call_operand.vmem [shape: f32[1,128], index: 5, kind: output, shape index: {2}]   ;;  %s767_s2 = inlined_call_operand.vmem [shape: f32[1,128], index: 2, kind: input, shape index: {}]   ;;  %s768_s3 = inlined_call_operand.vmem [shape: bf16[1,16,128], index: 3, kind: output, shape index: {0}]  }
   0x1   :  { %v562_v0 = vld [vmem:[%s763_s1 + $0x40] sm:$0xff]   ;;  %v566_v4 = vld [vmem:[%s763_s1 + $0x48] sm:$0xff]   ;;  %v570_v8 = vld [vmem:[%s763_s1 + $0x50] sm:$0xff]   ;;  %32 = vst [vmem:[%s765_s4] sm:$0x1] %v600_v36 }
   0x2   :  { %v563_v1 = vld [vmem:[%s763_s1 + $0xc0] sm:$0xff]   ;;  %517 = vmatprep.subr.bf16.mxu0 %v562_v0  ;;  %v567_v5 = vld [vmem:[%s763_s1 + $0xc8] sm:$0xff]   ;;  %v571_v9 = vld [vmem:[%s763_s1 + $0xd0] sm:$0xff]   ;;  %33 = vst [vmem:[%s766_s5] sm:$0x1] %v600_v36 }
   0x3   :  { %v564_v2 = vld [vmem:[%s763_s1] sm:$0xff]   ;;  %539 = vmatprep.subr.bf16.mxu1 %v563_v1  ;;  %v568_v6 = vld [vmem:[%s763_s1 + $0x8] sm:$0xff]   ;;  %v572_v10 = vld [vmem:[%s763_s1 + $0x10] sm:$0xff]  }
   0x4   :  { %v565_v3 = vld [vmem:[%s763_s1 + $0x80] sm:$0xff]   ;;  %518 = vmatpush3.bf16.msra.mxu0 %v564_v2  ;;  %v569_v7 = vld [vmem:[%s763_s1 + $0x88] sm:$0xff]   ;;  %v573_v11 = vld [vmem:[%s763_s1 + $0x90] sm:$0xff]  }
   0x5   :  { %540 = vmatpush3.bf16.msra.mxu1 %v565_v3  ;;  %519 = vmatprep.subr.bf16.mxu0 %v566_v4  ;;  %v574_v12 = vld [vmem:[%s763_s1 + $0x58] sm:$0xff]   ;;  %v578_v16 = vld [vmem:[%s763_s1 + $0x60] sm:$0xff]   ;;  %v582_v20 = vld [vmem:[%s763_s1 + $0x68] sm:$0xff]  }
   0x6   :  { %541 = vmatprep.subr.bf16.mxu1 %v567_v5  ;;  %v575_v13 = vld [vmem:[%s763_s1 + $0xd8] sm:$0xff]   ;;  %v579_v17 = vld [vmem:[%s763_s1 + $0xe0] sm:$0xff]   ;;  %v583_v21 = vld [vmem:[%s763_s1 + $0xe8] sm:$0xff]  }
   0x7   :  { %v576_v14 = vld [vmem:[%s763_s1 + $0x18] sm:$0xff]   ;;  %v580_v18 = vld [vmem:[%s763_s1 + $0x20] sm:$0xff]   ;;  %v584_v22 = vld [vmem:[%s763_s1 + $0x28] sm:$0xff]  }
   0x8   :  { %520 = vmatpush3.bf16.msra.mxu0 %v568_v6  ;;  %v577_v15 = vld [vmem:[%s763_s1 + $0x98] sm:$0xff]   ;;  %v581_v19 = vld [vmem:[%s763_s1 + $0xa0] sm:$0xff]   ;;  %v585_v23 = vld [vmem:[%s763_s1 + $0xa8] sm:$0xff]  }
   0x9   :  { %542 = vmatpush3.bf16.msra.mxu1 %v569_v7  ;;  %521 = vmatprep.subr.bf16.mxu0 %v570_v8  ;;  %v586_v24 = vld [vmem:[%s763_s1 + $0x70] sm:$0xff]   ;;  %v590_v28 = vld [vmem:[%s763_s1 + $0x78] sm:$0xff]   ;;  %v507_v46 = vld [vmem:[%s767_s2] ss:$0 sm:$0xff] }
   0xa   :  { %543 = vmatprep.subr.bf16.mxu1 %v571_v9  ;;  %v587_v25 = vld [vmem:[%s763_s1 + $0xf0] sm:$0xff]   ;;  %v591_v29 = vld [vmem:[%s763_s1 + $0xf8] sm:$0xff]   ;;  %v427_v1 = vld [vmem:[%s765_s4] sm:$0x1] }
   0xb   :  { %v588_v26 = vld [vmem:[%s763_s1 + $0x30] sm:$0xff]   ;;  %v592_v30 = vld [vmem:[%s763_s1 + $0x38] sm:$0xff]   ;;  %v437_v4 = vld [vmem:[%s766_s5] sm:$0x1] }
   0xc   :  { %522 = vmatpush3.bf16.msra.mxu0 %v572_v10  ;;  %v589_v27 = vld [vmem:[%s763_s1 + $0xb0] sm:$0xff]   ;;  %v593_v31 = vld [vmem:[%s763_s1 + $0xb8] sm:$0xff]  }
   0xd   :  { %544 = vmatpush3.bf16.msra.mxu1 %v573_v11  ;;  %523 = vmatprep.subr.bf16.mxu0 %v574_v12  ;;  %v594_v32 = vld [vmem:[%s764_s0] ss:$16 sps:$4 sm:$0xff]   ;;  %v596_v33 = vld [vmem:[%s764_s0 + $0x4] ss:$16 sps:$4 sm:$0xff]   ;;  %v597_v34 = vld [vmem:[%s764_s0 + $0x8] ss:$16 sps:$4 sm:$0xff]  }
   0xe   :  { %545 = vmatprep.subr.bf16.mxu1 %v575_v13  ;;  %v599_v35 = vld [vmem:[%s764_s0 + $0xc] ss:$16 sps:$4 sm:$0xff]   ;;  %348 = vmatprep.mubr.bf16.mxu0 %v596_v33 }
   0xf   :  { %389 = vmatprep.mubr.bf16.mxu1 %v599_v35 }
  0x10   :  { %524 = vmatpush3.bf16.msra.mxu0 %v576_v14 }
  0x11   :  { %546 = vmatpush3.bf16.msra.mxu1 %v577_v15  ;;  %525 = vmatprep.subr.bf16.mxu0 %v578_v16 }
  0x12   :  { %547 = vmatprep.subr.bf16.mxu1 %v579_v17 }
  0x14   :  { %526 = vmatpush3.bf16.msra.mxu0 %v580_v18 }
  0x15   :  { %548 = vmatpush3.bf16.msra.mxu1 %v581_v19  ;;  %527 = vmatprep.subr.bf16.mxu0 %v582_v20 }
  0x16   :  { %549 = vmatprep.subr.bf16.mxu1 %v583_v21 }
  0x18   :  { %528 = vmatpush3.bf16.msra.mxu0 %v584_v22 }
  0x19   :  { %550 = vmatpush3.bf16.msra.mxu1 %v585_v23  ;;  %529 = vmatprep.subr.bf16.mxu0 %v586_v24 }
  0x1a   :  { %551 = vmatprep.subr.bf16.mxu1 %v587_v25 }
  0x1c   :  { %530 = vmatpush3.bf16.msra.mxu0 %v588_v26 }
  0x1d   :  { %552 = vmatpush3.bf16.msra.mxu1 %v589_v27  ;;  %531 = vmatprep.subr.bf16.mxu0 %v590_v28 }
  0x1e   :  { %553 = vmatprep.subr.bf16.mxu1 %v591_v29 }
  0x20   :  { %532 = vmatpush3.bf16.msra.mxu0 %v592_v30 }
  0x21   :  { %554 = vmatpush3.bf16.msra.mxu1 %v593_v31 }
  0x23   :  { %349 = vmatmul.mubr.bf16.vlgmr.msra.gmra.mrb[0].mxu0 %v594_v32 }
  0x24   :  { %390 = vmatmul.mubr.bf16.vlgmr.msra.gmra.mrb[0].mxu1 %v597_v34 }
  0xf6   :  { %v533_v37 = vpop.f32.mrb[0].mxu0 }
  0xf7   :  { %v555_v38 = vpop.f32.mrb[0].mxu1  ;;  %v534_v39 = vpop.f32.mrb[1].mxu0 }
  0xf8   :  { %v535_v40 = vadd.f32 %v534_v39, %v533_v37  ;;  %v556_v41 = vpop.f32.mrb[1].mxu1  ;;  %v536_v42 = vpop.f32.mrb[2].mxu0 }
  0xf9   :  { %v557_v43 = vadd.f32 %v556_v41, %v555_v38  ;;  %v558_v44 = vpop.f32.mrb[2].mxu1  ;;  %v537_v45 = vpop.f32.mrb[3].mxu0 }
  0xfa   :  { %v538_v47 = vadd.f32 %v537_v45, %v536_v42  ;;  %v559_v48 = vpop.f32.mrb[3].mxu1 }
  0xfb   :  { %v392_v49 = vadd.f32 %v557_v43, %v535_v40  ;;  %v560_v50 = vadd.f32 %v559_v48, %v558_v44 }
  0xfd   :  { %v414_v51 = vadd.f32 %v507_v46, %v392_v49  ;;  %v395_v52 = vadd.f32 %v560_v50, %v538_v47 }
  0xff   :  { %v429_v53 = vrot.slane %v414_v51, 4  ;;  %v438_v54 = vmul.f32 %v414_v51, %v414_v51  ;;  %v415_v55 = vadd.f32 %v507_v46, %v395_v52 }
 0x101   :  { %v430_v56 = vadd.f32 %v429_v53, %v414_v51  ;;  %v441_v57 = vrot.slane %v438_v54, 4  ;;  %v515_v58 = vpack.c.bf16 %v415_v55, %v414_v51 }
 0x103   :  { %v431_v59 = vrot.slane %v430_v56, 2  ;;  %v442_v60 = vadd.f32 %v441_v57, %v438_v54  ;;  %516 = vst [vmem:[%s768_s3] sm:$0xff] %v515_v58  }
 0x105   :  { %v432_v61 = vadd.f32 %v431_v59, %v430_v56  ;;  %v443_v62 = vrot.slane %v442_v60, 2 }
 0x107   :  { %v433_v63 = vrot.slane %v432_v61, 1  ;;  %v444_v0 = vadd.f32 %v443_v62, %v442_v60 }
 0x109   :  { %v434_v2 = vadd.f32 %v433_v63, %v432_v61  ;;  %v445_v3 = vrot.slane %v444_v0, 1 }
 0x10b   :  { %v435_v5 = vadd.f32 %v434_v2, %v427_v1  ;;  %v446_v6 = vadd.f32 %v445_v3, %v444_v0 }
 0x10d   :  { %436 = vst [vmem:[%s765_s4] sm:$0x1] %v435_v5  ;;  %v447_v7 = vadd.f32 %v446_v6, %v437_v4 }
 0x10f   :  { %448 = vst [vmem:[%s766_s5] sm:$0x1] %v447_v7 }

// kernel: _lambda_.26
= control target key start
LH: loop header
LB: loop body
LE: loop exit
PB: predicated region body
PF: predicated region fallthrough
CT: control target
= control target key end

     0   :  { %s324_s12 = smov 0   ;;  %s341_s0 = inlined_call_operand.vmem [shape: bf16[64,128], index: 0, kind: input, shape index: {}]   ;;  %s342_s1 = inlined_call_operand.vmem [shape: f32[1,128], index: 1, kind: input, shape index: {}]   ;;  %s343_s2 = inlined_call_operand.vmem [shape: f32[1,128], index: 2, kind: input, shape index: {}]   ;;  %s344_s3 = inlined_call_operand.vmem [shape: bf16[64,128], index: 3, kind: output, shape index: {}]  }
   0x1 LB: > { %s262_s13 = sadd.s32 4294967295, %s302_s12   ;;  %p266_p0 = scmp.ge.s32.totalorder %s302_s12, 1  ;;  %s302_s12 = sphi %s324_s12, %s13_s12  }
   0x2   : > { %p138_p1 = scmp.lt.s32.totalorder %s302_s12, 5 }
   0x4   : > { %p139_p2 = pnand %p266_p0, %p138_p1 }
   0x5   : > { %s267_s14 = sshll.u32 (!%p139_p2), %s262_s13, 1  ;;  %v271_v1 = vld [vmem:[%s342_s1] ss:$0 sm:$0xff] (!%p139_p2) }
   0x6   : > { %142 = sbr.rel (%p139_p2) target bundleno = 26 (0x1a), region = 32  ;;  %p163_p3 = scmp.lt.s32.totalorder (!%p139_p2), %s267_s14, 7  ;;  %v272_v4 = vld [vmem:[%s343_s2] ss:$0 sm:$0xff] (!%p139_p2) }
   0xd   : > { %s346_s14 = smov (!%p163_p3, %s267_s14), 7 }
   0xe   : > { %s268_s15 = sshll.u32 %s346_s14, 2 }
   0xf   : > { %s166_s18 = scalar_lea.vmem %s341_s0, %s268_s15  ;;  %s172_s25 = scalar_lea.vmem %s344_s3, %s268_s15 }
  0x10   : > { %v280_v0 = vld [vmem:[%s166_s18] sm:$0xff]  }
  0x11   : > { %v281_v2 = vunpack.c.l.bf16 %v280_v0  ;;  %v282_v3 = vunpack.c.h.bf16 %v280_v0 }
  0x13   : > { %v185_v5 = vmul.f32 %v281_v2, %v271_v1  ;;  %v186_v6 = vmul.f32 %v282_v3, %v271_v1 }
  0x15   : > { %v194_v7 = vadd.f32 %v272_v4, %v185_v5  ;;  %v195_v8 = vadd.f32 %v272_v4, %v186_v6 }
  0x17   : > { %v286_v9 = vpack.c.bf16 %v195_v8, %v194_v7 }
  0x19   : > { %287 = vst [vmem:[%s172_s25] sm:$0xff] %v286_v9  }
  0x1a PF: > { %s13_s12 = sadd.s32 1, %s302_s12  }
  0x1b   : > { %p10_p4 = scmp.ge.s32.totalorder %s13_s12, 6  }
  0x1d   :  { %12 = sbr.rel (!%p10_p4) target bundleno = 1 (0x1), region = 62 }

// kernel: _lambda_.24
= control target key start
LH: loop header
LB: loop body
LE: loop exit
PB: predicated region body
PF: predicated region fallthrough
CT: control target
= control target key end

     0   :  { %s1255_s1 = inlined_call_operand.vmem [shape: bf16[1,1024,128], index: 1, kind: input, shape index: {}]   ;;  %s1256_s0 = inlined_call_operand.vmem [shape: bf16[1,16,1024], index: 0, kind: input, shape index: {}]   ;;  %s1257_s2 = inlined_call_operand.vmem [shape: f32[1,128], index: 2, kind: input, shape index: {}]   ;;  %s1258_s3 = inlined_call_operand.vmem [shape: bf16[1,16,128], index: 3, kind: output, shape index: {}]  }
   0x1   :  { %v949_v0 = vld [vmem:[%s1255_s1 + $0x40] sm:$0xff]   ;;  %v953_v4 = vld [vmem:[%s1255_s1 + $0x48] sm:$0xff]   ;;  %v957_v8 = vld [vmem:[%s1255_s1 + $0x50] sm:$0xff]  }
   0x2   :  { %v950_v1 = vld [vmem:[%s1255_s1 + $0xc0] sm:$0xff]   ;;  %861 = vmatprep.subr.bf16.mxu0 %v949_v0  ;;  %v954_v5 = vld [vmem:[%s1255_s1 + $0xc8] sm:$0xff]   ;;  %v958_v9 = vld [vmem:[%s1255_s1 + $0xd0] sm:$0xff]  }
   0x3   :  { %v951_v2 = vld [vmem:[%s1255_s1] sm:$0xff]   ;;  %883 = vmatprep.subr.bf16.mxu1 %v950_v1  ;;  %v955_v6 = vld [vmem:[%s1255_s1 + $0x8] sm:$0xff]   ;;  %v959_v10 = vld [vmem:[%s1255_s1 + $0x10] sm:$0xff]  }
   0x4   :  { %v952_v3 = vld [vmem:[%s1255_s1 + $0x80] sm:$0xff]   ;;  %862 = vmatpush3.bf16.msra.mxu0 %v951_v2  ;;  %v956_v7 = vld [vmem:[%s1255_s1 + $0x88] sm:$0xff]   ;;  %v960_v11 = vld [vmem:[%s1255_s1 + $0x90] sm:$0xff]  }
   0x5   :  { %884 = vmatpush3.bf16.msra.mxu1 %v952_v3  ;;  %863 = vmatprep.subr.bf16.mxu0 %v953_v4  ;;  %v961_v12 = vld [vmem:[%s1255_s1 + $0x58] sm:$0xff]   ;;  %v965_v16 = vld [vmem:[%s1255_s1 + $0x60] sm:$0xff]   ;;  %v969_v20 = vld [vmem:[%s1255_s1 + $0x68] sm:$0xff]  }
   0x6   :  { %885 = vmatprep.subr.bf16.mxu1 %v954_v5  ;;  %v962_v13 = vld [vmem:[%s1255_s1 + $0xd8] sm:$0xff]   ;;  %v966_v17 = vld [vmem:[%s1255_s1 + $0xe0] sm:$0xff]   ;;  %v970_v21 = vld [vmem:[%s1255_s1 + $0xe8] sm:$0xff]  }
   0x7   :  { %v963_v14 = vld [vmem:[%s1255_s1 + $0x18] sm:$0xff]   ;;  %v967_v18 = vld [vmem:[%s1255_s1 + $0x20] sm:$0xff]   ;;  %v971_v22 = vld [vmem:[%s1255_s1 + $0x28] sm:$0xff]  }
   0x8   :  { %864 = vmatpush3.bf16.msra.mxu0 %v955_v6  ;;  %v964_v15 = vld [vmem:[%s1255_s1 + $0x98] sm:$0xff]   ;;  %v968_v19 = vld [vmem:[%s1255_s1 + $0xa0] sm:$0xff]   ;;  %v972_v23 = vld [vmem:[%s1255_s1 + $0xa8] sm:$0xff]  }
   0x9   :  { %886 = vmatpush3.bf16.msra.mxu1 %v956_v7  ;;  %865 = vmatprep.subr.bf16.mxu0 %v957_v8  ;;  %v973_v24 = vld [vmem:[%s1255_s1 + $0x70] sm:$0xff]   ;;  %v977_v28 = vld [vmem:[%s1255_s1 + $0x78] sm:$0xff]   ;;  %v23_v32 = vld [vmem:[%s1256_s0] sm:$0xff] }
   0xa   :  { %887 = vmatprep.subr.bf16.mxu1 %v958_v9  ;;  %v974_v25 = vld [vmem:[%s1255_s1 + $0xf0] sm:$0xff]   ;;  %v978_v29 = vld [vmem:[%s1255_s1 + $0xf8] sm:$0xff]   ;;  %v27_v33 = vld [vmem:[%s1256_s0 + $0x20] sm:$0xff] }
   0xb   :  { %v975_v26 = vld [vmem:[%s1255_s1 + $0x30] sm:$0xff]   ;;  %v979_v30 = vld [vmem:[%s1255_s1 + $0x38] sm:$0xff]   ;;  %v24_v34 = vld [vmem:[%s1256_s0 + $0x8] sm:$0xff]  ;;  %v779_v35 = vcombine.low %v23_v32, %v27_v33  ;;  %v780_v36 = vcombine.high %v23_v32, %v27_v33 }
   0xc   :  { %866 = vmatpush3.bf16.msra.mxu0 %v959_v10  ;;  %v976_v27 = vld [vmem:[%s1255_s1 + $0xb0] sm:$0xff]   ;;  %v980_v31 = vld [vmem:[%s1255_s1 + $0xb8] sm:$0xff]   ;;  %v28_v37 = vld [vmem:[%s1256_s0 + $0x28] sm:$0xff] }
   0xd   :  { %888 = vmatpush3.bf16.msra.mxu1 %v960_v11  ;;  %867 = vmatprep.subr.bf16.mxu0 %v961_v12  ;;  %v781_v38 = vcombine.low %v24_v34, %v28_v37  ;;  %v782_v39 = vcombine.high %v24_v34, %v28_v37  ;;  %v981_v40 = vld [vmem:[%s1255_s1 + $0x140] sm:$0xff]   ;;  %v985_v44 = vld [vmem:[%s1255_s1 + $0x148] sm:$0xff]   ;;  %v989_v48 = vld [vmem:[%s1255_s1 + $0x150] sm:$0xff]  }
   0xe   :  { %889 = vmatprep.subr.bf16.mxu1 %v962_v13  ;;  %615 = vmatprep.mubr.bf16.mxu0 %v780_v36  ;;  %v982_v41 = vld [vmem:[%s1255_s1 + $0x1c0] sm:$0xff]   ;;  %v986_v45 = vld [vmem:[%s1255_s1 + $0x1c8] sm:$0xff]   ;;  %v990_v49 = vld [vmem:[%s1255_s1 + $0x1d0] sm:$0xff]  }
   0xf   :  { %656 = vmatprep.mubr.bf16.mxu1 %v782_v39  ;;  %v983_v42 = vld [vmem:[%s1255_s1 + $0x100] sm:$0xff]   ;;  %v987_v46 = vld [vmem:[%s1255_s1 + $0x108] sm:$0xff]   ;;  %v991_v50 = vld [vmem:[%s1255_s1 + $0x110] sm:$0xff]  }
  0x10   :  { %868 = vmatpush3.bf16.msra.mxu0 %v963_v14  ;;  %v984_v43 = vld [vmem:[%s1255_s1 + $0x180] sm:$0xff]   ;;  %v988_v47 = vld [vmem:[%s1255_s1 + $0x188] sm:$0xff]   ;;  %v992_v51 = vld [vmem:[%s1255_s1 + $0x190] sm:$0xff]  }
  0x11   :  { %890 = vmatpush3.bf16.msra.mxu1 %v964_v15  ;;  %869 = vmatprep.subr.bf16.mxu0 %v965_v16  ;;  %v993_v52 = vld [vmem:[%s1255_s1 + $0x158] sm:$0xff]   ;;  %v997_v56 = vld [vmem:[%s1255_s1 + $0x160] sm:$0xff]   ;;  %v1001_v60 = vld [vmem:[%s1255_s1 + $0x168] sm:$0xff]  }
  0x12   :  { %891 = vmatprep.subr.bf16.mxu1 %v966_v17  ;;  %v994_v53 = vld [vmem:[%s1255_s1 + $0x1d8] sm:$0xff]   ;;  %v998_v57 = vld [vmem:[%s1255_s1 + $0x1e0] sm:$0xff]   ;;  %v1002_v61 = vld [vmem:[%s1255_s1 + $0x1e8] sm:$0xff]  }
  0x13   :  { %v995_v54 = vld [vmem:[%s1255_s1 + $0x118] sm:$0xff]   ;;  %v999_v58 = vld [vmem:[%s1255_s1 + $0x120] sm:$0xff]   ;;  %v1003_v62 = vld [vmem:[%s1255_s1 + $0x128] sm:$0xff]  }
  0x14   :  { %870 = vmatpush3.bf16.msra.mxu0 %v967_v18  ;;  %v996_v55 = vld [vmem:[%s1255_s1 + $0x198] sm:$0xff]   ;;  %v1000_v59 = vld [vmem:[%s1255_s1 + $0x1a0] sm:$0xff]   ;;  %v1004_v63 = vld [vmem:[%s1255_s1 + $0x1a8] sm:$0xff]  }
  0x15   :  { %892 = vmatpush3.bf16.msra.mxu1 %v968_v19  ;;  %871 = vmatprep.subr.bf16.mxu0 %v969_v20  ;;  %v1005_v0 = vld [vmem:[%s1255_s1 + $0x170] sm:$0xff]   ;;  %v1009_v4 = vld [vmem:[%s1255_s1 + $0x178] sm:$0xff]  }
  0x16   :  { %893 = vmatprep.subr.bf16.mxu1 %v970_v21  ;;  %v1006_v1 = vld [vmem:[%s1255_s1 + $0x1f0] sm:$0xff]   ;;  %v1010_v5 = vld [vmem:[%s1255_s1 + $0x1f8] sm:$0xff]  }
  0x17   :  { %v1007_v2 = vld [vmem:[%s1255_s1 + $0x130] sm:$0xff]   ;;  %v1011_v6 = vld [vmem:[%s1255_s1 + $0x138] sm:$0xff]  }
  0x18   :  { %872 = vmatpush3.bf16.msra.mxu0 %v971_v22  ;;  %v1008_v3 = vld [vmem:[%s1255_s1 + $0x1b0] sm:$0xff]   ;;  %v1012_v7 = vld [vmem:[%s1255_s1 + $0x1b8] sm:$0xff]  }
  0x19   :  { %894 = vmatpush3.bf16.msra.mxu1 %v972_v23  ;;  %873 = vmatprep.subr.bf16.mxu0 %v973_v24  ;;  %v25_v8 = vld [vmem:[%s1256_s0 + $0x10] sm:$0xff]  ;;  %v26_v12 = vld [vmem:[%s1256_s0 + $0x18] sm:$0xff] }
  0x1a   :  { %895 = vmatprep.subr.bf16.mxu1 %v974_v25  ;;  %v29_v9 = vld [vmem:[%s1256_s0 + $0x30] sm:$0xff]  ;;  %v30_v13 = vld [vmem:[%s1256_s0 + $0x38] sm:$0xff] }
  0x1b   :  { %v783_v10 = vcombine.low %v25_v8, %v29_v9  ;;  %v784_v11 = vcombine.high %v25_v8, %v29_v9  ;;  %v785_v14 = vcombine.low %v26_v12, %v30_v13  ;;  %v786_v15 = vcombine.high %v26_v12, %v30_v13 }
  0x1c   :  { %874 = vmatpush3.bf16.msra.mxu0 %v975_v26 }
  0x1d   :  { %896 = vmatpush3.bf16.msra.mxu1 %v976_v27  ;;  %875 = vmatprep.subr.bf16.mxu0 %v977_v28 }
  0x1e   :  { %897 = vmatprep.subr.bf16.mxu1 %v978_v29 }
  0x20   :  { %876 = vmatpush3.bf16.msra.mxu0 %v979_v30 }
  0x21   :  { %898 = vmatpush3.bf16.msra.mxu1 %v980_v31  ;;  %905 = vmatprep.subr.bf16.mxu0 %v981_v40 }
  0x22   :  { %927 = vmatprep.subr.bf16.mxu1 %v982_v41 }
  0x23   :  { %616 = vmatmul.mubr.bf16.vlgmr.msra.gmra.mrb[0].mxu0 %v779_v35 }
  0x24   :  { %657 = vmatmul.mubr.bf16.vlgmr.msra.gmra.mrb[0].mxu1 %v781_v38  ;;  %906 = vmatpush3.bf16.msra.mxu0 %v983_v42 }
  0x25   :  { %928 = vmatpush3.bf16.msra.mxu1 %v984_v43  ;;  %907 = vmatprep.subr.bf16.mxu0 %v985_v44 }
  0x26   :  { %929 = vmatprep.subr.bf16.mxu1 %v986_v45  ;;  %697 = vmatprep.mubr.bf16.mxu0 %v784_v11  ;;  %v851_v45 = vld [vmem:[%s1257_s2] ss:$0 sm:$0xff] }
  0x27   :  { %738 = vmatprep.mubr.bf16.mxu1 %v786_v15 }
  0x28   :  { %908 = vmatpush3.bf16.msra.mxu0 %v987_v46 }
  0x29   :  { %930 = vmatpush3.bf16.msra.mxu1 %v988_v47  ;;  %909 = vmatprep.subr.bf16.mxu0 %v989_v48 }
  0x2a   :  { %931 = vmatprep.subr.bf16.mxu1 %v990_v49 }
  0x2c   :  { %910 = vmatpush3.bf16.msra.mxu0 %v991_v50 }
  0x2d   :  { %932 = vmatpush3.bf16.msra.mxu1 %v992_v51  ;;  %911 = vmatprep.subr.bf16.mxu0 %v993_v52 }
  0x2e   :  { %933 = vmatprep.subr.bf16.mxu1 %v994_v53 }
  0x30   :  { %912 = vmatpush3.bf16.msra.mxu0 %v995_v54 }
  0x31   :  { %934 = vmatpush3.bf16.msra.mxu1 %v996_v55  ;;  %913 = vmatprep.subr.bf16.mxu0 %v997_v56 }
  0x32   :  { %935 = vmatprep.subr.bf16.mxu1 %v998_v57 }
  0x34   :  { %914 = vmatpush3.bf16.msra.mxu0 %v999_v58 }
  0x35   :  { %936 = vmatpush3.bf16.msra.mxu1 %v1000_v59  ;;  %915 = vmatprep.subr.bf16.mxu0 %v1001_v60 }
  0x36   :  { %937 = vmatprep.subr.bf16.mxu1 %v1002_v61 }
  0x38   :  { %916 = vmatpush3.bf16.msra.mxu0 %v1003_v62 }
  0x39   :  { %938 = vmatpush3.bf16.msra.mxu1 %v1004_v63  ;;  %917 = vmatprep.subr.bf16.mxu0 %v1005_v0 }
  0x3a   :  { %939 = vmatprep.subr.bf16.mxu1 %v1006_v1 }
  0x3c   :  { %918 = vmatpush3.bf16.msra.mxu0 %v1007_v2 }
  0x3d   :  { %940 = vmatpush3.bf16.msra.mxu1 %v1008_v3  ;;  %919 = vmatprep.subr.bf16.mxu0 %v1009_v4 }
  0x3e   :  { %941 = vmatprep.subr.bf16.mxu1 %v1010_v5 }
  0x40   :  { %920 = vmatpush3.bf16.msra.mxu0 %v1011_v6 }
  0x41   :  { %942 = vmatpush3.bf16.msra.mxu1 %v1012_v7 }
  0x43   :  { %698 = vmatmul.mubr.bf16.vlgmr.msra.gmra.mrb[4].mxu0 %v783_v10 }
  0x44   :  { %739 = vmatmul.mubr.bf16.vlgmr.msra.gmra.mrb[4].mxu1 %v785_v14 }
  0xf6   :  { %v877_v16 = vpop.f32.mrb[0].mxu0 }
  0xf7   :  { %v899_v17 = vpop.f32.mrb[0].mxu1  ;;  %v878_v18 = vpop.f32.mrb[1].mxu0 }
  0xf8   :  { %v879_v19 = vadd.f32 %v878_v18, %v877_v16  ;;  %v900_v20 = vpop.f32.mrb[1].mxu1  ;;  %v880_v21 = vpop.f32.mrb[2].mxu0 }
  0xf9   :  { %v901_v22 = vadd.f32 %v900_v20, %v899_v17  ;;  %v902_v23 = vpop.f32.mrb[2].mxu1  ;;  %v881_v24 = vpop.f32.mrb[3].mxu0 }
  0xfa   :  { %v882_v25 = vadd.f32 %v881_v24, %v880_v21  ;;  %v903_v26 = vpop.f32.mrb[3].mxu1 }
  0xfb   :  { %v659_v27 = vadd.f32 %v901_v22, %v879_v19  ;;  %v904_v28 = vadd.f32 %v903_v26, %v902_v23 }
  0xfd   :  { %v662_v29 = vadd.f32 %v904_v28, %v882_v25 }
 0x116   :  { %v921_v30 = vpop.f32.mrb[4].mxu0 }
 0x117   :  { %v943_v31 = vpop.f32.mrb[4].mxu1  ;;  %v922_v32 = vpop.f32.mrb[5].mxu0 }
 0x118   :  { %v923_v33 = vadd.f32 %v922_v32, %v921_v30  ;;  %v944_v34 = vpop.f32.mrb[5].mxu1  ;;  %v924_v35 = vpop.f32.mrb[6].mxu0 }
 0x119   :  { %v945_v36 = vadd.f32 %v944_v34, %v943_v31  ;;  %v946_v37 = vpop.f32.mrb[6].mxu1  ;;  %v925_v38 = vpop.f32.mrb[7].mxu0 }
 0x11a   :  { %v700_v39 = vadd.f32 %v923_v33, %v659_v27  ;;  %v926_v40 = vadd.f32 %v925_v38, %v924_v35  ;;  %v947_v41 = vpop.f32.mrb[7].mxu1 }
 0x11b   :  { %v948_v42 = vadd.f32 %v947_v41, %v946_v37 }
 0x11c   :  { %v741_v43 = vadd.f32 %v945_v36, %v700_v39  ;;  %v703_v44 = vadd.f32 %v926_v40, %v662_v29 }
 0x11e   :  { %v744_v46 = vadd.f32 %v948_v42, %v703_v44  ;;  %v763_v47 = vadd.f32 %v851_v45, %v741_v43 }
 0x120   :  { %v764_v48 = vadd.f32 %v851_v45, %v744_v46 }
 0x122   :  { %v859_v49 = vpack.c.bf16 %v764_v48, %v763_v47 }
 0x124   :  { %860 = vst [vmem:[%s1258_s3] sm:$0xff] %v859_v49  }

// kernel: _lambda_.25
= control target key start
LH: loop header
LB: loop body
LE: loop exit
PB: predicated region body
PF: predicated region fallthrough
CT: control target
= control target key end

     0   :  { %s1004_s18 = smov 0   ;;  %s1006_s19 = smov 0   ;;  %s1086_s0 = inlined_call_operand.vmem [shape: bf16[4,16,256], index: 0, kind: input, shape index: {}]   ;;  %s1087_s1 = inlined_call_operand.vmem [shape: bf16[4,256,128], index: 1, kind: input, shape index: {}]   ;;  %s1088_s2 = inlined_call_operand.vmem [shape: f32[1,128], index: 2, kind: input, shape index: {}]   ;;  %s1089_s3 = inlined_call_operand.vmem [shape: bf16[4,16,128], index: 3, kind: output, shape index: {0}]   ;;  %s1090_s4 = inlined_call_operand.vmem [shape: f32[1,128], index: 4, kind: output, shape index: {1}]   ;;  %s1091_s5 = inlined_call_operand.vmem [shape: f32[1,128], index: 5, kind: output, shape index: {2}]  }
   0x1   :  { %s1008_s20 = smov 0  }
   0x2 LB: > { %s38_s21 = sadd.s32 1, %s966_s19  ;;  %p835_p0 = scmp.ge.s32.totalorder %s970_s20, 1  ;;  %s970_s20 = sphi %s1008_s20, %s16_s20   ;;  %s966_s19 = sphi %s1006_s19, %s1093_s19   ;;  %s962_s18 = sphi %s1004_s18, %s1092_s18  }
   0x3   : > { %p40_p1 = scmp.ge.s32.totalorder %s38_s21, 4  ;;  %p267_p2 = scmp.lt.s32.totalorder %s970_s20, 5 }
   0x5   : > { %s1095_s21 = smov (%p40_p1, %s38_s21), 0  ;;  %p268_p3 = pnand %p835_p0, %p267_p2 }
   0x6   : > { %p334_p4 = scmp.lt.s32.totalorder (!%p268_p3), %s962_s18, 3  ;;  %p390_p5 = scmp.eq.s32.totalorder (!%p268_p3), %s962_s18, 0  ;;  %v972_v0 = vmov (!%p268_p3), 0.0  }
   0x7   : > { %271 = sbr.rel (%p268_p3) target bundleno = 291 (0x123), region = 32  ;;  %388 = vst [vmem:[#allocation2] sm:$0xff] (!%p268_p3), %v972_v0  ;;  %389 = vst [vmem:[#allocation2 + $0x8] sm:$0xff] (!%p268_p3), %v972_v0 }
   0xe   : > { %s1097_s18 = smov (!%p334_p4, %s962_s18), 3  ;;  %397 = sbr.rel (!%p390_p5) target bundleno = 21 (0x15), region = 40 }
   0xf   : > { %s869_s22 = sshll.u32 %s1097_s18, 4  ;;  %s870_s23 = sshll.u32 %s1097_s18, 7  ;;  %v973_v1 = vmov (%p390_p5), 0.0  }
  0x10   : > { %s1025_s26 = scalar_lea.vmem %s1086_s0, %s869_s22  ;;  %s1030_s29 = scalar_lea.vmem %s1087_s1, %s870_s23  ;;  %398 = vst [vmem:[%s1090_s4] sm:$0x1] (%p390_p5), %v973_v1  ;;  %399 = vst [vmem:[%s1091_s5] sm:$0x1] (%p390_p5), %v973_v1 }
  0x11   : > { %s871_s30 = sshll.u32 %s1097_s18, 3 }
  0x12   : > { %s1035_s8 = scalar_lea.vmem %s1089_s3, %s871_s30 }
  0x15 PF: > { %v929_v2 = vld [vmem:[%s1030_s29 + $0x40] sm:$0xff]   ;;  %v931_v4 = vld [vmem:[%s1030_s29 + $0x48] sm:$0xff]   ;;  %v933_v6 = vld [vmem:[%s1030_s29 + $0x50] sm:$0xff]   ;;  %v601_v20 = vlaneseq }
  0x16   : > { %v930_v3 = vld [vmem:[%s1030_s29] sm:$0xff]   ;;  %881 = vmatprep.subr.bf16.mxu0 %v929_v2  ;;  %v932_v5 = vld [vmem:[%s1030_s29 + $0x8] sm:$0xff]   ;;  %v934_v7 = vld [vmem:[%s1030_s29 + $0x10] sm:$0xff]  }
  0x17   : > { %882 = vmatpush3.bf16.msra.mxu0 %v930_v3  ;;  %v935_v8 = vld [vmem:[%s1030_s29 + $0x58] sm:$0xff]   ;;  %v937_v10 = vld [vmem:[%s1030_s29 + $0x60] sm:$0xff]   ;;  %v939_v12 = vld [vmem:[%s1030_s29 + $0x68] sm:$0xff]   ;;  %v602_v24 = vshrl.u32 %v601_v20, 7 }
  0x18   : > { %883 = vmatprep.subr.bf16.mxu0 %v931_v4  ;;  %v936_v9 = vld [vmem:[%s1030_s29 + $0x18] sm:$0xff]   ;;  %v938_v11 = vld [vmem:[%s1030_s29 + $0x20] sm:$0xff]   ;;  %v940_v14 = vld [vmem:[%s1030_s29 + $0x28] sm:$0xff]  }
  0x19   : > { %v947_v13 = vld [vmem:[%s1025_s26 + $0x4] ss:$8 sps:$4 sm:$0xff]   ;;  %v941_v15 = vld [vmem:[%s1030_s29 + $0x70] sm:$0xff]   ;;  %v943_v17 = vld [vmem:[%s1030_s29 + $0x78] sm:$0xff]   ;;  %vm608_vm0 = vcmp.lt.s32.totalorder %v602_v24, 2 }
  0x1a   : > { %574 = vmatprep.mubr.bf16.mxu0 %v947_v13  ;;  %v942_v16 = vld [vmem:[%s1030_s29 + $0x30] sm:$0xff]   ;;  %v944_v18 = vld [vmem:[%s1030_s29 + $0x38] sm:$0xff]   ;;  %v945_v19 = vld [vmem:[%s1025_s26] ss:$8 sps:$4 sm:$0xff]  }
  0x1b   : > { %884 = vmatpush3.bf16.msra.mxu0 %v932_v5  ;;  %v400_v22 = vld [vmem:[#allocation2] sm:$0xff]  ;;  %v401_v28 = vld [vmem:[#allocation2 + $0x8] sm:$0xff] }
  0x1c   : > { %885 = vmatprep.subr.bf16.mxu0 %v933_v6  ;;  %v862_v27 = vld [vmem:[%s1088_s2] ss:$0 sm:$0xff] }
  0x1d   : > { %v612_v47 = vld [vmem:[%s1090_s4] sm:$0x1] }
  0x1e   : > { %v622_v50 = vld [vmem:[%s1091_s5] sm:$0x1] }
  0x1f   : > { %886 = vmatpush3.bf16.msra.mxu0 %v934_v7 }
  0x20   : > { %887 = vmatprep.subr.bf16.mxu0 %v935_v8 }
  0x23   : > { %888 = vmatpush3.bf16.msra.mxu0 %v936_v9 }
  0x24   : > { %889 = vmatprep.subr.bf16.mxu0 %v937_v10 }
  0x27   : > { %890 = vmatpush3.bf16.msra.mxu0 %v938_v11 }
  0x28   : > { %891 = vmatprep.subr.bf16.mxu0 %v939_v12 }
  0x2b   : > { %892 = vmatpush3.bf16.msra.mxu0 %v940_v14 }
  0x2c   : > { %893 = vmatprep.subr.bf16.mxu0 %v941_v15 }
  0x2f   : > { %894 = vmatpush3.bf16.msra.mxu0 %v942_v16 }
  0x30   : > { %895 = vmatprep.subr.bf16.mxu0 %v943_v17 }
  0x33   : > { %896 = vmatpush3.bf16.msra.mxu0 %v944_v18 }
  0x36   : > { %575 = vmatmul.mubr.bf16.vlgmr.msra.gmra.mrb[0].mxu0 %v945_v19 }
 0x109   : > { %v897_v21 = vpop.f32.mrb[0].mxu0 }
 0x10a   : > { %v898_v23 = vpop.f32.mrb[1].mxu0 }
 0x10b   : > { %v899_v25 = vadd.f32 %v898_v23, %v897_v21  ;;  %v900_v26 = vpop.f32.mrb[2].mxu0 }
 0x10c   : > { %v901_v29 = vpop.f32.mrb[3].mxu0 }
 0x10d   : > { %v583_v30 = vadd.f32 %v899_v25, %v400_v22  ;;  %v902_v31 = vadd.f32 %v901_v29, %v900_v26 }
 0x10f   : > { %585 = vst [vmem:[#allocation2] sm:$0xff] %v583_v30  ;;  %v599_v32 = vadd.f32 %v862_v27, %v583_v30  ;;  %v584_v33 = vadd.f32 %v902_v31, %v401_v28 }
 0x111   : > { %v610_v34 = vsel %vm608_vm0, %v599_v32, 0.0  ;;  %586 = vst [vmem:[#allocation2 + $0x8] sm:$0xff] %v584_v33  ;;  %v600_v35 = vadd.f32 %v862_v27, %v584_v33 }
 0x112   : > { %v614_v36 = vrot.slane %v610_v34, 4  ;;  %v623_v37 = vmul.f32 %v610_v34, %v610_v34 }
 0x113   : > { %v879_v38 = vpack.c.bf16 %v600_v35, %v599_v32 }
 0x114   : > { %v615_v39 = vadd.f32 %v614_v36, %v610_v34  ;;  %v626_v40 = vrot.slane %v623_v37, 4 }
 0x115   : > { %880 = vst [vmem:[%s1035_s8] sm:$0xff] %v879_v38  }
 0x116   : > { %v616_v41 = vrot.slane %v615_v39, 2  ;;  %v627_v42 = vadd.f32 %v626_v40, %v623_v37 }
 0x118   : > { %v617_v43 = vadd.f32 %v616_v41, %v615_v39  ;;  %v628_v44 = vrot.slane %v627_v42, 2 }
 0x11a   : > { %v618_v45 = vrot.slane %v617_v43, 1  ;;  %v629_v46 = vadd.f32 %v628_v44, %v627_v42 }
 0x11c   : > { %v619_v48 = vadd.f32 %v618_v45, %v617_v43  ;;  %v630_v49 = vrot.slane %v629_v46, 1 }
 0x11e   : > { %v620_v51 = vadd.f32 %v619_v48, %v612_v47  ;;  %v631_v52 = vadd.f32 %v630_v49, %v629_v46 }
 0x120   : > { %621 = vst [vmem:[%s1090_s4] sm:$0x1] %v620_v51  ;;  %v632_v53 = vadd.f32 %v631_v52, %v622_v50 }
 0x122   : > { %633 = vst [vmem:[%s1091_s5] sm:$0x1] %v632_v53 }
 0x123 PF: > { %s16_s20 = sadd.s32 1, %s970_s20   ;;  %s1092_s18 = smov %s966_s19 }
 0x124   : > { %p13_p6 = scmp.ge.s32.totalorder %s16_s20, 6   ;;  %s1093_s19 = smov %s1095_s21 }
 0x126   :  { %15 = sbr.rel (!%p13_p6) target bundleno = 2 (0x2), region = 104 }

// kernel: _lambda_.27
= control target key start
LH: loop header
LB: loop body
LE: loop exit
PB: predicated region body
PF: predicated region fallthrough
CT: control target
= control target key end

     0   :  { %s1244_s18 = smov 0   ;;  %s1246_s19 = smov 0   ;;  %s1344_s0 = inlined_call_operand.vmem [shape: bf16[4,16,512], index: 0, kind: input, shape index: {}]   ;;  %s1345_s1 = inlined_call_operand.vmem [shape: bf16[4,512,128], index: 1, kind: input, shape index: {}]   ;;  %s1346_s2 = inlined_call_operand.vmem [shape: f32[1,128], index: 2, kind: input, shape index: {}]   ;;  %s1347_s3 = inlined_call_operand.vmem [shape: bf16[4,16,128], index: 3, kind: output, shape index: {0}]   ;;  %s1348_s4 = inlined_call_operand.vmem [shape: f32[1,128], index: 4, kind: output, shape index: {1}]   ;;  %s1349_s5 = inlined_call_operand.vmem [shape: f32[1,128], index: 5, kind: output, shape index: {2}]  }
   0x1   :  { %s1248_s20 = smov 0  }
   0x2 LB: > { %s38_s21 = sadd.s32 1, %s1206_s19  ;;  %p1016_p0 = scmp.ge.s32.totalorder %s1210_s20, 1  ;;  %s1210_s20 = sphi %s1248_s20, %s16_s20   ;;  %s1206_s19 = sphi %s1246_s19, %s1351_s19   ;;  %s1202_s18 = sphi %s1244_s18, %s1350_s18  }
   0x3   : > { %p40_p1 = scmp.ge.s32.totalorder %s38_s21, 4  ;;  %p267_p2 = scmp.lt.s32.totalorder %s1210_s20, 5 }
   0x5   : > { %s1353_s21 = smov (%p40_p1, %s38_s21), 0  ;;  %p268_p3 = pnand %p1016_p0, %p267_p2 }
   0x6   : > { %p334_p4 = scmp.lt.s32.totalorder (!%p268_p3), %s1202_s18, 3  ;;  %p390_p5 = scmp.eq.s32.totalorder (!%p268_p3), %s1202_s18, 0  ;;  %v1212_v0 = vmov (!%p268_p3), 0.0  }
   0x7   : > { %271 = sbr.rel (%p268_p3) target bundleno = 294 (0x126), region = 32  ;;  %388 = vst [vmem:[#allocation2] sm:$0xff] (!%p268_p3), %v1212_v0  ;;  %389 = vst [vmem:[#allocation2 + $0x8] sm:$0xff] (!%p268_p3), %v1212_v0 }
   0xe   : > { %s1355_s18 = smov (!%p334_p4, %s1202_s18), 3  ;;  %397 = sbr.rel (!%p390_p5) target bundleno = 21 (0x15), region = 40 }
   0xf   : > { %s1068_s22 = sshll.u32 %s1355_s18, 5  ;;  %s1069_s23 = sshll.u32 %s1355_s18, 8  ;;  %v1213_v1 = vmov (%p390_p5), 0.0  }
  0x10   : > { %s1265_s26 = scalar_lea.vmem %s1344_s0, %s1068_s22  ;;  %s1270_s29 = scalar_lea.vmem %s1345_s1, %s1069_s23  ;;  %398 = vst [vmem:[%s1348_s4] sm:$0x1] (%p390_p5), %v1213_v1  ;;  %399 = vst [vmem:[%s1349_s5] sm:$0x1] (%p390_p5), %v1213_v1 }
  0x11   : > { %s1070_s30 = sshll.u32 %s1355_s18, 3 }
  0x12   : > { %s1275_s8 = scalar_lea.vmem %s1347_s3, %s1070_s30 }
  0x15 PF: > { %v1150_v2 = vld [vmem:[%s1270_s29 + $0x40] sm:$0xff]   ;;  %v1154_v6 = vld [vmem:[%s1270_s29 + $0x48] sm:$0xff]   ;;  %v1158_v10 = vld [vmem:[%s1270_s29 + $0x50] sm:$0xff]  }
  0x16   : > { %v1151_v3 = vld [vmem:[%s1270_s29 + $0xc0] sm:$0xff]   ;;  %1080 = vmatprep.subr.bf16.mxu0 %v1150_v2  ;;  %v1155_v7 = vld [vmem:[%s1270_s29 + $0xc8] sm:$0xff]   ;;  %v1159_v11 = vld [vmem:[%s1270_s29 + $0xd0] sm:$0xff]  }
  0x17   : > { %v1152_v4 = vld [vmem:[%s1270_s29] sm:$0xff]   ;;  %1102 = vmatprep.subr.bf16.mxu1 %v1151_v3  ;;  %v1156_v8 = vld [vmem:[%s1270_s29 + $0x8] sm:$0xff]   ;;  %v1160_v12 = vld [vmem:[%s1270_s29 + $0x10] sm:$0xff]  }
  0x18   : > { %v1153_v5 = vld [vmem:[%s1270_s29 + $0x80] sm:$0xff]   ;;  %1081 = vmatpush3.bf16.msra.mxu0 %v1152_v4  ;;  %v1157_v9 = vld [vmem:[%s1270_s29 + $0x88] sm:$0xff]   ;;  %v1161_v13 = vld [vmem:[%s1270_s29 + $0x90] sm:$0xff]  }
  0x19   : > { %1103 = vmatpush3.bf16.msra.mxu1 %v1153_v5  ;;  %1082 = vmatprep.subr.bf16.mxu0 %v1154_v6  ;;  %v1162_v14 = vld [vmem:[%s1270_s29 + $0x58] sm:$0xff]   ;;  %v1166_v18 = vld [vmem:[%s1270_s29 + $0x60] sm:$0xff]   ;;  %v1170_v22 = vld [vmem:[%s1270_s29 + $0x68] sm:$0xff]  }
  0x1a   : > { %1104 = vmatprep.subr.bf16.mxu1 %v1155_v7  ;;  %v1163_v15 = vld [vmem:[%s1270_s29 + $0xd8] sm:$0xff]   ;;  %v1167_v19 = vld [vmem:[%s1270_s29 + $0xe0] sm:$0xff]   ;;  %v1171_v23 = vld [vmem:[%s1270_s29 + $0xe8] sm:$0xff]  }
  0x1b   : > { %v1164_v16 = vld [vmem:[%s1270_s29 + $0x18] sm:$0xff]   ;;  %v1168_v20 = vld [vmem:[%s1270_s29 + $0x20] sm:$0xff]   ;;  %v1172_v24 = vld [vmem:[%s1270_s29 + $0x28] sm:$0xff]  }
  0x1c   : > { %1083 = vmatpush3.bf16.msra.mxu0 %v1156_v8  ;;  %v1165_v17 = vld [vmem:[%s1270_s29 + $0x98] sm:$0xff]   ;;  %v1169_v21 = vld [vmem:[%s1270_s29 + $0xa0] sm:$0xff]   ;;  %v1173_v25 = vld [vmem:[%s1270_s29 + $0xa8] sm:$0xff]  }
  0x1d   : > { %1105 = vmatpush3.bf16.msra.mxu1 %v1157_v9  ;;  %1084 = vmatprep.subr.bf16.mxu0 %v1158_v10  ;;  %v1174_v26 = vld [vmem:[%s1270_s29 + $0x70] sm:$0xff]   ;;  %v1178_v30 = vld [vmem:[%s1270_s29 + $0x78] sm:$0xff]   ;;  %v400_v47 = vld [vmem:[#allocation2] sm:$0xff] }
  0x1e   : > { %1106 = vmatprep.subr.bf16.mxu1 %v1159_v11  ;;  %v1175_v27 = vld [vmem:[%s1270_s29 + $0xf0] sm:$0xff]   ;;  %v1179_v31 = vld [vmem:[%s1270_s29 + $0xf8] sm:$0xff]   ;;  %v1061_v52 = vld [vmem:[%s1346_s2] ss:$0 sm:$0xff] }
  0x1f   : > { %v1176_v28 = vld [vmem:[%s1270_s29 + $0x30] sm:$0xff]   ;;  %v1180_v32 = vld [vmem:[%s1270_s29 + $0x38] sm:$0xff]   ;;  %v401_v53 = vld [vmem:[#allocation2 + $0x8] sm:$0xff] }
  0x20   : > { %1085 = vmatpush3.bf16.msra.mxu0 %v1160_v12  ;;  %v1177_v29 = vld [vmem:[%s1270_s29 + $0xb0] sm:$0xff]   ;;  %v1181_v33 = vld [vmem:[%s1270_s29 + $0xb8] sm:$0xff]   ;;  %v793_v6 = vld [vmem:[%s1348_s4] sm:$0x1] }
  0x21   : > { %1107 = vmatpush3.bf16.msra.mxu1 %v1161_v13  ;;  %1086 = vmatprep.subr.bf16.mxu0 %v1162_v14  ;;  %v1182_v34 = vld [vmem:[%s1265_s26] ss:$16 sps:$4 sm:$0xff]   ;;  %v1184_v35 = vld [vmem:[%s1265_s26 + $0x4] ss:$16 sps:$4 sm:$0xff]   ;;  %v1185_v36 = vld [vmem:[%s1265_s26 + $0x8] ss:$16 sps:$4 sm:$0xff]  }
  0x22   : > { %1108 = vmatprep.subr.bf16.mxu1 %v1163_v15  ;;  %v1187_v37 = vld [vmem:[%s1265_s26 + $0xc] ss:$16 sps:$4 sm:$0xff]   ;;  %714 = vmatprep.mubr.bf16.mxu0 %v1184_v35  ;;  %v803_v9 = vld [vmem:[%s1349_s5] sm:$0x1] }
  0x23   : > { %755 = vmatprep.mubr.bf16.mxu1 %v1187_v37 }
  0x24   : > { %1087 = vmatpush3.bf16.msra.mxu0 %v1164_v16 }
  0x25   : > { %1109 = vmatpush3.bf16.msra.mxu1 %v1165_v17  ;;  %1088 = vmatprep.subr.bf16.mxu0 %v1166_v18 }
  0x26   : > { %1110 = vmatprep.subr.bf16.mxu1 %v1167_v19 }
  0x28   : > { %1089 = vmatpush3.bf16.msra.mxu0 %v1168_v20 }
  0x29   : > { %1111 = vmatpush3.bf16.msra.mxu1 %v1169_v21  ;;  %1090 = vmatprep.subr.bf16.mxu0 %v1170_v22 }
  0x2a   : > { %1112 = vmatprep.subr.bf16.mxu1 %v1171_v23 }
  0x2c   : > { %1091 = vmatpush3.bf16.msra.mxu0 %v1172_v24 }
  0x2d   : > { %1113 = vmatpush3.bf16.msra.mxu1 %v1173_v25  ;;  %1092 = vmatprep.subr.bf16.mxu0 %v1174_v26 }
  0x2e   : > { %1114 = vmatprep.subr.bf16.mxu1 %v1175_v27 }
  0x30   : > { %1093 = vmatpush3.bf16.msra.mxu0 %v1176_v28 }
  0x31   : > { %1115 = vmatpush3.bf16.msra.mxu1 %v1177_v29  ;;  %1094 = vmatprep.subr.bf16.mxu0 %v1178_v30 }
  0x32   : > { %1116 = vmatprep.subr.bf16.mxu1 %v1179_v31 }
  0x34   : > { %1095 = vmatpush3.bf16.msra.mxu0 %v1180_v32 }
  0x35   : > { %1117 = vmatpush3.bf16.msra.mxu1 %v1181_v33 }
  0x37   : > { %715 = vmatmul.mubr.bf16.vlgmr.msra.gmra.mrb[0].mxu0 %v1182_v34 }
  0x38   : > { %756 = vmatmul.mubr.bf16.vlgmr.msra.gmra.mrb[0].mxu1 %v1185_v36 }
 0x10a   : > { %v1096_v38 = vpop.f32.mrb[0].mxu0 }
 0x10b   : > { %v1118_v39 = vpop.f32.mrb[0].mxu1  ;;  %v1097_v40 = vpop.f32.mrb[1].mxu0 }
 0x10c   : > { %v1098_v41 = vadd.f32 %v1097_v40, %v1096_v38  ;;  %v1119_v42 = vpop.f32.mrb[1].mxu1  ;;  %v1099_v43 = vpop.f32.mrb[2].mxu0 }
 0x10d   : > { %v1120_v44 = vadd.f32 %v1119_v42, %v1118_v39  ;;  %v1121_v45 = vpop.f32.mrb[2].mxu1  ;;  %v1100_v46 = vpop.f32.mrb[3].mxu0 }
 0x10e   : > { %v1101_v48 = vadd.f32 %v1100_v46, %v1099_v43  ;;  %v1122_v49 = vpop.f32.mrb[3].mxu1 }
 0x10f   : > { %v758_v50 = vadd.f32 %v1120_v44, %v1098_v41  ;;  %v1123_v51 = vadd.f32 %v1122_v49, %v1121_v45 }
 0x111   : > { %v764_v54 = vadd.f32 %v758_v50, %v400_v47  ;;  %v761_v55 = vadd.f32 %v1123_v51, %v1101_v48 }
 0x113   : > { %766 = vst [vmem:[#allocation2] sm:$0xff] %v764_v54  ;;  %v780_v56 = vadd.f32 %v1061_v52, %v764_v54  ;;  %v765_v57 = vadd.f32 %v761_v55, %v401_v53 }
 0x115   : > { %v795_v58 = vrot.slane %v780_v56, 4  ;;  %v804_v59 = vmul.f32 %v780_v56, %v780_v56  ;;  %767 = vst [vmem:[#allocation2 + $0x8] sm:$0xff] %v765_v57  ;;  %v781_v60 = vadd.f32 %v1061_v52, %v765_v57 }
 0x117   : > { %v796_v61 = vadd.f32 %v795_v58, %v780_v56  ;;  %v807_v62 = vrot.slane %v804_v59, 4  ;;  %v1078_v63 = vpack.c.bf16 %v781_v60, %v780_v56 }
 0x119   : > { %v797_v0 = vrot.slane %v796_v61, 2  ;;  %v808_v1 = vadd.f32 %v807_v62, %v804_v59  ;;  %1079 = vst [vmem:[%s1275_s8] sm:$0xff] %v1078_v63  }
 0x11b   : > { %v798_v2 = vadd.f32 %v797_v0, %v796_v61  ;;  %v809_v3 = vrot.slane %v808_v1, 2 }
 0x11d   : > { %v799_v4 = vrot.slane %v798_v2, 1  ;;  %v810_v5 = vadd.f32 %v809_v3, %v808_v1 }
 0x11f   : > { %v800_v7 = vadd.f32 %v799_v4, %v798_v2  ;;  %v811_v8 = vrot.slane %v810_v5, 1 }
 0x121   : > { %v801_v10 = vadd.f32 %v800_v7, %v793_v6  ;;  %v812_v11 = vadd.f32 %v811_v8, %v810_v5 }
 0x123   : > { %802 = vst [vmem:[%s1348_s4] sm:$0x1] %v801_v10  ;;  %v813_v12 = vadd.f32 %v812_v11, %v803_v9 }
 0x125   : > { %814 = vst [vmem:[%s1349_s5] sm:$0x1] %v813_v12 }
 0x126 PF: > { %s16_s20 = sadd.s32 1, %s1210_s20   ;;  %s1350_s18 = smov %s1206_s19 }
 0x127   : > { %p13_p6 = scmp.ge.s32.totalorder %s16_s20, 6   ;;  %s1351_s19 = smov %s1353_s21 }
 0x129   :  { %15 = sbr.rel (!%p13_p6) target bundleno = 2 (0x2), region = 104 }

// kernel: _lambda_.30
= control target key start
LH: loop header
LB: loop body
LE: loop exit
PB: predicated region body
PF: predicated region fallthrough
CT: control target
= control target key end

     0   :  { %s357_s12 = smov 0   ;;  %s380_s0 = inlined_call_operand.vmem [shape: bf16[128,128], index: 0, kind: input, shape index: {}]   ;;  %s381_s1 = inlined_call_operand.vmem [shape: f32[1,128], index: 1, kind: input, shape index: {}]   ;;  %s382_s2 = inlined_call_operand.vmem [shape: f32[1,128], index: 2, kind: input, shape index: {}]   ;;  %s383_s3 = inlined_call_operand.vmem [shape: bf16[128,128], index: 3, kind: output, shape index: {}]  }
   0x1 LB: > { %s280_s13 = sadd.s32 4294967295, %s335_s12   ;;  %p284_p0 = scmp.ge.s32.totalorder %s335_s12, 1  ;;  %s335_s12 = sphi %s357_s12, %s13_s12  }
   0x2   : > { %p138_p1 = scmp.lt.s32.totalorder %s335_s12, 5 }
   0x4   : > { %p139_p2 = pnand %p284_p0, %p138_p1 }
   0x5   : > { %s285_s14 = sshll.u32 (!%p139_p2), %s280_s13, 2  ;;  %v289_v2 = vld [vmem:[%s381_s1] ss:$0 sm:$0xff] (!%p139_p2) }
   0x6   : > { %142 = sbr.rel (%p139_p2) target bundleno = 26 (0x1a), region = 32  ;;  %p163_p3 = scmp.lt.s32.totalorder (!%p139_p2), %s285_s14, 15  ;;  %v290_v7 = vld [vmem:[%s382_s2] ss:$0 sm:$0xff] (!%p139_p2) }
   0xd   : > { %s385_s14 = smov (!%p163_p3, %s285_s14), 15 }
   0xe   : > { %s286_s15 = sshll.u32 %s385_s14, 2 }
   0xf   : > { %s166_s18 = scalar_lea.vmem %s380_s0, %s286_s15  ;;  %s172_s25 = scalar_lea.vmem %s383_s3, %s286_s15 }
  0x10   : > { %v302_v0 = vld [vmem:[%s166_s18] sm:$0xff]   ;;  %v319_v1 = vld [vmem:[%s166_s18 + $0x8] sm:$0xff]  }
  0x11   : > { %v303_v3 = vunpack.c.l.bf16 %v302_v0  ;;  %v304_v4 = vunpack.c.h.bf16 %v302_v0  ;;  %v307_v5 = vunpack.c.l.bf16 %v319_v1  ;;  %v308_v6 = vunpack.c.h.bf16 %v319_v1 }
  0x13   : > { %v189_v8 = vmul.f32 %v303_v3, %v289_v2  ;;  %v190_v9 = vmul.f32 %v304_v4, %v289_v2  ;;  %v191_v10 = vmul.f32 %v307_v5, %v289_v2  ;;  %v192_v11 = vmul.f32 %v308_v6, %v289_v2 }
  0x15   : > { %v200_v12 = vadd.f32 %v290_v7, %v189_v8  ;;  %v201_v13 = vadd.f32 %v290_v7, %v190_v9  ;;  %v202_v14 = vadd.f32 %v290_v7, %v191_v10  ;;  %v203_v15 = vadd.f32 %v290_v7, %v192_v11 }
  0x17   : > { %v312_v16 = vpack.c.bf16 %v201_v13, %v200_v12  ;;  %v317_v17 = vpack.c.bf16 %v203_v15, %v202_v14 }
  0x19   : > { %313 = vst [vmem:[%s172_s25] sm:$0xff] %v312_v16   ;;  %320 = vst [vmem:[%s172_s25 + $0x8] sm:$0xff] %v317_v17  }
  0x1a PF: > { %s13_s12 = sadd.s32 1, %s335_s12  }
  0x1b   : > { %p10_p4 = scmp.ge.s32.totalorder %s13_s12, 6  }
  0x1d   :  { %12 = sbr.rel (!%p10_p4) target bundleno = 1 (0x1), region = 62 }

// kernel: _lambda_.29
= control target key start
LH: loop header
LB: loop body
LE: loop exit
PB: predicated region body
PF: predicated region fallthrough
CT: control target
= control target key end

     0   :  { %s1097_s18 = smov 0   ;;  %s1099_s19 = smov 0   ;;  %s1182_s0 = inlined_call_operand.vmem [shape: bf16[4,32,256], index: 0, kind: input, shape index: {}]   ;;  %s1183_s1 = inlined_call_operand.vmem [shape: bf16[4,256,128], index: 1, kind: input, shape index: {}]   ;;  %s1184_s2 = inlined_call_operand.vmem [shape: f32[1,128], index: 2, kind: input, shape index: {}]   ;;  %s1185_s3 = inlined_call_operand.vmem [shape: bf16[4,32,128], index: 3, kind: output, shape index: {0}]   ;;  %s1186_s4 = inlined_call_operand.vmem [shape: f32[1,128], index: 4, kind: output, shape index: {1}]   ;;  %s1187_s5 = inlined_call_operand.vmem [shape: f32[1,128], index: 5, kind: output, shape index: {2}]  }
   0x1   :  { %s1101_s20 = smov 0  }
   0x2 LB: > { %s38_s21 = sadd.s32 1, %s1059_s19  ;;  %p891_p0 = scmp.ge.s32.totalorder %s1063_s20, 1  ;;  %s1063_s20 = sphi %s1101_s20, %s16_s20   ;;  %s1059_s19 = sphi %s1099_s19, %s1189_s19   ;;  %s1055_s18 = sphi %s1097_s18, %s1188_s18  }
   0x3   : > { %p40_p1 = scmp.ge.s32.totalorder %s38_s21, 4  ;;  %p267_p2 = scmp.lt.s32.totalorder %s1063_s20, 5 }
   0x5   : > { %s1191_s21 = smov (%p40_p1, %s38_s21), 0  ;;  %p268_p3 = pnand %p891_p0, %p267_p2 }
   0x6   : > { %p334_p4 = scmp.lt.s32.totalorder (!%p268_p3), %s1055_s18, 3  ;;  %p392_p5 = scmp.eq.s32.totalorder (!%p268_p3), %s1055_s18, 0  ;;  %v1065_v0 = vmov (!%p268_p3), 0.0  }
   0x7   : > { %271 = sbr.rel (%p268_p3) target bundleno = 298 (0x12a), region = 32  ;;  %388 = vst [vmem:[#allocation2] sm:$0xff] (!%p268_p3), %v1065_v0  ;;  %389 = vst [vmem:[#allocation2 + $0x8] sm:$0xff] (!%p268_p3), %v1065_v0 }
   0x8   : > { %390 = vst [vmem:[#allocation2 + $0x10] sm:$0xff] (!%p268_p3), %v1065_v0  ;;  %391 = vst [vmem:[#allocation2 + $0x18] sm:$0xff] (!%p268_p3), %v1065_v0 }
   0xe   : > { %s1193_s18 = smov (!%p334_p4, %s1055_s18), 3  ;;  %399 = sbr.rel (!%p392_p5) target bundleno = 21 (0x15), region = 40 }
   0xf   : > { %s929_s22 = sshll.u32 %s1193_s18, 5  ;;  %s930_s23 = sshll.u32 %s1193_s18, 7  ;;  %v1066_v1 = vmov (%p392_p5), 0.0  }
  0x10   : > { %s1118_s26 = scalar_lea.vmem %s1182_s0, %s929_s22  ;;  %s1123_s29 = scalar_lea.vmem %s1183_s1, %s930_s23  ;;  %400 = vst [vmem:[%s1186_s4] sm:$0x1] (%p392_p5), %v1066_v1  ;;  %401 = vst [vmem:[%s1187_s5] sm:$0x1] (%p392_p5), %v1066_v1 }
  0x11   : > { %s931_s30 = sshll.u32 %s1193_s18, 4 }
  0x12   : > { %s1128_s8 = scalar_lea.vmem %s1185_s3, %s931_s30 }
  0x15 PF: > { %v1019_v2 = vld [vmem:[%s1123_s29 + $0x40] sm:$0xff]   ;;  %v1021_v4 = vld [vmem:[%s1123_s29 + $0x48] sm:$0xff]   ;;  %v1023_v6 = vld [vmem:[%s1123_s29 + $0x50] sm:$0xff]  }
  0x16   : > { %v1020_v3 = vld [vmem:[%s1123_s29] sm:$0xff]   ;;  %949 = vmatprep.subr.bf16.mxu0 %v1019_v2  ;;  %977 = vmatprep.subr.bf16.mxu1 %v1019_v2  ;;  %v1022_v5 = vld [vmem:[%s1123_s29 + $0x8] sm:$0xff]   ;;  %v1024_v7 = vld [vmem:[%s1123_s29 + $0x10] sm:$0xff]  }
  0x17   : > { %950 = vmatpush3.bf16.msra.mxu0 %v1020_v3  ;;  %985 = vmatpush3.bf16.msra.mxu1 %v1020_v3  ;;  %v1025_v8 = vld [vmem:[%s1123_s29 + $0x58] sm:$0xff]   ;;  %v1027_v10 = vld [vmem:[%s1123_s29 + $0x60] sm:$0xff]   ;;  %v1029_v12 = vld [vmem:[%s1123_s29 + $0x68] sm:$0xff]  }
  0x18   : > { %951 = vmatprep.subr.bf16.mxu0 %v1021_v4  ;;  %978 = vmatprep.subr.bf16.mxu1 %v1021_v4  ;;  %v1026_v9 = vld [vmem:[%s1123_s29 + $0x18] sm:$0xff]   ;;  %v1028_v11 = vld [vmem:[%s1123_s29 + $0x20] sm:$0xff]   ;;  %v1030_v15 = vld [vmem:[%s1123_s29 + $0x28] sm:$0xff]  }
  0x19   : > { %v1037_v13 = vld [vmem:[%s1118_s26 + $0x4] ss:$8 sps:$4 sm:$0xff]   ;;  %v1040_v14 = vld [vmem:[%s1118_s26 + $0x14] ss:$8 sps:$4 sm:$0xff]   ;;  %v1035_v20 = vld [vmem:[%s1118_s26] ss:$8 sps:$4 sm:$0xff]  }
  0x1a   : > { %v1031_v16 = vld [vmem:[%s1123_s29 + $0x70] sm:$0xff]   ;;  %590 = vmatprep.mubr.bf16.mxu0 %v1037_v13  ;;  %598 = vmatprep.mubr.bf16.mxu1 %v1040_v14  ;;  %v1033_v18 = vld [vmem:[%s1123_s29 + $0x78] sm:$0xff]   ;;  %v402_v24 = vld [vmem:[#allocation2] sm:$0xff] }
  0x1b   : > { %952 = vmatpush3.bf16.msra.mxu0 %v1022_v5  ;;  %986 = vmatpush3.bf16.msra.mxu1 %v1022_v5  ;;  %v1032_v17 = vld [vmem:[%s1123_s29 + $0x30] sm:$0xff]   ;;  %v1034_v19 = vld [vmem:[%s1123_s29 + $0x38] sm:$0xff]   ;;  %v920_v32 = vld [vmem:[%s1184_s2] ss:$0 sm:$0xff] }
  0x1c   : > { %953 = vmatprep.subr.bf16.mxu0 %v1023_v6  ;;  %979 = vmatprep.subr.bf16.mxu1 %v1023_v6  ;;  %v1038_v21 = vld [vmem:[%s1118_s26 + $0x10] ss:$8 sps:$4 sm:$0xff]   ;;  %v403_v33 = vld [vmem:[#allocation2 + $0x8] sm:$0xff]  ;;  %v652_v4 = vld [vmem:[%s1186_s4] sm:$0x1] }
  0x1d   : > { %v404_v26 = vld [vmem:[#allocation2 + $0x10] sm:$0xff]  ;;  %v405_v35 = vld [vmem:[#allocation2 + $0x18] sm:$0xff] }
  0x1f   : > { %954 = vmatpush3.bf16.msra.mxu0 %v1024_v7  ;;  %987 = vmatpush3.bf16.msra.mxu1 %v1024_v7  ;;  %v664_v7 = vld [vmem:[%s1187_s5] sm:$0x1] }
  0x20   : > { %955 = vmatprep.subr.bf16.mxu0 %v1025_v8  ;;  %980 = vmatprep.subr.bf16.mxu1 %v1025_v8 }
  0x23   : > { %956 = vmatpush3.bf16.msra.mxu0 %v1026_v9  ;;  %988 = vmatpush3.bf16.msra.mxu1 %v1026_v9 }
  0x24   : > { %957 = vmatprep.subr.bf16.mxu0 %v1027_v10  ;;  %981 = vmatprep.subr.bf16.mxu1 %v1027_v10 }
  0x27   : > { %958 = vmatpush3.bf16.msra.mxu0 %v1028_v11  ;;  %989 = vmatpush3.bf16.msra.mxu1 %v1028_v11 }
  0x28   : > { %959 = vmatprep.subr.bf16.mxu0 %v1029_v12  ;;  %982 = vmatprep.subr.bf16.mxu1 %v1029_v12 }
  0x2b   : > { %960 = vmatpush3.bf16.msra.mxu0 %v1030_v15  ;;  %990 = vmatpush3.bf16.msra.mxu1 %v1030_v15 }
  0x2c   : > { %961 = vmatprep.subr.bf16.mxu0 %v1031_v16  ;;  %983 = vmatprep.subr.bf16.mxu1 %v1031_v16 }
  0x2f   : > { %962 = vmatpush3.bf16.msra.mxu0 %v1032_v17  ;;  %991 = vmatpush3.bf16.msra.mxu1 %v1032_v17 }
  0x30   : > { %963 = vmatprep.subr.bf16.mxu0 %v1033_v18  ;;  %984 = vmatprep.subr.bf16.mxu1 %v1033_v18 }
  0x33   : > { %964 = vmatpush3.bf16.msra.mxu0 %v1034_v19  ;;  %992 = vmatpush3.bf16.msra.mxu1 %v1034_v19 }
  0x36   : > { %591 = vmatmul.mubr.bf16.vlgmr.msra.gmra.mrb[0].mxu0 %v1035_v20  ;;  %599 = vmatmul.mubr.bf16.vlgmr.msra.gmra.mrb[0].mxu1 %v1038_v21 }
 0x109   : > { %v965_v22 = vpop.f32.mrb[0].mxu0  ;;  %v971_v23 = vpop.f32.mrb[0].mxu1 }
 0x10a   : > { %v966_v25 = vpop.f32.mrb[1].mxu0  ;;  %v972_v27 = vpop.f32.mrb[1].mxu1 }
 0x10b   : > { %v967_v28 = vadd.f32 %v966_v25, %v965_v22  ;;  %v968_v29 = vpop.f32.mrb[2].mxu0  ;;  %v973_v30 = vadd.f32 %v972_v27, %v971_v23  ;;  %v974_v31 = vpop.f32.mrb[2].mxu1 }
 0x10c   : > { %v969_v34 = vpop.f32.mrb[3].mxu0  ;;  %v975_v36 = vpop.f32.mrb[3].mxu1 }
 0x10d   : > { %v607_v37 = vadd.f32 %v967_v28, %v402_v24  ;;  %v609_v38 = vadd.f32 %v973_v30, %v404_v26  ;;  %v970_v39 = vadd.f32 %v969_v34, %v968_v29  ;;  %v976_v40 = vadd.f32 %v975_v36, %v974_v31 }
 0x10f   : > { %611 = vst [vmem:[#allocation2] sm:$0xff] %v607_v37  ;;  %v629_v41 = vadd.f32 %v920_v32, %v607_v37  ;;  %613 = vst [vmem:[#allocation2 + $0x10] sm:$0xff] %v609_v38  ;;  %v631_v42 = vadd.f32 %v920_v32, %v609_v38  ;;  %v608_v43 = vadd.f32 %v970_v39, %v403_v33 }
 0x110   : > { %v610_v44 = vadd.f32 %v976_v40, %v405_v35 }
 0x111   : > { %612 = vst [vmem:[#allocation2 + $0x8] sm:$0xff] %v608_v43  ;;  %v630_v45 = vadd.f32 %v920_v32, %v608_v43  ;;  %v665_v47 = vmul.f32 %v629_v41, %v629_v41  ;;  %v667_v48 = vmul.f32 %v631_v42, %v631_v42 }
 0x112   : > { %614 = vst [vmem:[#allocation2 + $0x18] sm:$0xff] %v610_v44  ;;  %v632_v46 = vadd.f32 %v920_v32, %v610_v44 }
 0x113   : > { %v653_v49 = vadd.f32 %v630_v45, %v629_v41  ;;  %v666_v50 = vmul.f32 %v630_v45, %v630_v45  ;;  %v941_v51 = vpack.c.bf16 %v630_v45, %v629_v41 }
 0x114   : > { %v946_v52 = vpack.c.bf16 %v632_v46, %v631_v42  ;;  %v668_v56 = vmul.f32 %v632_v46, %v632_v46 }
 0x115   : > { %v669_v53 = vadd.f32 %v666_v50, %v665_v47  ;;  %942 = vst [vmem:[%s1128_s8] sm:$0xff] %v941_v51   ;;  %v654_v54 = vadd.f32 %v653_v49, %v631_v42 }
 0x116   : > { %948 = vst [vmem:[%s1128_s8 + $0x8] sm:$0xff] %v946_v52  }
 0x117   : > { %v655_v55 = vadd.f32 %v654_v54, %v632_v46  ;;  %v670_v57 = vadd.f32 %v669_v53, %v667_v48 }
 0x119   : > { %v656_v58 = vrot.slane %v655_v55, 4  ;;  %v671_v59 = vadd.f32 %v670_v57, %v668_v56 }
 0x11b   : > { %v657_v60 = vadd.f32 %v656_v58, %v655_v55  ;;  %v672_v61 = vrot.slane %v671_v59, 4 }
 0x11d   : > { %v658_v62 = vrot.slane %v657_v60, 2  ;;  %v673_v63 = vadd.f32 %v672_v61, %v671_v59 }
 0x11f   : > { %v659_v0 = vadd.f32 %v658_v62, %v657_v60  ;;  %v674_v1 = vrot.slane %v673_v63, 2 }
 0x121   : > { %v660_v2 = vrot.slane %v659_v0, 1  ;;  %v675_v3 = vadd.f32 %v674_v1, %v673_v63 }
 0x123   : > { %v661_v5 = vadd.f32 %v660_v2, %v659_v0  ;;  %v676_v6 = vrot.slane %v675_v3, 1 }
 0x125   : > { %v662_v8 = vadd.f32 %v661_v5, %v652_v4  ;;  %v677_v9 = vadd.f32 %v676_v6, %v675_v3 }
 0x127   : > { %663 = vst [vmem:[%s1186_s4] sm:$0x1] %v662_v8  ;;  %v678_v10 = vadd.f32 %v677_v9, %v664_v7 }
 0x129   : > { %679 = vst [vmem:[%s1187_s5] sm:$0x1] %v678_v10 }
 0x12a PF: > { %s16_s20 = sadd.s32 1, %s1063_s20   ;;  %s1188_s18 = smov %s1059_s19 }
 0x12b   : > { %p13_p6 = scmp.ge.s32.totalorder %s16_s20, 6   ;;  %s1189_s19 = smov %s1191_s21 }
 0x12d   :  { %15 = sbr.rel (!%p13_p6) target bundleno = 2 (0x2), region = 104 }

// kernel: _lambda_.32
= control target key start
LH: loop header
LB: loop body
LE: loop exit
PB: predicated region body
PF: predicated region fallthrough
CT: control target
= control target key end

     0   :  { %s555_s12 = smov 0   ;;  %s605_s0 = inlined_call_operand.vmem [shape: bf16[512,128], index: 0, kind: input, shape index: {}]   ;;  %s606_s1 = inlined_call_operand.vmem [shape: f32[1,128], index: 1, kind: input, shape index: {}]   ;;  %s607_s2 = inlined_call_operand.vmem [shape: f32[1,128], index: 2, kind: input, shape index: {}]   ;;  %s608_s3 = inlined_call_operand.vmem [shape: bf16[512,128], index: 3, kind: output, shape index: {}]  }
   0x1 LB: > { %s388_s13 = sadd.s32 4294967295, %s533_s12   ;;  %p392_p0 = scmp.ge.s32.totalorder %s533_s12, 1  ;;  %s533_s12 = sphi %s555_s12, %s13_s12  }
   0x2   : > { %p138_p1 = scmp.lt.s32.totalorder %s533_s12, 5 }
   0x4   : > { %p139_p2 = pnand %p392_p0, %p138_p1 }
   0x5   : > { %s393_s14 = sshll.u32 (!%p139_p2), %s388_s13, 4  ;;  %v397_v0 = vld [vmem:[%s606_s1] ss:$0 sm:$0xff] (!%p139_p2) }
   0x6   : > { %142 = sbr.rel (%p139_p2) target bundleno = 35 (0x23), region = 32  ;;  %p163_p3 = scmp.lt.s32.totalorder (!%p139_p2), %s393_s14, 63  ;;  %v398_v9 = vld [vmem:[%s607_s2] ss:$0 sm:$0xff] (!%p139_p2) }
   0xd   : > { %s610_s14 = smov (!%p163_p3, %s393_s14), 63 }
   0xe   : > { %s394_s15 = sshll.u32 %s610_s14, 2 }
   0xf   : > { %s571_s18 = scalar_lea.vmem %s605_s0, %s394_s15  ;;  %s590_s25 = scalar_lea.vmem %s608_s3, %s394_s15 }
  0x10   : > { %v434_v1 = vld [vmem:[%s571_s18] sm:$0xff]   ;;  %v505_v2 = vld [vmem:[%s571_s18 + $0x8] sm:$0xff]   ;;  %v506_v3 = vld [vmem:[%s571_s18 + $0x10] sm:$0xff]  }
  0x11   : > { %v435_v4 = vunpack.c.l.bf16 %v434_v1  ;;  %v436_v5 = vunpack.c.h.bf16 %v434_v1  ;;  %v439_v6 = vunpack.c.l.bf16 %v505_v2  ;;  %v440_v7 = vunpack.c.h.bf16 %v505_v2  ;;  %v507_v8 = vld [vmem:[%s571_s18 + $0x18] sm:$0xff]   ;;  %v508_v22 = vld [vmem:[%s571_s18 + $0x20] sm:$0xff]   ;;  %v509_v27 = vld [vmem:[%s571_s18 + $0x28] sm:$0xff]  }
  0x12   : > { %v443_v10 = vunpack.c.l.bf16 %v506_v3  ;;  %v444_v11 = vunpack.c.h.bf16 %v506_v3  ;;  %v447_v12 = vunpack.c.l.bf16 %v507_v8  ;;  %v448_v13 = vunpack.c.h.bf16 %v507_v8  ;;  %v510_v32 = vld [vmem:[%s571_s18 + $0x30] sm:$0xff]   ;;  %v511_v37 = vld [vmem:[%s571_s18 + $0x38] sm:$0xff]  }
  0x13   : > { %v213_v14 = vmul.f32 %v435_v4, %v397_v0  ;;  %v214_v15 = vmul.f32 %v436_v5, %v397_v0  ;;  %v215_v16 = vmul.f32 %v439_v6, %v397_v0  ;;  %v216_v17 = vmul.f32 %v440_v7, %v397_v0 }
  0x14   : > { %v217_v18 = vmul.f32 %v443_v10, %v397_v0  ;;  %v218_v19 = vmul.f32 %v444_v11, %v397_v0  ;;  %v219_v20 = vmul.f32 %v447_v12, %v397_v0  ;;  %v220_v21 = vmul.f32 %v448_v13, %v397_v0 }
  0x15   : > { %v236_v23 = vadd.f32 %v398_v9, %v213_v14  ;;  %v237_v24 = vadd.f32 %v398_v9, %v214_v15  ;;  %v238_v25 = vadd.f32 %v398_v9, %v215_v16  ;;  %v239_v26 = vadd.f32 %v398_v9, %v216_v17 }
  0x16   : > { %v240_v28 = vadd.f32 %v398_v9, %v217_v18  ;;  %v241_v29 = vadd.f32 %v398_v9, %v218_v19  ;;  %v242_v30 = vadd.f32 %v398_v9, %v219_v20  ;;  %v243_v31 = vadd.f32 %v398_v9, %v220_v21 }
  0x17   : > { %v468_v33 = vpack.c.bf16 %v237_v24, %v236_v23  ;;  %v473_v34 = vpack.c.bf16 %v239_v26, %v238_v25  ;;  %v451_v35 = vunpack.c.l.bf16 %v508_v22  ;;  %v452_v36 = vunpack.c.h.bf16 %v508_v22 }
  0x18   : > { %v478_v38 = vpack.c.bf16 %v241_v29, %v240_v28  ;;  %v483_v39 = vpack.c.bf16 %v243_v31, %v242_v30  ;;  %v455_v40 = vunpack.c.l.bf16 %v509_v27  ;;  %v456_v41 = vunpack.c.h.bf16 %v509_v27 }
  0x19   : > { %469 = vst [vmem:[%s590_s25] sm:$0xff] %v468_v33   ;;  %512 = vst [vmem:[%s590_s25 + $0x8] sm:$0xff] %v473_v34   ;;  %v221_v42 = vmul.f32 %v451_v35, %v397_v0  ;;  %v222_v43 = vmul.f32 %v452_v36, %v397_v0  ;;  %v459_v44 = vunpack.c.l.bf16 %v510_v32  ;;  %v460_v45 = vunpack.c.h.bf16 %v510_v32 }
  0x1a   : > { %513 = vst [vmem:[%s590_s25 + $0x10] sm:$0xff] %v478_v38   ;;  %514 = vst [vmem:[%s590_s25 + $0x18] sm:$0xff] %v483_v39   ;;  %v223_v46 = vmul.f32 %v455_v40, %v397_v0  ;;  %v224_v47 = vmul.f32 %v456_v41, %v397_v0  ;;  %v463_v48 = vunpack.c.l.bf16 %v511_v37  ;;  %v464_v49 = vunpack.c.h.bf16 %v511_v37 }
  0x1b   : > { %v244_v50 = vadd.f32 %v398_v9, %v221_v42  ;;  %v245_v51 = vadd.f32 %v398_v9, %v222_v43  ;;  %v225_v52 = vmul.f32 %v459_v44, %v397_v0  ;;  %v226_v53 = vmul.f32 %v460_v45, %v397_v0 }
  0x1c   : > { %v246_v54 = vadd.f32 %v398_v9, %v223_v46  ;;  %v247_v55 = vadd.f32 %v398_v9, %v224_v47  ;;  %v227_v56 = vmul.f32 %v463_v48, %v397_v0  ;;  %v228_v57 = vmul.f32 %v464_v49, %v397_v0 }
  0x1d   : > { %v488_v58 = vpack.c.bf16 %v245_v51, %v244_v50  ;;  %v248_v59 = vadd.f32 %v398_v9, %v225_v52  ;;  %v249_v60 = vadd.f32 %v398_v9, %v226_v53 }
  0x1e   : > { %v493_v61 = vpack.c.bf16 %v247_v55, %v246_v54  ;;  %v250_v62 = vadd.f32 %v398_v9, %v227_v56  ;;  %v251_v63 = vadd.f32 %v398_v9, %v228_v57 }
  0x1f   : > { %515 = vst [vmem:[%s590_s25 + $0x20] sm:$0xff] %v488_v58   ;;  %v498_v1 = vpack.c.bf16 %v249_v60, %v248_v59 }
  0x20   : > { %516 = vst [vmem:[%s590_s25 + $0x28] sm:$0xff] %v493_v61   ;;  %v503_v2 = vpack.c.bf16 %v251_v63, %v250_v62 }
  0x21   : > { %517 = vst [vmem:[%s590_s25 + $0x30] sm:$0xff] %v498_v1  }
  0x22   : > { %518 = vst [vmem:[%s590_s25 + $0x38] sm:$0xff] %v503_v2  }
  0x23 PF: > { %s13_s12 = sadd.s32 1, %s533_s12  }
  0x24   : > { %p10_p4 = scmp.ge.s32.totalorder %s13_s12, 6  }
  0x26   :  { %12 = sbr.rel (!%p10_p4) target bundleno = 1 (0x1), region = 62 }

// kernel: _lambda_.31
= control target key start
LH: loop header
LB: loop body
LE: loop exit
PB: predicated region body
PF: predicated region fallthrough
CT: control target
= control target key end

     0   :  { %s1396_s18 = smov 0   ;;  %s1398_s19 = smov 0   ;;  %s1534_s0 = inlined_call_operand.vmem [shape: bf16[4,128,128], index: 0, kind: input, shape index: {}]   ;;  %s1535_s1 = inlined_call_operand.vmem [shape: bf16[4,128,128], index: 1, kind: input, shape index: {}]   ;;  %s1536_s2 = inlined_call_operand.vmem [shape: f32[1,128], index: 2, kind: input, shape index: {}]   ;;  %s1537_s3 = inlined_call_operand.vmem [shape: bf16[4,128,128], index: 3, kind: output, shape index: {0}]   ;;  %s1538_s4 = inlined_call_operand.vmem [shape: f32[1,128], index: 4, kind: output, shape index: {1}]   ;;  %s1539_s5 = inlined_call_operand.vmem [shape: f32[1,128], index: 5, kind: output, shape index: {2}]  }
   0x1   :  { %s1400_s20 = smov 0  }
   0x2 LB: > { %s38_s21 = sadd.s32 1, %s1358_s19  ;;  %p1120_p0 = scmp.ge.s32.totalorder %s1362_s20, 1  ;;  %s1362_s20 = sphi %s1400_s20, %s16_s20   ;;  %s1358_s19 = sphi %s1398_s19, %s1541_s19   ;;  %s1354_s18 = sphi %s1396_s18, %s1540_s18  }
   0x3   : > { %p40_p1 = scmp.ge.s32.totalorder %s38_s21, 4  ;;  %p264_p2 = scmp.lt.s32.totalorder %s1362_s20, 5 }
   0x5   : > { %s1543_s21 = smov (%p40_p1, %s38_s21), 0  ;;  %p265_p3 = pnand %p1120_p0, %p264_p2 }
   0x6   : > { %p328_p4 = scmp.lt.s32.totalorder (!%p265_p3), %s1354_s18, 3  ;;  %p396_p5 = scmp.eq.s32.totalorder (!%p265_p3), %s1354_s18, 0  ;;  %v1364_v0 = vmov (!%p265_p3), 0.0  }
   0x7   : > { %268 = sbr.rel (%p265_p3) target bundleno = 322 (0x142), region = 32  ;;  %380 = vst [vmem:[#allocation2] sm:$0xff] (!%p265_p3), %v1364_v0  ;;  %381 = vst [vmem:[#allocation2 + $0x8] sm:$0xff] (!%p265_p3), %v1364_v0 }
   0x8   : > { %382 = vst [vmem:[#allocation2 + $0x10] sm:$0xff] (!%p265_p3), %v1364_v0  ;;  %383 = vst [vmem:[#allocation2 + $0x18] sm:$0xff] (!%p265_p3), %v1364_v0 }
   0x9   : > { %384 = vst [vmem:[#allocation2 + $0x20] sm:$0xff] (!%p265_p3), %v1364_v0  ;;  %385 = vst [vmem:[#allocation2 + $0x28] sm:$0xff] (!%p265_p3), %v1364_v0 }
   0xa   : > { %386 = vst [vmem:[#allocation2 + $0x30] sm:$0xff] (!%p265_p3), %v1364_v0  ;;  %387 = vst [vmem:[#allocation2 + $0x38] sm:$0xff] (!%p265_p3), %v1364_v0 }
   0xb   : > { %388 = vst [vmem:[#allocation2 + $0x40] sm:$0xff] (!%p265_p3), %v1364_v0  ;;  %389 = vst [vmem:[#allocation2 + $0x48] sm:$0xff] (!%p265_p3), %v1364_v0 }
   0xc   : > { %390 = vst [vmem:[#allocation2 + $0x50] sm:$0xff] (!%p265_p3), %v1364_v0  ;;  %391 = vst [vmem:[#allocation2 + $0x58] sm:$0xff] (!%p265_p3), %v1364_v0 }
   0xd   : > { %392 = vst [vmem:[#allocation2 + $0x60] sm:$0xff] (!%p265_p3), %v1364_v0  ;;  %393 = vst [vmem:[#allocation2 + $0x68] sm:$0xff] (!%p265_p3), %v1364_v0 }
   0xe   : > { %394 = vst [vmem:[#allocation2 + $0x70] sm:$0xff] %v1364_v0  ;;  %395 = vst [vmem:[#allocation2 + $0x78] sm:$0xff] %v1364_v0  ;;  %s329_s22 = scalar_select %p328_p4, %s1354_s18, 3 }
   0xf   : > { %403 = sbr.rel (!%p396_p5) target bundleno = 22 (0x16), region = 40  ;;  %v1365_v1 = vmov (%p396_p5), 0.0  }
  0x10   : > { %s1166_s23 = sshll.u32 %s329_s22, 6  ;;  %404 = vst [vmem:[%s1538_s4] sm:$0x1] (%p396_p5), %v1365_v1  ;;  %405 = vst [vmem:[%s1539_s5] sm:$0x1] (%p396_p5), %v1365_v1 }
  0x11   : > { %s1424_s26 = scalar_lea.vmem %s1534_s0, %s1166_s23  ;;  %s1429_s29 = scalar_lea.vmem %s1535_s1, %s1166_s23 }
  0x12   : > { %s1434_s7 = scalar_lea.vmem %s1537_s3, %s1166_s23 }
  0x16 PF: > { %v1324_v2 = vld [vmem:[%s1429_s29] sm:$0xff]   ;;  %v1325_v3 = vld [vmem:[%s1429_s29 + $0x8] sm:$0xff]   ;;  %v1326_v4 = vld [vmem:[%s1429_s29 + $0x10] sm:$0xff]  }
  0x17   : > { %1250 = vmatprep.subr.bf16.mxu0 %v1324_v2  ;;  %1282 = vmatprep.subr.bf16.mxu1 %v1324_v2  ;;  %v1327_v5 = vld [vmem:[%s1429_s29 + $0x18] sm:$0xff]   ;;  %v1332_v6 = vld [vmem:[%s1424_s26] sm:$0xff]   ;;  %v1329_v9 = vld [vmem:[%s1429_s29 + $0x28] sm:$0xff]  }
  0x18   : > { %1251 = vmatpush3.bf16.msra.mxu0 %v1324_v2  ;;  %1290 = vmatpush3.bf16.msra.mxu1 %v1324_v2  ;;  %v1328_v7 = vld [vmem:[%s1429_s29 + $0x20] sm:$0xff]   ;;  %v1330_v10 = vld [vmem:[%s1429_s29 + $0x30] sm:$0xff]   ;;  %v1331_v11 = vld [vmem:[%s1429_s29 + $0x38] sm:$0xff]  }
  0x19   : > { %1252 = vmatprep.subr.bf16.mxu0 %v1325_v3  ;;  %1283 = vmatprep.subr.bf16.mxu1 %v1325_v3  ;;  %v1336_v8 = vld [vmem:[%s1424_s26 + $0x20] sm:$0xff]   ;;  %v1333_v12 = vld [vmem:[%s1424_s26 + $0x8] sm:$0xff]   ;;  %v1334_v14 = vld [vmem:[%s1424_s26 + $0x10] sm:$0xff]  }
  0x1a   : > { %1266 = vmatprep.mubr.bf16.mxu0 %v1332_v6  ;;  %1274 = vmatprep.mubr.bf16.mxu1 %v1336_v8  ;;  %v1337_v13 = vld [vmem:[%s1424_s26 + $0x28] sm:$0xff]   ;;  %v1338_v15 = vld [vmem:[%s1424_s26 + $0x30] sm:$0xff]   ;;  %v1335_v16 = vld [vmem:[%s1424_s26 + $0x18] sm:$0xff]  }
  0x1b   : > { %v1339_v17 = vld [vmem:[%s1424_s26 + $0x38] sm:$0xff]   ;;  %v408_v18 = vld [vmem:[#allocation2 + $0x10] sm:$0xff]  ;;  %v406_v20 = vld [vmem:[#allocation2] sm:$0xff] }
  0x1c   : > { %1253 = vmatpush3.bf16.msra.mxu0 %v1325_v3  ;;  %1291 = vmatpush3.bf16.msra.mxu1 %v1325_v3  ;;  %v416_v19 = vld [vmem:[#allocation2 + $0x50] sm:$0xff]  ;;  %v414_v21 = vld [vmem:[#allocation2 + $0x40] sm:$0xff]  ;;  %v409_v23 = vld [vmem:[#allocation2 + $0x18] sm:$0xff] }
  0x1d   : > { %1254 = vmatprep.subr.bf16.mxu0 %v1326_v4  ;;  %1284 = vmatprep.subr.bf16.mxu1 %v1326_v4  ;;  %v417_v25 = vld [vmem:[#allocation2 + $0x58] sm:$0xff]  ;;  %v1463_v27 = vld [vmem:[%s1536_s2] ss:$0 sm:$0xff]  ;;  %v407_v29 = vld [vmem:[#allocation2 + $0x8] sm:$0xff] }
  0x1e   : > { %v415_v32 = vld [vmem:[#allocation2 + $0x48] sm:$0xff]  ;;  %v412_v50 = vld [vmem:[#allocation2 + $0x30] sm:$0xff]  ;;  %v410_v54 = vld [vmem:[#allocation2 + $0x20] sm:$0xff] }
  0x1f   : > { %v420_v52 = vld [vmem:[#allocation2 + $0x70] sm:$0xff]  ;;  %v418_v56 = vld [vmem:[#allocation2 + $0x60] sm:$0xff]  ;;  %v413_v62 = vld [vmem:[#allocation2 + $0x38] sm:$0xff] }
  0x20   : > { %1255 = vmatpush3.bf16.msra.mxu0 %v1326_v4  ;;  %1292 = vmatpush3.bf16.msra.mxu1 %v1326_v4  ;;  %v421_v0 = vld [vmem:[#allocation2 + $0x78] sm:$0xff]  ;;  %v411_v4 = vld [vmem:[#allocation2 + $0x28] sm:$0xff] }
  0x21   : > { %1256 = vmatprep.subr.bf16.mxu0 %v1327_v5  ;;  %1285 = vmatprep.subr.bf16.mxu1 %v1327_v5 }
  0x24   : > { %1257 = vmatpush3.bf16.msra.mxu0 %v1327_v5  ;;  %1293 = vmatpush3.bf16.msra.mxu1 %v1327_v5 }
  0x25   : > { %1258 = vmatprep.subr.bf16.mxu0 %v1328_v7  ;;  %1286 = vmatprep.subr.bf16.mxu1 %v1328_v7 }
  0x28   : > { %1259 = vmatpush3.bf16.msra.mxu0 %v1328_v7  ;;  %1294 = vmatpush3.bf16.msra.mxu1 %v1328_v7 }
  0x29   : > { %1260 = vmatprep.subr.bf16.mxu0 %v1329_v9  ;;  %1287 = vmatprep.subr.bf16.mxu1 %v1329_v9 }
  0x2c   : > { %1261 = vmatpush3.bf16.msra.mxu0 %v1329_v9  ;;  %1295 = vmatpush3.bf16.msra.mxu1 %v1329_v9 }
  0x2d   : > { %1262 = vmatprep.subr.bf16.mxu0 %v1330_v10  ;;  %1288 = vmatprep.subr.bf16.mxu1 %v1330_v10 }
  0x30   : > { %1263 = vmatpush3.bf16.msra.mxu0 %v1330_v10  ;;  %1296 = vmatpush3.bf16.msra.mxu1 %v1330_v10 }
  0x31   : > { %1264 = vmatprep.subr.bf16.mxu0 %v1331_v11  ;;  %1289 = vmatprep.subr.bf16.mxu1 %v1331_v11 }
  0x34   : > { %1265 = vmatpush3.bf16.msra.mxu0 %v1331_v11  ;;  %1297 = vmatpush3.bf16.msra.mxu1 %v1331_v11 }
  0x37   : > { %1267 = vmatmul.mubr.bf16.vlgmr.msra.gmra.mrb[0].mxu0 %v1333_v12  ;;  %1275 = vmatmul.mubr.bf16.vlgmr.msra.gmra.mrb[0].mxu1 %v1337_v13 }
  0x38   : > { %1270 = vmatprep.mubr.bf16.mxu0 %v1334_v14  ;;  %1278 = vmatprep.mubr.bf16.mxu1 %v1338_v15 }
  0x3f   : > { %1271 = vmatmul.mubr.bf16.gmra.mrb[4].mxu0 %v1335_v16  ;;  %1279 = vmatmul.mubr.bf16.gmra.mrb[4].mxu1 %v1339_v17 }
 0x10a   : > { %v1268_v22 = vpop.f32.mrb[0].mxu0  ;;  %v1276_v24 = vpop.f32.mrb[0].mxu1 }
 0x10b   : > { %v649_v26 = vadd.f32 %v1268_v22, %v408_v18  ;;  %v584_v28 = vpop.f32.mrb[1].mxu0  ;;  %v657_v30 = vadd.f32 %v1276_v24, %v416_v19  ;;  %v616_v31 = vpop.f32.mrb[1].mxu1 }
 0x10c   : > { %v647_v33 = vadd.f32 %v584_v28, %v406_v20  ;;  %v1269_v34 = vpop.f32.mrb[2].mxu0  ;;  %v655_v35 = vadd.f32 %v616_v31, %v414_v21  ;;  %v1277_v36 = vpop.f32.mrb[2].mxu1  ;;  %v419_v31 = vld [vmem:[#allocation2 + $0x68] sm:$0xff] }
 0x10d   : > { %665 = vst [vmem:[#allocation2 + $0x10] sm:$0xff] %v649_v26  ;;  %v650_v37 = vadd.f32 %v1269_v34, %v409_v23  ;;  %v587_v38 = vpop.f32.mrb[3].mxu0  ;;  %673 = vst [vmem:[#allocation2 + $0x50] sm:$0xff] %v657_v30  ;;  %v1466_v39 = vadd.f32 %v1463_v27, %v657_v30  ;;  %v658_v40 = vadd.f32 %v1277_v36, %v417_v25  ;;  %v619_v41 = vpop.f32.mrb[3].mxu1 }
 0x10e   : > { %663 = vst [vmem:[#allocation2] sm:$0xff] %v647_v33  ;;  %v705_v42 = vadd.f32 %v1463_v27, %v647_v33  ;;  %v648_v43 = vadd.f32 %v587_v38, %v407_v29  ;;  %671 = vst [vmem:[#allocation2 + $0x40] sm:$0xff] %v655_v35  ;;  %v656_v44 = vadd.f32 %v619_v41, %v415_v32 }
 0x10f   : > { %v707_v45 = vadd.f32 %v1463_v27, %v649_v26  ;;  %666 = vst [vmem:[#allocation2 + $0x18] sm:$0xff] %v650_v37  ;;  %v708_v46 = vadd.f32 %v1463_v27, %v650_v37  ;;  %v1472_v47 = vadd.f32 %v1463_v27, %v655_v35  ;;  %674 = vst [vmem:[#allocation2 + $0x58] sm:$0xff] %v658_v40 }
 0x110   : > { %v1475_v48 = vadd.f32 %v1463_v27, %v658_v40  ;;  %664 = vst [vmem:[#allocation2 + $0x8] sm:$0xff] %v648_v43  ;;  %v706_v49 = vadd.f32 %v1463_v27, %v648_v43  ;;  %672 = vst [vmem:[#allocation2 + $0x48] sm:$0xff] %v656_v44  ;;  %v1479_v51 = vadd.f32 %v1463_v27, %v656_v44 }
 0x111   : > { %v1195_v53 = vpack.c.bf16 %v708_v46, %v707_v45  ;;  %v813_v57 = vmul.f32 %v705_v42, %v705_v42  ;;  %v815_v1 = vmul.f32 %v707_v45, %v707_v45  ;;  %v816_v14 = vmul.f32 %v708_v46, %v708_v46 }
 0x112   : > { %v1215_v55 = vpack.c.bf16 %v1475_v48, %v1466_v39  ;;  %v789_v58 = vadd.f32 %v706_v49, %v705_v42  ;;  %v814_v59 = vmul.f32 %v706_v49, %v706_v49  ;;  %v1190_v60 = vpack.c.bf16 %v706_v49, %v705_v42  ;;  %v1272_v61 = vpop.f32.mrb[4].mxu0  ;;  %v1280_v63 = vpop.f32.mrb[4].mxu1 }
 0x113   : > { %1227 = vst [vmem:[%s1434_s7 + $0x8] sm:$0xff] %v1195_v53   ;;  %v653_v2 = vadd.f32 %v1272_v61, %v412_v50  ;;  %v600_v3 = vpop.f32.mrb[5].mxu0  ;;  %v1210_v5 = vpack.c.bf16 %v1479_v51, %v1472_v47  ;;  %v661_v6 = vadd.f32 %v1280_v63, %v420_v52  ;;  %v632_v7 = vpop.f32.mrb[5].mxu1  ;;  %v821_v52 = vmul.f32 %v1472_v47, %v1472_v47 }
 0x114   : > { %1231 = vst [vmem:[%s1434_s7 + $0x28] sm:$0xff] %v1215_v55   ;;  %v790_v8 = vadd.f32 %v789_v58, %v707_v45  ;;  %v829_v9 = vadd.f32 %v814_v59, %v813_v57  ;;  %1191 = vst [vmem:[%s1434_s7] sm:$0xff] %v1190_v60   ;;  %v651_v10 = vadd.f32 %v600_v3, %v410_v54  ;;  %v1273_v11 = vpop.f32.mrb[6].mxu0  ;;  %v1281_v13 = vpop.f32.mrb[6].mxu1 }
 0x115   : > { %v659_v12 = vadd.f32 %v632_v7, %v418_v56  ;;  %669 = vst [vmem:[#allocation2 + $0x30] sm:$0xff] %v653_v2  ;;  %v654_v15 = vadd.f32 %v1273_v11, %v413_v62  ;;  %v603_v16 = vpop.f32.mrb[7].mxu0  ;;  %1230 = vst [vmem:[%s1434_s7 + $0x20] sm:$0xff] %v1210_v5   ;;  %v662_v17 = vadd.f32 %v1281_v13, %v421_v0  ;;  %v635_v18 = vpop.f32.mrb[7].mxu1 }
 0x116   : > { %677 = vst [vmem:[#allocation2 + $0x70] sm:$0xff] %v661_v6  ;;  %v830_v19 = vadd.f32 %v829_v9, %v815_v1  ;;  %667 = vst [vmem:[#allocation2 + $0x20] sm:$0xff] %v651_v10  ;;  %v709_v20 = vadd.f32 %v1463_v27, %v651_v10  ;;  %v791_v21 = vadd.f32 %v790_v8, %v708_v46 }
 0x117   : > { %v652_v22 = vadd.f32 %v603_v16, %v411_v4  ;;  %675 = vst [vmem:[#allocation2 + $0x60] sm:$0xff] %v659_v12  ;;  %v711_v23 = vadd.f32 %v1463_v27, %v653_v2  ;;  %670 = vst [vmem:[#allocation2 + $0x38] sm:$0xff] %v654_v15  ;;  %v712_v24 = vadd.f32 %v1463_v27, %v654_v15 }
 0x118   : > { %v719_v25 = vadd.f32 %v1463_v27, %v661_v6  ;;  %678 = vst [vmem:[#allocation2 + $0x78] sm:$0xff] %v662_v17  ;;  %v792_v26 = vadd.f32 %v791_v21, %v709_v20  ;;  %v817_v28 = vmul.f32 %v709_v20, %v709_v20  ;;  %v831_v29 = vadd.f32 %v830_v19, %v816_v14  ;;  %v812_v21 = vld [vmem:[%s1539_s5] sm:$0x1] }
 0x119   : > { %668 = vst [vmem:[#allocation2 + $0x28] sm:$0xff] %v652_v22  ;;  %v710_v30 = vadd.f32 %v1463_v27, %v652_v22  ;;  %v1205_v32 = vpack.c.bf16 %v712_v24, %v711_v23  ;;  %v720_v33 = vadd.f32 %v1463_v27, %v662_v17  ;;  %v717_v38 = vadd.f32 %v1463_v27, %v659_v12 }
 0x11a   : > { %v832_v34 = vadd.f32 %v831_v29, %v817_v28  ;;  %v660_v41 = vadd.f32 %v635_v18, %v419_v31  ;;  %v819_v42 = vmul.f32 %v711_v23, %v711_v23  ;;  %v820_v46 = vmul.f32 %v712_v24, %v712_v24  ;;  %v788_v18 = vld [vmem:[%s1538_s4] sm:$0x1] }
 0x11b   : > { %v793_v35 = vadd.f32 %v792_v26, %v710_v30  ;;  %v818_v36 = vmul.f32 %v710_v30, %v710_v30  ;;  %v1200_v37 = vpack.c.bf16 %v710_v30, %v709_v20  ;;  %1229 = vst [vmem:[%s1434_s7 + $0x18] sm:$0xff] %v1205_v32   ;;  %v1225_v40 = vpack.c.bf16 %v720_v33, %v719_v25 }
 0x11c   : > { %676 = vst [vmem:[#allocation2 + $0x68] sm:$0xff] %v660_v41  ;;  %v718_v45 = vadd.f32 %v1463_v27, %v660_v41  ;;  %v822_v58 = vmul.f32 %v1479_v51, %v1479_v51  ;;  %v823_v27 = vmul.f32 %v1466_v39, %v1466_v39  ;;  %v824_v61 = vmul.f32 %v1475_v48, %v1475_v48 }
 0x11d   : > { %v794_v43 = vadd.f32 %v793_v35, %v711_v23  ;;  %v833_v44 = vadd.f32 %v832_v34, %v818_v36  ;;  %1228 = vst [vmem:[%s1434_s7 + $0x10] sm:$0xff] %v1200_v37   ;;  %1233 = vst [vmem:[%s1434_s7 + $0x38] sm:$0xff] %v1225_v40   ;;  %v825_v63 = vmul.f32 %v717_v38, %v717_v38 }
 0x11e   : > { %v1220_v53 = vpack.c.bf16 %v718_v45, %v717_v38  ;;  %v826_v4 = vmul.f32 %v718_v45, %v718_v45  ;;  %v827_v5 = vmul.f32 %v719_v25, %v719_v25  ;;  %v828_v7 = vmul.f32 %v720_v33, %v720_v33 }
 0x11f   : > { %v834_v49 = vadd.f32 %v833_v44, %v819_v42  ;;  %v795_v50 = vadd.f32 %v794_v43, %v712_v24 }
 0x120   : > { %1232 = vst [vmem:[%s1434_s7 + $0x30] sm:$0xff] %v1220_v53  }
 0x121   : > { %v796_v54 = vadd.f32 %v795_v50, %v1472_v47  ;;  %v835_v55 = vadd.f32 %v834_v49, %v820_v46 }
 0x123   : > { %v836_v56 = vadd.f32 %v835_v55, %v821_v52  ;;  %v797_v57 = vadd.f32 %v796_v54, %v1479_v51 }
 0x125   : > { %v798_v59 = vadd.f32 %v797_v57, %v1466_v39  ;;  %v837_v60 = vadd.f32 %v836_v56, %v822_v58 }
 0x127   : > { %v838_v62 = vadd.f32 %v837_v60, %v823_v27  ;;  %v799_v47 = vadd.f32 %v798_v59, %v1475_v48 }
 0x129   : > { %v800_v0 = vadd.f32 %v799_v47, %v717_v38  ;;  %v839_v1 = vadd.f32 %v838_v62, %v824_v61 }
 0x12b   : > { %v840_v2 = vadd.f32 %v839_v1, %v825_v63  ;;  %v801_v3 = vadd.f32 %v800_v0, %v718_v45 }
 0x12d   : > { %v802_v51 = vadd.f32 %v801_v3, %v719_v25  ;;  %v841_v6 = vadd.f32 %v840_v2, %v826_v4 }
 0x12f   : > { %v803_v8 = vadd.f32 %v802_v51, %v720_v33  ;;  %v842_v9 = vadd.f32 %v841_v6, %v827_v5 }
 0x131   : > { %v804_v39 = vrot.slane %v803_v8, 4  ;;  %v843_v10 = vadd.f32 %v842_v9, %v828_v7 }
 0x133   : > { %v805_v11 = vadd.f32 %v804_v39, %v803_v8  ;;  %v844_v12 = vrot.slane %v843_v10, 4 }
 0x135   : > { %v806_v13 = vrot.slane %v805_v11, 2  ;;  %v845_v14 = vadd.f32 %v844_v12, %v843_v10 }
 0x137   : > { %v807_v15 = vadd.f32 %v806_v13, %v805_v11  ;;  %v846_v48 = vrot.slane %v845_v14, 2 }
 0x139   : > { %v808_v16 = vrot.slane %v807_v15, 1  ;;  %v847_v17 = vadd.f32 %v846_v48, %v845_v14 }
 0x13b   : > { %v809_v19 = vadd.f32 %v808_v16, %v807_v15  ;;  %v848_v20 = vrot.slane %v847_v17, 1 }
 0x13d   : > { %v810_v22 = vadd.f32 %v809_v19, %v788_v18  ;;  %v849_v23 = vadd.f32 %v848_v20, %v847_v17 }
 0x13f   : > { %811 = vst [vmem:[%s1538_s4] sm:$0x1] %v810_v22  ;;  %v850_v24 = vadd.f32 %v849_v23, %v812_v21 }
 0x141   : > { %851 = vst [vmem:[%s1539_s5] sm:$0x1] %v850_v24 }
 0x142 PF: > { %s16_s20 = sadd.s32 1, %s1362_s20   ;;  %s1540_s18 = smov %s1358_s19 }
 0x143   : > { %p13_p6 = scmp.ge.s32.totalorder %s16_s20, 6   ;;  %s1541_s19 = smov %s1543_s21 }
 0x145   :  { %15 = sbr.rel (!%p13_p6) target bundleno = 2 (0x2), region = 104 }

// kernel: _lambda_.33
= control target key start
LH: loop header
LB: loop body
LE: loop exit
PB: predicated region body
PF: predicated region fallthrough
CT: control target
= control target key end

     0   :  { %s2009_s12 = smov 0   ;;  %s2011_s13 = smov 0   ;;  %s2229_s0 = inlined_call_operand.vmem [shape: bf16[4,512,128], index: 0, kind: input, shape index: {}]   ;;  %s2230_s1 = inlined_call_operand.vmem [shape: bf16[4,128,128], index: 1, kind: input, shape index: {}]   ;;  %s2231_s2 = inlined_call_operand.vmem [shape: f32[1,128], index: 2, kind: input, shape index: {}]   ;;  %s2232_s3 = inlined_call_operand.vmem [shape: f32[4,512,128], index: 3, kind: output, shape index: {}]  }
   0x1   :  { %s2013_s14 = smov 0  }
   0x2 LB: > { %s35_s15 = sadd.s32 1, %s1983_s13  ;;  %p1584_p0 = scmp.ge.s32.totalorder %s1987_s14, 1  ;;  %s1987_s14 = sphi %s2013_s14, %s13_s14   ;;  %s1983_s13 = sphi %s2011_s13, %s2234_s13   ;;  %s1979_s12 = sphi %s2009_s12, %s2233_s12  }
   0x3   : > { %p37_p1 = scmp.ge.s32.totalorder %s35_s15, 4  ;;  %p209_p2 = scmp.lt.s32.totalorder %s1987_s14, 5 }
   0x5   : > { %s2236_s15 = smov (%p37_p1, %s35_s15), 0  ;;  %p210_p3 = pnand %p1584_p0, %p209_p2 }
   0x6   : > { %p263_p4 = scmp.lt.s32.totalorder (!%p210_p3), %s1979_s12, 3  ;;  %v2084_v40 = vld [vmem:[%s2231_s2] ss:$0 sm:$0xff] (!%p210_p3) }
   0x7   : > { %213 = sbr.rel (%p210_p3) target bundleno = 342 (0x156), region = 32 }
   0xe   : > { %s2238_s12 = smov (!%p263_p4, %s1979_s12), 3 }
   0xf   : > { %s1635_s16 = sshll.u32 %s2238_s12, 6  ;;  %s1634_s20 = sshll.u32 %s2238_s12, 8 }
  0x10   : > { %s2033_s19 = scalar_lea.vmem %s2230_s1, %s1635_s16  ;;  %s2042_s23 = scalar_lea.vmem %s2229_s0, %s1634_s20 }
  0x11   : > { %v1797_v0 = vld [vmem:[%s2033_s19] sm:$0xff]   ;;  %v1798_v1 = vld [vmem:[%s2033_s19 + $0x8] sm:$0xff]   ;;  %v1799_v2 = vld [vmem:[%s2033_s19 + $0x10] sm:$0xff]   ;;  %s1636_s26 = sshll.u32 %s2238_s12, 9 }
  0x12   : > { %1677 = vmatprep.subr.bf16.mxu0 %v1797_v0  ;;  %1757 = vmatprep.subr.bf16.mxu1 %v1797_v0  ;;  %v1800_v3 = vld [vmem:[%s2033_s19 + $0x18] sm:$0xff]   ;;  %v1805_v4 = vld [vmem:[%s2042_s23] sm:$0xff]   ;;  %v1802_v7 = vld [vmem:[%s2033_s19 + $0x28] sm:$0xff]   ;;  %s2102_s29 = scalar_lea.vmem %s2232_s3, %s1636_s26 }
  0x13   : > { %1678 = vmatpush3.bf16.msra.mxu0 %v1797_v0  ;;  %1765 = vmatpush3.bf16.msra.mxu1 %v1797_v0  ;;  %v1806_v5 = vld [vmem:[%s2042_s23 + $0x80] sm:$0xff]   ;;  %v1803_v8 = vld [vmem:[%s2033_s19 + $0x30] sm:$0xff]   ;;  %v1804_v9 = vld [vmem:[%s2033_s19 + $0x38] sm:$0xff]  }
  0x14   : > { %1679 = vmatprep.subr.bf16.mxu0 %v1798_v1  ;;  %1758 = vmatprep.subr.bf16.mxu1 %v1798_v1  ;;  %v1801_v6 = vld [vmem:[%s2033_s19 + $0x20] sm:$0xff]   ;;  %v1807_v10 = vld [vmem:[%s2042_s23 + $0x8] sm:$0xff]   ;;  %v1809_v12 = vld [vmem:[%s2042_s23 + $0x10] sm:$0xff]  }
  0x15   : > { %1693 = vmatprep.mubr.bf16.mxu0 %v1805_v4  ;;  %1725 = vmatprep.mubr.bf16.mxu1 %v1806_v5  ;;  %v1808_v11 = vld [vmem:[%s2042_s23 + $0x88] sm:$0xff]   ;;  %v1810_v13 = vld [vmem:[%s2042_s23 + $0x90] sm:$0xff]   ;;  %v1811_v14 = vld [vmem:[%s2042_s23 + $0x18] sm:$0xff]  }
  0x16   : > { %v1812_v15 = vld [vmem:[%s2042_s23 + $0x98] sm:$0xff]   ;;  %v1813_v16 = vld [vmem:[%s2042_s23 + $0x20] sm:$0xff]   ;;  %v1815_v18 = vld [vmem:[%s2042_s23 + $0x28] sm:$0xff]  }
  0x17   : > { %1680 = vmatpush3.bf16.msra.mxu0 %v1798_v1  ;;  %1766 = vmatpush3.bf16.msra.mxu1 %v1798_v1  ;;  %v1814_v17 = vld [vmem:[%s2042_s23 + $0xa0] sm:$0xff]   ;;  %v1816_v19 = vld [vmem:[%s2042_s23 + $0xa8] sm:$0xff]   ;;  %v1817_v20 = vld [vmem:[%s2042_s23 + $0x30] sm:$0xff]  }
  0x18   : > { %1681 = vmatprep.subr.bf16.mxu0 %v1799_v2  ;;  %1759 = vmatprep.subr.bf16.mxu1 %v1799_v2  ;;  %v1818_v21 = vld [vmem:[%s2042_s23 + $0xb0] sm:$0xff]   ;;  %v1819_v22 = vld [vmem:[%s2042_s23 + $0x38] sm:$0xff]   ;;  %v1821_v24 = vld [vmem:[%s2042_s23 + $0x40] sm:$0xff]  }
  0x19   : > { %v1820_v23 = vld [vmem:[%s2042_s23 + $0xb8] sm:$0xff]   ;;  %v1822_v25 = vld [vmem:[%s2042_s23 + $0xc0] sm:$0xff]   ;;  %v1823_v26 = vld [vmem:[%s2042_s23 + $0x48] sm:$0xff]  }
  0x1a   : > { %v1824_v27 = vld [vmem:[%s2042_s23 + $0xc8] sm:$0xff]   ;;  %v1825_v28 = vld [vmem:[%s2042_s23 + $0x50] sm:$0xff]   ;;  %v1827_v30 = vld [vmem:[%s2042_s23 + $0x58] sm:$0xff]  }
  0x1b   : > { %1682 = vmatpush3.bf16.msra.mxu0 %v1799_v2  ;;  %1767 = vmatpush3.bf16.msra.mxu1 %v1799_v2  ;;  %v1826_v29 = vld [vmem:[%s2042_s23 + $0xd0] sm:$0xff]   ;;  %v1828_v31 = vld [vmem:[%s2042_s23 + $0xd8] sm:$0xff]   ;;  %v1829_v32 = vld [vmem:[%s2042_s23 + $0x60] sm:$0xff]  }
  0x1c   : > { %1683 = vmatprep.subr.bf16.mxu0 %v1800_v3  ;;  %1760 = vmatprep.subr.bf16.mxu1 %v1800_v3  ;;  %v1830_v33 = vld [vmem:[%s2042_s23 + $0xe0] sm:$0xff]   ;;  %v1831_v34 = vld [vmem:[%s2042_s23 + $0x68] sm:$0xff]   ;;  %v1833_v36 = vld [vmem:[%s2042_s23 + $0x70] sm:$0xff]  }
  0x1d   : > { %v1832_v35 = vld [vmem:[%s2042_s23 + $0xe8] sm:$0xff]   ;;  %v1834_v37 = vld [vmem:[%s2042_s23 + $0xf0] sm:$0xff]   ;;  %v1835_v38 = vld [vmem:[%s2042_s23 + $0x78] sm:$0xff]  }
  0x1e   : > { %v1836_v39 = vld [vmem:[%s2042_s23 + $0xf8] sm:$0xff]  }
  0x1f   : > { %1684 = vmatpush3.bf16.msra.mxu0 %v1800_v3  ;;  %1768 = vmatpush3.bf16.msra.mxu1 %v1800_v3 }
  0x20   : > { %1685 = vmatprep.subr.bf16.mxu0 %v1801_v6  ;;  %1761 = vmatprep.subr.bf16.mxu1 %v1801_v6 }
  0x23   : > { %1686 = vmatpush3.bf16.msra.mxu0 %v1801_v6  ;;  %1769 = vmatpush3.bf16.msra.mxu1 %v1801_v6 }
  0x24   : > { %1687 = vmatprep.subr.bf16.mxu0 %v1802_v7  ;;  %1762 = vmatprep.subr.bf16.mxu1 %v1802_v7 }
  0x27   : > { %1688 = vmatpush3.bf16.msra.mxu0 %v1802_v7  ;;  %1770 = vmatpush3.bf16.msra.mxu1 %v1802_v7 }
  0x28   : > { %1689 = vmatprep.subr.bf16.mxu0 %v1803_v8  ;;  %1763 = vmatprep.subr.bf16.mxu1 %v1803_v8 }
  0x2b   : > { %1690 = vmatpush3.bf16.msra.mxu0 %v1803_v8  ;;  %1771 = vmatpush3.bf16.msra.mxu1 %v1803_v8 }
  0x2c   : > { %1691 = vmatprep.subr.bf16.mxu0 %v1804_v9  ;;  %1764 = vmatprep.subr.bf16.mxu1 %v1804_v9 }
  0x2f   : > { %1692 = vmatpush3.bf16.msra.mxu0 %v1804_v9  ;;  %1772 = vmatpush3.bf16.msra.mxu1 %v1804_v9 }
  0x32   : > { %1694 = vmatmul.mubr.bf16.vlgmr.msra.gmra.mrb[0].mxu0 %v1807_v10  ;;  %1726 = vmatmul.mubr.bf16.vlgmr.msra.gmra.mrb[0].mxu1 %v1808_v11 }
  0x33   : > { %1697 = vmatprep.mubr.bf16.mxu0 %v1809_v12  ;;  %1729 = vmatprep.mubr.bf16.mxu1 %v1810_v13 }
  0x3a   : > { %1698 = vmatmul.mubr.bf16.gmra.mrb[4].mxu0 %v1811_v14  ;;  %1730 = vmatmul.mubr.bf16.gmra.mrb[4].mxu1 %v1812_v15 }
  0x3b   : > { %1701 = vmatprep.mubr.bf16.mxu0 %v1813_v16  ;;  %1733 = vmatprep.mubr.bf16.mxu1 %v1814_v17 }
  0x42   : > { %1702 = vmatmul.mubr.bf16.gmra.mrb[8].mxu0 %v1815_v18  ;;  %1734 = vmatmul.mubr.bf16.gmra.mrb[8].mxu1 %v1816_v19 }
  0x43   : > { %1705 = vmatprep.mubr.bf16.mxu0 %v1817_v20  ;;  %1737 = vmatprep.mubr.bf16.mxu1 %v1818_v21 }
  0x4a   : > { %1706 = vmatmul.mubr.bf16.gmra.mrb[12].mxu0 %v1819_v22  ;;  %1738 = vmatmul.mubr.bf16.gmra.mrb[12].mxu1 %v1820_v23 }
  0x4b   : > { %1709 = vmatprep.mubr.bf16.mxu0 %v1821_v24  ;;  %1741 = vmatprep.mubr.bf16.mxu1 %v1822_v25 }
  0x52   : > { %1710 = vmatmul.mubr.bf16.gmra.mrb[16].mxu0 %v1823_v26  ;;  %1742 = vmatmul.mubr.bf16.gmra.mrb[16].mxu1 %v1824_v27 }
  0x53   : > { %1713 = vmatprep.mubr.bf16.mxu0 %v1825_v28  ;;  %1745 = vmatprep.mubr.bf16.mxu1 %v1826_v29 }
  0x5a   : > { %1714 = vmatmul.mubr.bf16.gmra.mrb[20].mxu0 %v1827_v30  ;;  %1746 = vmatmul.mubr.bf16.gmra.mrb[20].mxu1 %v1828_v31 }
  0x5b   : > { %1717 = vmatprep.mubr.bf16.mxu0 %v1829_v32  ;;  %1749 = vmatprep.mubr.bf16.mxu1 %v1830_v33 }
  0x62   : > { %1718 = vmatmul.mubr.bf16.gmra.mrb[24].mxu0 %v1831_v34  ;;  %1750 = vmatmul.mubr.bf16.gmra.mrb[24].mxu1 %v1832_v35 }
  0x63   : > { %1721 = vmatprep.mubr.bf16.mxu0 %v1833_v36  ;;  %1753 = vmatprep.mubr.bf16.mxu1 %v1834_v37 }
  0x6a   : > { %1722 = vmatmul.mubr.bf16.gmra.mrb[28].mxu0 %v1835_v38  ;;  %1754 = vmatmul.mubr.bf16.gmra.mrb[28].mxu1 %v1836_v39 }
 0x105   : > { %v1695_v41 = vpop.f32.mrb[0].mxu0  ;;  %v1727_v42 = vpop.f32.mrb[0].mxu1 }
 0x106   : > { %v1250_v43 = vadd.f32 %v1695_v41, %v2084_v40  ;;  %v1282_v44 = vadd.f32 %v1727_v42, %v2084_v40  ;;  %v791_v45 = vpop.f32.mrb[1].mxu0  ;;  %v919_v46 = vpop.f32.mrb[1].mxu1 }
 0x107   : > { %v1248_v47 = vadd.f32 %v2084_v40, %v791_v45  ;;  %v1280_v48 = vadd.f32 %v2084_v40, %v919_v46  ;;  %v1696_v49 = vpop.f32.mrb[2].mxu0  ;;  %v1728_v50 = vpop.f32.mrb[2].mxu1 }
 0x108   : > { %1837 = vtanh.f32 %v1250_v43  ;;  %v1251_v51 = vadd.f32 %v1696_v49, %v2084_v40  ;;  %v794_v52 = vpop.f32.mrb[3].mxu0  ;;  %v922_v53 = vpop.f32.mrb[3].mxu1  ;;  %v1283_v54 = vadd.f32 %v1728_v50, %v2084_v40 }
 0x109   : > { %1839 = vtanh.f32 %v1282_v44  ;;  %v1249_v55 = vadd.f32 %v2084_v40, %v794_v52  ;;  %v1281_v56 = vadd.f32 %v2084_v40, %v922_v53 }
 0x10a   : > { %1841 = vtanh.f32 %v1248_v47 }
 0x10b   : > { %1843 = vtanh.f32 %v1280_v48 }
 0x10c   : > { %1845 = vtanh.f32 %v1251_v51 }
 0x10d   : > { %1847 = vtanh.f32 %v1283_v54  ;;  %v1699_v57 = vpop.f32.mrb[4].mxu0  ;;  %v1731_v58 = vpop.f32.mrb[4].mxu1 }
 0x10e   : > { %1849 = vtanh.f32 %v1249_v55  ;;  %v1254_v59 = vadd.f32 %v1699_v57, %v2084_v40  ;;  %v1286_v60 = vadd.f32 %v1731_v58, %v2084_v40  ;;  %v807_v61 = vpop.f32.mrb[5].mxu0  ;;  %v935_v62 = vpop.f32.mrb[5].mxu1 }
 0x10f   : > { %1851 = vtanh.f32 %v1281_v56  ;;  %v1252_v63 = vadd.f32 %v2084_v40, %v807_v61  ;;  %v1284_v0 = vadd.f32 %v2084_v40, %v935_v62  ;;  %v1700_v1 = vpop.f32.mrb[6].mxu0  ;;  %v1732_v2 = vpop.f32.mrb[6].mxu1 }
 0x110   : > { %1853 = vtanh.f32 %v1254_v59  ;;  %v1255_v3 = vadd.f32 %v1700_v1, %v2084_v40  ;;  %v810_v4 = vpop.f32.mrb[7].mxu0  ;;  %v938_v5 = vpop.f32.mrb[7].mxu1  ;;  %v1287_v6 = vadd.f32 %v1732_v2, %v2084_v40 }
 0x111   : > { %1855 = vtanh.f32 %v1286_v60  ;;  %v1253_v8 = vadd.f32 %v2084_v40, %v810_v4  ;;  %v1285_v10 = vadd.f32 %v2084_v40, %v938_v5 }
 0x112   : > { %v1838_v7 = vpop.eup %1837  ;;  %1857 = vtanh.f32 %v1252_v63 }
 0x113   : > { %v1840_v9 = vpop.eup %1839  ;;  %1378 = vst [vmem:[%s2102_s29 + $0x10] sm:$0xff] %v1838_v7  ;;  %1859 = vtanh.f32 %v1284_v0 }
 0x114   : > { %v1842_v11 = vpop.eup %1841  ;;  %1410 = vst [vmem:[%s2102_s29 + $0x110] sm:$0xff] %v1840_v9  ;;  %1861 = vtanh.f32 %v1255_v3 }
 0x115   : > { %v1844_v12 = vpop.eup %1843  ;;  %1376 = vst [vmem:[%s2102_s29] sm:$0xff] %v1842_v11  ;;  %1863 = vtanh.f32 %v1287_v6  ;;  %v1703_v13 = vpop.f32.mrb[8].mxu0 }
 0x116   : > { %v1735_v14 = vpop.f32.mrb[8].mxu1  ;;  %v1846_v15 = vpop.eup %1845  ;;  %1408 = vst [vmem:[%s2102_s29 + $0x100] sm:$0xff] %v1844_v12  ;;  %1865 = vtanh.f32 %v1253_v8  ;;  %v1258_v16 = vadd.f32 %v1703_v13, %v2084_v40 }
 0x117   : > { %v1290_v17 = vadd.f32 %v1735_v14, %v2084_v40  ;;  %v823_v18 = vpop.f32.mrb[9].mxu0  ;;  %v951_v19 = vpop.f32.mrb[9].mxu1  ;;  %1379 = vst [vmem:[%s2102_s29 + $0x18] sm:$0xff] %v1846_v15  ;;  %1867 = vtanh.f32 %v1285_v10 }
 0x118   : > { %v1848_v20 = vpop.eup %1847  ;;  %v1256_v21 = vadd.f32 %v2084_v40, %v823_v18  ;;  %v1288_v22 = vadd.f32 %v2084_v40, %v951_v19  ;;  %v1704_v23 = vpop.f32.mrb[10].mxu0  ;;  %1869 = vtanh.f32 %v1258_v16 }
 0x119   : > { %v1736_v24 = vpop.f32.mrb[10].mxu1  ;;  %v1850_v25 = vpop.eup %1849  ;;  %1411 = vst [vmem:[%s2102_s29 + $0x118] sm:$0xff] %v1848_v20  ;;  %v1259_v26 = vadd.f32 %v1704_v23, %v2084_v40  ;;  %1871 = vtanh.f32 %v1290_v17 }
 0x11a   : > { %v826_v27 = vpop.f32.mrb[11].mxu0  ;;  %v954_v28 = vpop.f32.mrb[11].mxu1  ;;  %1377 = vst [vmem:[%s2102_s29 + $0x8] sm:$0xff] %v1850_v25  ;;  %v1291_v30 = vadd.f32 %v1736_v24, %v2084_v40  ;;  %1873 = vtanh.f32 %v1256_v21 }
 0x11b   : > { %v1852_v29 = vpop.eup %1851  ;;  %v1257_v32 = vadd.f32 %v2084_v40, %v826_v27  ;;  %1875 = vtanh.f32 %v1288_v22  ;;  %v1289_v34 = vadd.f32 %v2084_v40, %v954_v28 }
 0x11c   : > { %v1854_v31 = vpop.eup %1853  ;;  %1409 = vst [vmem:[%s2102_s29 + $0x108] sm:$0xff] %v1852_v29  ;;  %1877 = vtanh.f32 %v1259_v26 }
 0x11d   : > { %v1856_v33 = vpop.eup %1855  ;;  %1382 = vst [vmem:[%s2102_s29 + $0x30] sm:$0xff] %v1854_v31  ;;  %1879 = vtanh.f32 %v1291_v30  ;;  %v1707_v37 = vpop.f32.mrb[12].mxu0 }
 0x11e   : > { %v1858_v35 = vpop.eup %1857  ;;  %1414 = vst [vmem:[%s2102_s29 + $0x130] sm:$0xff] %v1856_v33  ;;  %v1739_v38 = vpop.f32.mrb[12].mxu1  ;;  %1881 = vtanh.f32 %v1257_v32  ;;  %v1262_v41 = vadd.f32 %v1707_v37, %v2084_v40 }
 0x11f   : > { %v1860_v36 = vpop.eup %1859  ;;  %1380 = vst [vmem:[%s2102_s29 + $0x20] sm:$0xff] %v1858_v35  ;;  %v1294_v42 = vadd.f32 %v1739_v38, %v2084_v40  ;;  %v839_v43 = vpop.f32.mrb[13].mxu0  ;;  %1883 = vtanh.f32 %v1289_v34 }
 0x120   : > { %v1862_v39 = vpop.eup %1861  ;;  %1412 = vst [vmem:[%s2102_s29 + $0x120] sm:$0xff] %v1860_v36  ;;  %v967_v44 = vpop.f32.mrb[13].mxu1  ;;  %v1260_v46 = vadd.f32 %v2084_v40, %v839_v43  ;;  %1885 = vtanh.f32 %v1262_v41 }
 0x121   : > { %v1864_v45 = vpop.eup %1863  ;;  %1383 = vst [vmem:[%s2102_s29 + $0x38] sm:$0xff] %v1862_v39  ;;  %v1292_v47 = vadd.f32 %v2084_v40, %v967_v44  ;;  %v1708_v48 = vpop.f32.mrb[14].mxu0  ;;  %1887 = vtanh.f32 %v1294_v42 }
 0x122   : > { %v1740_v49 = vpop.f32.mrb[14].mxu1  ;;  %v1866_v50 = vpop.eup %1865  ;;  %1415 = vst [vmem:[%s2102_s29 + $0x138] sm:$0xff] %v1864_v45  ;;  %v1263_v51 = vadd.f32 %v1708_v48, %v2084_v40  ;;  %1889 = vtanh.f32 %v1260_v46 }
 0x123   : > { %v842_v52 = vpop.f32.mrb[15].mxu0  ;;  %v970_v53 = vpop.f32.mrb[15].mxu1  ;;  %1381 = vst [vmem:[%s2102_s29 + $0x28] sm:$0xff] %v1866_v50  ;;  %v1295_v55 = vadd.f32 %v1740_v49, %v2084_v40  ;;  %1891 = vtanh.f32 %v1292_v47 }
 0x124   : > { %v1868_v54 = vpop.eup %1867  ;;  %v1261_v57 = vadd.f32 %v2084_v40, %v842_v52  ;;  %v1293_v59 = vadd.f32 %v2084_v40, %v970_v53  ;;  %1893 = vtanh.f32 %v1263_v51 }
 0x125   : > { %v1870_v56 = vpop.eup %1869  ;;  %1413 = vst [vmem:[%s2102_s29 + $0x128] sm:$0xff] %v1868_v54  ;;  %1895 = vtanh.f32 %v1295_v55  ;;  %v1711_v62 = vpop.f32.mrb[16].mxu0 }
 0x126   : > { %v1872_v58 = vpop.eup %1871  ;;  %1386 = vst [vmem:[%s2102_s29 + $0x50] sm:$0xff] %v1870_v56  ;;  %v1743_v63 = vpop.f32.mrb[16].mxu1  ;;  %1897 = vtanh.f32 %v1261_v57  ;;  %v1266_v1 = vadd.f32 %v1711_v62, %v2084_v40 }
 0x127   : > { %v1874_v60 = vpop.eup %1873  ;;  %1418 = vst [vmem:[%s2102_s29 + $0x150] sm:$0xff] %v1872_v58  ;;  %v1298_v2 = vadd.f32 %v1743_v63, %v2084_v40  ;;  %v855_v3 = vpop.f32.mrb[17].mxu0  ;;  %1899 = vtanh.f32 %v1293_v59 }
 0x128   : > { %v1876_v61 = vpop.eup %1875  ;;  %1384 = vst [vmem:[%s2102_s29 + $0x40] sm:$0xff] %v1874_v60  ;;  %v983_v4 = vpop.f32.mrb[17].mxu1  ;;  %v1264_v6 = vadd.f32 %v2084_v40, %v855_v3  ;;  %1901 = vtanh.f32 %v1266_v1 }
 0x129   : > { %v1878_v0 = vpop.eup %1877  ;;  %1416 = vst [vmem:[%s2102_s29 + $0x140] sm:$0xff] %v1876_v61  ;;  %v1296_v7 = vadd.f32 %v2084_v40, %v983_v4  ;;  %v1712_v8 = vpop.f32.mrb[18].mxu0  ;;  %1903 = vtanh.f32 %v1298_v2 }
 0x12a   : > { %v1880_v5 = vpop.eup %1879  ;;  %1387 = vst [vmem:[%s2102_s29 + $0x58] sm:$0xff] %v1878_v0  ;;  %v1744_v9 = vpop.f32.mrb[18].mxu1  ;;  %v1267_v11 = vadd.f32 %v1712_v8, %v2084_v40  ;;  %1905 = vtanh.f32 %v1264_v6 }
 0x12b   : > { %v1882_v10 = vpop.eup %1881  ;;  %1419 = vst [vmem:[%s2102_s29 + $0x158] sm:$0xff] %v1880_v5  ;;  %v858_v12 = vpop.f32.mrb[19].mxu0  ;;  %v1299_v15 = vadd.f32 %v1744_v9, %v2084_v40  ;;  %1907 = vtanh.f32 %v1296_v7 }
 0x12c   : > { %v986_v13 = vpop.f32.mrb[19].mxu1  ;;  %v1884_v14 = vpop.eup %1883  ;;  %1385 = vst [vmem:[%s2102_s29 + $0x48] sm:$0xff] %v1882_v10  ;;  %v1265_v17 = vadd.f32 %v2084_v40, %v858_v12  ;;  %1909 = vtanh.f32 %v1267_v11 }
 0x12d   : > { %v1886_v16 = vpop.eup %1885  ;;  %1417 = vst [vmem:[%s2102_s29 + $0x148] sm:$0xff] %v1884_v14  ;;  %v1297_v19 = vadd.f32 %v2084_v40, %v986_v13  ;;  %1911 = vtanh.f32 %v1299_v15  ;;  %v1715_v22 = vpop.f32.mrb[20].mxu0 }
 0x12e   : > { %v1888_v18 = vpop.eup %1887  ;;  %1390 = vst [vmem:[%s2102_s29 + $0x70] sm:$0xff] %v1886_v16  ;;  %v1747_v23 = vpop.f32.mrb[20].mxu1  ;;  %1913 = vtanh.f32 %v1265_v17  ;;  %v1270_v25 = vadd.f32 %v1715_v22, %v2084_v40 }
 0x12f   : > { %v1890_v20 = vpop.eup %1889  ;;  %1422 = vst [vmem:[%s2102_s29 + $0x170] sm:$0xff] %v1888_v18  ;;  %v1302_v26 = vadd.f32 %v1747_v23, %v2084_v40  ;;  %v871_v27 = vpop.f32.mrb[21].mxu0  ;;  %1915 = vtanh.f32 %v1297_v19 }
 0x130   : > { %v1892_v21 = vpop.eup %1891  ;;  %1388 = vst [vmem:[%s2102_s29 + $0x60] sm:$0xff] %v1890_v20  ;;  %v999_v28 = vpop.f32.mrb[21].mxu1  ;;  %v1268_v30 = vadd.f32 %v2084_v40, %v871_v27  ;;  %1917 = vtanh.f32 %v1270_v25 }
 0x131   : > { %v1894_v24 = vpop.eup %1893  ;;  %1420 = vst [vmem:[%s2102_s29 + $0x160] sm:$0xff] %v1892_v21  ;;  %v1300_v31 = vadd.f32 %v2084_v40, %v999_v28  ;;  %v1716_v32 = vpop.f32.mrb[22].mxu0  ;;  %1919 = vtanh.f32 %v1302_v26 }
 0x132   : > { %v1896_v29 = vpop.eup %1895  ;;  %1391 = vst [vmem:[%s2102_s29 + $0x78] sm:$0xff] %v1894_v24  ;;  %v1748_v33 = vpop.f32.mrb[22].mxu1  ;;  %v1271_v35 = vadd.f32 %v1716_v32, %v2084_v40  ;;  %1921 = vtanh.f32 %v1268_v30 }
 0x133   : > { %v1898_v34 = vpop.eup %1897  ;;  %1423 = vst [vmem:[%s2102_s29 + $0x178] sm:$0xff] %v1896_v29  ;;  %v874_v36 = vpop.f32.mrb[23].mxu0  ;;  %v1303_v39 = vadd.f32 %v1748_v33, %v2084_v40  ;;  %1923 = vtanh.f32 %v1300_v31 }
 0x134   : > { %v1002_v37 = vpop.f32.mrb[23].mxu1  ;;  %v1900_v38 = vpop.eup %1899  ;;  %1389 = vst [vmem:[%s2102_s29 + $0x68] sm:$0xff] %v1898_v34  ;;  %v1269_v42 = vadd.f32 %v2084_v40, %v874_v36  ;;  %1925 = vtanh.f32 %v1271_v35 }
 0x135   : > { %v1902_v41 = vpop.eup %1901  ;;  %1421 = vst [vmem:[%s2102_s29 + $0x168] sm:$0xff] %v1900_v38  ;;  %v1301_v44 = vadd.f32 %v2084_v40, %v1002_v37  ;;  %1927 = vtanh.f32 %v1303_v39  ;;  %v1719_v47 = vpop.f32.mrb[24].mxu0 }
 0x136   : > { %v1904_v43 = vpop.eup %1903  ;;  %1394 = vst [vmem:[%s2102_s29 + $0x90] sm:$0xff] %v1902_v41  ;;  %v1751_v48 = vpop.f32.mrb[24].mxu1  ;;  %1929 = vtanh.f32 %v1269_v42  ;;  %v1274_v50 = vadd.f32 %v1719_v47, %v2084_v40 }
 0x137   : > { %v1906_v45 = vpop.eup %1905  ;;  %1426 = vst [vmem:[%s2102_s29 + $0x190] sm:$0xff] %v1904_v43  ;;  %v1306_v51 = vadd.f32 %v1751_v48, %v2084_v40  ;;  %v887_v52 = vpop.f32.mrb[25].mxu0  ;;  %1931 = vtanh.f32 %v1301_v44 }
 0x138   : > { %v1908_v46 = vpop.eup %1907  ;;  %1392 = vst [vmem:[%s2102_s29 + $0x80] sm:$0xff] %v1906_v45  ;;  %v1015_v53 = vpop.f32.mrb[25].mxu1  ;;  %v1272_v55 = vadd.f32 %v2084_v40, %v887_v52  ;;  %1933 = vtanh.f32 %v1274_v50 }
 0x139   : > { %v1910_v49 = vpop.eup %1909  ;;  %1424 = vst [vmem:[%s2102_s29 + $0x180] sm:$0xff] %v1908_v46  ;;  %v1304_v56 = vadd.f32 %v2084_v40, %v1015_v53  ;;  %v1720_v57 = vpop.f32.mrb[26].mxu0  ;;  %1935 = vtanh.f32 %v1306_v51 }
 0x13a   : > { %v1912_v54 = vpop.eup %1911  ;;  %1395 = vst [vmem:[%s2102_s29 + $0x98] sm:$0xff] %v1910_v49  ;;  %v1752_v58 = vpop.f32.mrb[26].mxu1  ;;  %v1275_v60 = vadd.f32 %v1720_v57, %v2084_v40  ;;  %1937 = vtanh.f32 %v1272_v55 }
 0x13b   : > { %v1914_v59 = vpop.eup %1913  ;;  %1427 = vst [vmem:[%s2102_s29 + $0x198] sm:$0xff] %v1912_v54  ;;  %v890_v61 = vpop.f32.mrb[27].mxu0  ;;  %v1307_v0 = vadd.f32 %v1752_v58, %v2084_v40  ;;  %1939 = vtanh.f32 %v1304_v56 }
 0x13c   : > { %v1018_v62 = vpop.f32.mrb[27].mxu1  ;;  %v1916_v63 = vpop.eup %1915  ;;  %1393 = vst [vmem:[%s2102_s29 + $0x88] sm:$0xff] %v1914_v59  ;;  %v1273_v2 = vadd.f32 %v2084_v40, %v890_v61  ;;  %1941 = vtanh.f32 %v1275_v60 }
 0x13d   : > { %v1918_v1 = vpop.eup %1917  ;;  %1425 = vst [vmem:[%s2102_s29 + $0x188] sm:$0xff] %v1916_v63  ;;  %v1305_v4 = vadd.f32 %v2084_v40, %v1018_v62  ;;  %1943 = vtanh.f32 %v1307_v0  ;;  %v1723_v7 = vpop.f32.mrb[28].mxu0 }
 0x13e   : > { %v1920_v3 = vpop.eup %1919  ;;  %1398 = vst [vmem:[%s2102_s29 + $0xb0] sm:$0xff] %v1918_v1  ;;  %v1755_v8 = vpop.f32.mrb[28].mxu1  ;;  %1945 = vtanh.f32 %v1273_v2  ;;  %v1278_v10 = vadd.f32 %v1723_v7, %v2084_v40 }
 0x13f   : > { %v1922_v5 = vpop.eup %1921  ;;  %1430 = vst [vmem:[%s2102_s29 + $0x1b0] sm:$0xff] %v1920_v3  ;;  %v1310_v11 = vadd.f32 %v1755_v8, %v2084_v40  ;;  %v903_v12 = vpop.f32.mrb[29].mxu0  ;;  %1947 = vtanh.f32 %v1305_v4 }
 0x140   : > { %v1924_v6 = vpop.eup %1923  ;;  %1396 = vst [vmem:[%s2102_s29 + $0xa0] sm:$0xff] %v1922_v5  ;;  %v1031_v13 = vpop.f32.mrb[29].mxu1  ;;  %v1276_v15 = vadd.f32 %v2084_v40, %v903_v12  ;;  %1949 = vtanh.f32 %v1278_v10 }
 0x141   : > { %v1926_v9 = vpop.eup %1925  ;;  %1428 = vst [vmem:[%s2102_s29 + $0x1a0] sm:$0xff] %v1924_v6  ;;  %v1308_v16 = vadd.f32 %v2084_v40, %v1031_v13  ;;  %v1724_v17 = vpop.f32.mrb[30].mxu0  ;;  %1951 = vtanh.f32 %v1310_v11 }
 0x142   : > { %v1928_v14 = vpop.eup %1927  ;;  %1399 = vst [vmem:[%s2102_s29 + $0xb8] sm:$0xff] %v1926_v9  ;;  %v1756_v18 = vpop.f32.mrb[30].mxu1  ;;  %v1279_v20 = vadd.f32 %v1724_v17, %v2084_v40  ;;  %1953 = vtanh.f32 %v1276_v15 }
 0x143   : > { %v1930_v19 = vpop.eup %1929  ;;  %1431 = vst [vmem:[%s2102_s29 + $0x1b8] sm:$0xff] %v1928_v14  ;;  %v906_v21 = vpop.f32.mrb[31].mxu0  ;;  %v1311_v24 = vadd.f32 %v1756_v18, %v2084_v40  ;;  %1955 = vtanh.f32 %v1308_v16 }
 0x144   : > { %v1034_v22 = vpop.f32.mrb[31].mxu1  ;;  %v1932_v23 = vpop.eup %1931  ;;  %1397 = vst [vmem:[%s2102_s29 + $0xa8] sm:$0xff] %v1930_v19  ;;  %v1277_v26 = vadd.f32 %v2084_v40, %v906_v21  ;;  %1957 = vtanh.f32 %v1279_v20 }
 0x145   : > { %v1934_v25 = vpop.eup %1933  ;;  %1429 = vst [vmem:[%s2102_s29 + $0x1a8] sm:$0xff] %v1932_v23  ;;  %v1309_v28 = vadd.f32 %v2084_v40, %v1034_v22  ;;  %1959 = vtanh.f32 %v1311_v24 }
 0x146   : > { %v1936_v27 = vpop.eup %1935  ;;  %1402 = vst [vmem:[%s2102_s29 + $0xd0] sm:$0xff] %v1934_v25  ;;  %1961 = vtanh.f32 %v1277_v26 }
 0x147   : > { %v1938_v29 = vpop.eup %1937  ;;  %1434 = vst [vmem:[%s2102_s29 + $0x1d0] sm:$0xff] %v1936_v27  ;;  %1963 = vtanh.f32 %v1309_v28 }
 0x148   : > { %v1940_v30 = vpop.eup %1939  ;;  %1400 = vst [vmem:[%s2102_s29 + $0xc0] sm:$0xff] %v1938_v29 }
 0x149   : > { %v1942_v31 = vpop.eup %1941  ;;  %1432 = vst [vmem:[%s2102_s29 + $0x1c0] sm:$0xff] %v1940_v30 }
 0x14a   : > { %v1944_v32 = vpop.eup %1943  ;;  %1403 = vst [vmem:[%s2102_s29 + $0xd8] sm:$0xff] %v1942_v31 }
 0x14b   : > { %v1946_v40 = vpop.eup %1945  ;;  %1435 = vst [vmem:[%s2102_s29 + $0x1d8] sm:$0xff] %v1944_v32 }
 0x14c   : > { %v1948_v33 = vpop.eup %1947  ;;  %1401 = vst [vmem:[%s2102_s29 + $0xc8] sm:$0xff] %v1946_v40 }
 0x14d   : > { %v1950_v34 = vpop.eup %1949  ;;  %1433 = vst [vmem:[%s2102_s29 + $0x1c8] sm:$0xff] %v1948_v33 }
 0x14e   : > { %v1952_v35 = vpop.eup %1951  ;;  %1406 = vst [vmem:[%s2102_s29 + $0xf0] sm:$0xff] %v1950_v34 }
 0x14f   : > { %v1954_v36 = vpop.eup %1953  ;;  %1438 = vst [vmem:[%s2102_s29 + $0x1f0] sm:$0xff] %v1952_v35 }
 0x150   : > { %v1956_v37 = vpop.eup %1955  ;;  %1404 = vst [vmem:[%s2102_s29 + $0xe0] sm:$0xff] %v1954_v36 }
 0x151   : > { %v1958_v38 = vpop.eup %1957  ;;  %1436 = vst [vmem:[%s2102_s29 + $0x1e0] sm:$0xff] %v1956_v37 }
 0x152   : > { %v1960_v39 = vpop.eup %1959  ;;  %1407 = vst [vmem:[%s2102_s29 + $0xf8] sm:$0xff] %v1958_v38 }
 0x153   : > { %v1962_v41 = vpop.eup %1961  ;;  %1439 = vst [vmem:[%s2102_s29 + $0x1f8] sm:$0xff] %v1960_v39 }
 0x154   : > { %v1964_v42 = vpop.eup %1963  ;;  %1405 = vst [vmem:[%s2102_s29 + $0xe8] sm:$0xff] %v1962_v41 }
 0x155   : > { %1437 = vst [vmem:[%s2102_s29 + $0x1e8] sm:$0xff] %v1964_v42 }
 0x156 PF: > { %s13_s14 = sadd.s32 1, %s1987_s14   ;;  %s2233_s12 = smov %s1983_s13 }
 0x157   : > { %p10_p5 = scmp.ge.s32.totalorder %s13_s14, 6   ;;  %s2234_s13 = smov %s2236_s15 }
 0x159   :  { %12 = sbr.rel (!%p10_p5) target bundleno = 2 (0x2), region = 76 }

</bundles_post_ra>
